<compile_context>
chip_gen: v7x
topology: tpu7x:2x2x1
jax: 0.10.0
libtpu: 0.0.40
codegen_flags: <defaults>
</compile_context>

<pallas_src>
import math
import functools

import jax
import jax.numpy as jnp
from jax.experimental import pallas as pl
from jax.experimental.pallas import tpu as pltpu


# ----------------------------- in-kernel helpers -----------------------------

def _layernorm(x, g, b, eps):
    mu = jnp.mean(x, axis=-1, keepdims=True)
    var = jnp.mean((x - mu) ** 2, axis=-1, keepdims=True)
    return (x - mu) * jax.lax.rsqrt(var + eps) * g + b


def _attend(q2, k2, v2, mask_add, wo, bo, *, num_heads, bb, sq, sk):
    """Multi-head attention on already-projected (pre-scaled) tensors.

    q2: (bb*sq, D) f32 (1/sqrt(dh) already folded into the q projection),
    k2/v2: (bb*sk, D) f32.  mask_add: (bb, sq_or_1, sk) additive mask
    (0 = keep, -1e9 = drop).  wo: (D, D) with head-major rows (x @ W layout;
    transposed nn.Linear weight).  bo: (1, D).  Returns (bb*sq, D) f32.
    """
    d = q2.shape[-1]
    dh = d // num_heads
    cdt = wo.dtype

    def to_heads(x2, s):
        # lanes (head-major) -> leading head axis: (bb*s, H*dh) -> (H*bb, s, dh)
        # (lane slices + leading-dim reshapes only: safe Mosaic layout ops)
        x2 = x2.astype(cdt)
        return jnp.concatenate(
            [x2[:, h * dh:(h + 1) * dh].reshape(bb, s, dh)
             for h in range(num_heads)], axis=0)

    qh = to_heads(q2, sq)
    kh = to_heads(k2, sk)
    vh = to_heads(v2, sk)

    # one batched score matmul over all (head, batch) pairs
    s = jnp.einsum('bqd,bkd->bqk', qh, kh, preferred_element_type=jnp.float32)
    # additive mask broadcast over heads (no H-fold replication in VMEM)
    s = (s.reshape(num_heads, bb, sq, sk) + mask_add[None]
         ).reshape(num_heads * bb, sq, sk)
    s = s - jnp.max(s, axis=-1, keepdims=True)
    p = jnp.exp(s)
    inv_l = 1.0 / jnp.sum(p, axis=-1, keepdims=True)       # exact normalization

    ctx = jnp.einsum('bqk,bkd->bqd', p.astype(cdt), vh,
                     preferred_element_type=jnp.float32)    # (H*bb, sq, dh) f32
    ctx = ctx * inv_l                                        # normalize post-PV
    # heads back into lanes, then a single (M, D) @ (D, D) output projection
    ctx2 = jnp.concatenate(
        [ctx[h * bb:(h + 1) * bb].reshape(bb * sq, dh) for h in range(num_heads)],
        axis=-1)
    return jnp.dot(ctx2.astype(cdt), wo, preferred_element_type=jnp.float32) + bo


# -------------------------------- Pallas kernel --------------------------------

def decoder_stack_kernel(x_ref, enc_ref, tm_ref, sm_ref,
                         lng_ref, lnb_ref,
                         wqkv_s_ref, bqkv_s_ref, wo_s_ref, bo_s_ref,
                         wq_c_ref, bq_c_ref, wkv_c_ref, bkv_c_ref,
                         wo_c_ref, bo_c_ref,
                         w1_ref, b1_ref, w2_ref, b2_ref,
                         fg_ref, fb_ref,
                         o_ref, *, num_heads):
    layer = pl.program_id(1)
    n_layers = pl.num_programs(1)

    bb, sq, d = x_ref.shape
    sk = enc_ref.shape[1]
    cdt = w1_ref.dtype                      # compute dtype for matmuls (bf16)

    # o_ref's block index is constant along the (arbitrary) layer axis, so it
    # stays resident in VMEM across the whole layer loop and doubles as the
    # f32 activation accumulator.  Initialize it at layer 0.
    @pl.when(layer == 0)
    def _():
        o_ref[...] = x_ref[...].astype(o_ref.dtype)

    x = o_ref[...].reshape(bb * sq, d)                    # (M, D) f32 resident
    enc = enc_ref[...].reshape(bb * sk, d)
    tmask = tm_ref[...]                                   # (bb, sq, sq) additive
    smask = sm_ref[...]                                   # (bb, 1, sk)  additive
    lng = lng_ref[0]                                      # (3, D)
    lnb = lnb_ref[0]

    # --- 1) masked self-attention (pre-norm, residual; dropout = identity) ---
    h = _layernorm(x, lng[0:1, :], lnb[0:1, :], 1e-6)
    qkv = jnp.dot(h.astype(cdt), wqkv_s_ref[0],
                  preferred_element_type=jnp.float32) + bqkv_s_ref[0]
    x = x + _attend(qkv[:, 0:d], qkv[:, d:2 * d], qkv[:, 2 * d:3 * d],
                    tmask, wo_s_ref[0], bo_s_ref[0],
                    num_heads=num_heads, bb=bb, sq=sq, sk=sq)

    # --- 2) encoder-decoder cross attention ---
    h = _layernorm(x, lng[1:2, :], lnb[1:2, :], 1e-6)
    q = jnp.dot(h.astype(cdt), wq_c_ref[0],
                preferred_element_type=jnp.float32) + bq_c_ref[0]
    kv = jnp.dot(enc.astype(cdt), wkv_c_ref[0],
                 preferred_element_type=jnp.float32) + bkv_c_ref[0]
    x = x + _attend(q, kv[:, 0:d], kv[:, d:2 * d],
                    smask, wo_c_ref[0], bo_c_ref[0],
                    num_heads=num_heads, bb=bb, sq=sq, sk=sk)

    # --- 3) position-wise feed-forward ---
    h = _layernorm(x, lng[2:3, :], lnb[2:3, :], 1e-6)
    f = jnp.maximum(
        jnp.dot(h.astype(cdt), w1_ref[0],
                preferred_element_type=jnp.float32) + b1_ref[0], 0.0)
    x = x + (jnp.dot(f.astype(cdt), w2_ref[0],
                     preferred_element_type=jnp.float32) + b2_ref[0])

    # keep the resident accumulator up to date; fold the final LayerNorm into
    # the last layer step (writeback to HBM only happens once per batch block).
    @pl.when(layer < n_layers - 1)
    def _():
        o_ref[...] = x.reshape(bb, sq, d)

    @pl.when(layer == n_layers - 1)
    def _():
        y = _layernorm(x, fg_ref[...], fb_ref[...], 1e-5)
        o_ref[...] = y.reshape(bb, sq, d)


# ------------------------------- kernel wrapper --------------------------------

def decoder_stack(x_emb, enc, tmask, smask, layers, final_g, final_b,
                  *, num_heads, batch_block=None):
    B, S, D = x_emb.shape
    S_src = enc.shape[1]
    n_layers = layers["ln_g"].shape[0]
    F = layers["w1"].shape[-1]
    dh = D // num_heads

    if batch_block is None:
        # nb = 1 by default: the layer loop runs sequentially on one TensorCore,
        # so splitting the batch only re-streams every layer's weights nb times
        # (pure HBM overhead on v5e/v6e).  On v7x (2 TCs) pass batch_block=B//2
        # to use the "parallel" batch axis; prefer batch_block*S % 256 == 0.
        batch_block = B
    assert B % batch_block == 0
    nb = B // batch_block

    # {0,1} float masks -> additive masks (0 keep, -1e9 drop), built once in XLA.
    # TODO(synk): for causal-only masking at long S, generate the target mask
    # in-kernel with broadcasted_iota instead of streaming a dense (S, S) block.
    tmask_add = (tmask - 1.0) * 1e9
    smask_add = (smask - 1.0) * 1e9

    # Fold the 1/sqrt(dh) attention scale into the query projections so the
    # kernel never scales the (H*bb, S, S) score tensor elementwise.
    scale = 1.0 / math.sqrt(dh)
    qcols = jnp.concatenate([jnp.full((D,), scale, jnp.float32),
                             jnp.ones((2 * D,), jnp.float32)])
    wqkv_s = (layers["self_wqkv"].astype(jnp.float32) * qcols
              ).astype(layers["self_wqkv"].dtype)
    bqkv_s = layers["self_bqkv"] * qcols
    wq_c = (layers["cross_wq"].astype(jnp.float32) * scale
            ).astype(layers["cross_wq"].dtype)
    bq_c = layers["cross_bq"] * scale

    bmap3 = lambda b, l: (b, 0, 0)
    lmap3 = lambda b, l: (l, 0, 0)
    fmap2 = lambda b, l: (0, 0)

    # VMEM budget: double-buffered per-layer weights + resident act/out blocks.
    wdt = jnp.dtype(layers["self_wqkv"].dtype).itemsize
    weight_bytes = (D * 3 * D + 2 * D * D + D * 2 * D + D * F + F * D) * wdt \
                   + (6 * D + 3 * 3 * D + 2 * D + F + 4 * D) * 4
    block_bytes = (2 * batch_block * S * D + batch_block * S_src * D
                   + batch_block * S * S + batch_block * S_src + 2 * D) * 4
    est = 2 * weight_bytes + 2 * block_bytes + (1 << 20)
    try:
        phys_vmem = pltpu.get_tpu_info().vmem_capacity_bytes
    except Exception:
        phys_vmem = 64 * 1024 * 1024      # conservative (v7x per-TC VMEM)
    vmem_limit = int(min(max(2 * est, 32 * 1024 * 1024), 0.9 * phys_vmem))

    kernel = functools.partial(decoder_stack_kernel, num_heads=num_heads)
    return pl.pallas_call(
        kernel,
        out_shape=jax.ShapeDtypeStruct((B, S, D), jnp.float32),
        grid=(nb, n_layers),
        in_specs=[
            pl.BlockSpec((batch_block, S, D), bmap3),        # embedded input
            pl.BlockSpec((batch_block, S_src, D), bmap3),    # encoder outputs
            pl.BlockSpec((batch_block, S, S), bmap3),        # additive target mask
            pl.BlockSpec((batch_block, 1, S_src), bmap3),    # additive source mask
            pl.BlockSpec((1, 3, D), lmap3),                  # LN gammas (3 per layer)
            pl.BlockSpec((1, 3, D), lmap3),                  # LN betas
            pl.BlockSpec((1, D, 3 * D), lmap3),              # self-attn fused Wqkv (q pre-scaled)
            pl.BlockSpec((1, 1, 3 * D), lmap3),              # self-attn fused bqkv
            pl.BlockSpec((1, D, D), lmap3),                  # self-attn Wo (D, D)
            pl.BlockSpec((1, 1, D), lmap3),                  # self-attn bo
            pl.BlockSpec((1, D, D), lmap3),                  # cross-attn Wq (pre-scaled)
            pl.BlockSpec((1, 1, D), lmap3),                  # cross-attn bq
            pl.BlockSpec((1, D, 2 * D), lmap3),              # cross-attn fused Wkv
            pl.BlockSpec((1, 1, 2 * D), lmap3),              # cross-attn fused bkv
            pl.BlockSpec((1, D, D), lmap3),                  # cross-attn Wo (D, D)
            pl.BlockSpec((1, 1, D), lmap3),                  # cross-attn bo
            pl.BlockSpec((1, D, F), lmap3),                  # FFN W1
            pl.BlockSpec((1, 1, F), lmap3),                  # FFN b1
            pl.BlockSpec((1, F, D), lmap3),                  # FFN W2
            pl.BlockSpec((1, 1, D), lmap3),                  # FFN b2
            pl.BlockSpec((1, D), fmap2),                     # final LN gamma
            pl.BlockSpec((1, D), fmap2),                     # final LN beta
        ],
        out_specs=pl.BlockSpec((batch_block, S, D), bmap3),
        compiler_params=pltpu.CompilerParams(
            dimension_semantics=("parallel", "arbitrary"),
            vmem_limit_bytes=vmem_limit),
    )(x_emb, enc, tmask_add, smask_add,
      layers["ln_g"], layers["ln_b"],
      wqkv_s, bqkv_s,
      layers["self_wo"], layers["self_bo"],
      wq_c, bq_c,
      layers["cross_wkv"], layers["cross_bkv"],
      layers["cross_wo"], layers["cross_bo"],
      layers["w1"], layers["b1"], layers["w2"], layers["b2"],
      final_g, final_b)


# ------------------------------- parameter init -------------------------------

def sinusoidal_pos_encoding(max_len, D):
    pos = jnp.arange(max_len, dtype=jnp.float32)[:, None]
    i = jnp.arange(0, D, 2, dtype=jnp.float32)
    angle = pos / jnp.power(10000.0, i / D)
    pe = jnp.zeros((max_len, D), dtype=jnp.float32)
    pe = pe.at[:, 0::2].set(jnp.sin(angle))
    pe = pe.at[:, 1::2].set(jnp.cos(angle))
    return pe


def init_decoder_params(key, vocab, D, max_seq_len, num_layers, num_heads, d_ff,
                        compute_dtype=jnp.bfloat16):
    k_emb, k_layers = jax.random.split(key)
    ks = jax.random.split(k_layers, 7)
    s_d = 1.0 / math.sqrt(D)
    s_f = 1.0 / math.sqrt(d_ff)

    def w(k, shape, scale):
        return (jax.random.normal(k, shape, jnp.float32) * scale).astype(compute_dtype)

    # All weights are in x @ W layout (i.e. the transpose of nn.Linear.weight
    # would be needed when importing PyTorch checkpoints).
    layers = {
        "ln_g": jnp.ones((num_layers, 3, D), jnp.float32),
        "ln_b": jnp.zeros((num_layers, 3, D), jnp.float32),
        "self_wqkv": w(ks[0], (num_layers, D, 3 * D), s_d),
        "self_bqkv": jnp.zeros((num_layers, 1, 3 * D), jnp.float32),
        "self_wo": w(ks[1], (num_layers, D, D), s_d),
        "self_bo": jnp.zeros((num_layers, 1, D), jnp.float32),
        "cross_wq": w(ks[2], (num_layers, D, D), s_d),
        "cross_bq": jnp.zeros((num_layers, 1, D), jnp.float32),
        "cross_wkv": w(ks[3], (num_layers, D, 2 * D), s_d),
        "cross_bkv": jnp.zeros((num_layers, 1, 2 * D), jnp.float32),
        "cross_wo": w(ks[4], (num_layers, D, D), s_d),
        "cross_bo": jnp.zeros((num_layers, 1, D), jnp.float32),
        "w1": w(ks[5], (num_layers, D, d_ff), s_d),
        "b1": jnp.zeros((num_layers, 1, d_ff), jnp.float32),
        "w2": w(ks[6], (num_layers, d_ff, D), s_f),
        "b2": jnp.zeros((num_layers, 1, D), jnp.float32),
    }
    return {
        "embedding": jax.random.normal(k_emb, (vocab, D), jnp.float32) * 0.02,
        "pos_enc": sinusoidal_pos_encoding(max_seq_len, D),
        "final_g": jnp.ones((1, D), jnp.float32),
        "final_b": jnp.zeros((1, D), jnp.float32),
        "layers": layers,
    }


# --------------------------------- forward ------------------------------------

def decoder_forward(params, target_seq, target_mask, encoder_outputs, source_mask,
                    num_heads, batch_block=None):
    # glue: embedding gather + positional encoding (plain XLA ops outside Pallas)
    # TODO(synk): PosEncoder definition not given; no sqrt(D) embedding scaling applied.
    x = params["embedding"][target_seq]                        # (B, S, D)
    S = target_seq.shape[1]
    x = x + params["pos_enc"][:S][None, :, :]
    # whole N-layer decoder stack + final LayerNorm in one fused Pallas kernel
    return decoder_stack(x, encoder_outputs, target_mask, source_mask,
                         params["layers"], params["final_g"], params["final_b"],
                         num_heads=num_heads, batch_block=batch_block)


# ----------------------------------- main --------------------------------------

if __name__ == "__main__":
    B, S_TGT, S_SRC = 2, 8, 8
    VOCAB, D, MAX_LEN = 50, 32, 16
    HEADS, N_LAYERS = 8, 2
    D_FF = 4 * D   # TODO(synk): FeedForward hidden size not given; assume 4*model_dimension

    key = jax.random.PRNGKey(0)
    k_par, k_tgt, k_enc = jax.random.split(key, 3)

    params = init_decoder_params(k_par, VOCAB, D, MAX_LEN, N_LAYERS, HEADS, D_FF)

    target_seq = jax.random.randint(k_tgt, (B, S_TGT), 0, VOCAB, dtype=jnp.int32)
    encoder_outputs = jax.random.normal(k_enc, (B, S_SRC, D), jnp.float32)

    # causal target mask (B, S, S); source padding mask (B, 1, S_src); {0,1} floats
    causal = jnp.tril(jnp.ones((S_TGT, S_TGT), jnp.float32))
    target_mask = jnp.broadcast_to(causal, (B, S_TGT, S_TGT))
    source_mask = jnp.ones((B, 1, S_SRC), jnp.float32)
    source_mask = source_mask.at[1, 0, S_SRC - 1].set(0.0)   # pad last src token of batch 1

    fwd = jax.jit(functools.partial(decoder_forward, num_heads=HEADS))
    out = fwd(params, target_seq, target_mask, encoder_outputs, source_mask)
    out = jax.block_until_ready(out)
    assert out.shape == (B, S_TGT, D)
    assert bool(jnp.all(jnp.isfinite(out)))
    print("KERNEL_OK")
</pallas_src>

<mosaic_0001>
module attributes {stable_mosaic.version = 11 : i64} {
  func.func @decoder_stack_kernel(%arg0: i32, %arg1: i32, %arg2: memref<2x8x32xf32, #tpu.memory_space<vmem>>, %arg3: memref<2x8x32xf32, #tpu.memory_space<vmem>>, %arg4: memref<2x8x8xf32, #tpu.memory_space<vmem>>, %arg5: memref<2x1x8xf32, #tpu.memory_space<vmem>>, %arg6: memref<1x3x32xf32, #tpu.memory_space<vmem>>, %arg7: memref<1x3x32xf32, #tpu.memory_space<vmem>>, %arg8: memref<1x32x96xbf16, #tpu.memory_space<vmem>>, %arg9: memref<1x1x96xf32, #tpu.memory_space<vmem>>, %arg10: memref<1x32x32xbf16, #tpu.memory_space<vmem>>, %arg11: memref<1x1x32xf32, #tpu.memory_space<vmem>>, %arg12: memref<1x32x32xbf16, #tpu.memory_space<vmem>>, %arg13: memref<1x1x32xf32, #tpu.memory_space<vmem>>, %arg14: memref<1x32x64xbf16, #tpu.memory_space<vmem>>, %arg15: memref<1x1x64xf32, #tpu.memory_space<vmem>>, %arg16: memref<1x32x32xbf16, #tpu.memory_space<vmem>>, %arg17: memref<1x1x32xf32, #tpu.memory_space<vmem>>, %arg18: memref<1x32x128xbf16, #tpu.memory_space<vmem>>, %arg19: memref<1x1x128xf32, #tpu.memory_space<vmem>>, %arg20: memref<1x128x32xbf16, #tpu.memory_space<vmem>>, %arg21: memref<1x1x32xf32, #tpu.memory_space<vmem>>, %arg22: memref<1x32xf32, #tpu.memory_space<vmem>>, %arg23: memref<1x32xf32, #tpu.memory_space<vmem>>, %arg24: memref<2x8x32xf32, #tpu.memory_space<vmem>>) attributes {dimension_semantics = [#tpu.dimension_semantics<parallel>, #tpu.dimension_semantics<arbitrary>], iteration_bounds = array<i64: 1, 2>, scalar_prefetch = 0 : i64, scratch_operands = 0 : i64, tpu.core_type = #tpu.core_type<tc>, window_params = [{transform_indices = @transform_0, window_bounds = array<i64: 2, 8, 32>}, {transform_indices = @transform_1, window_bounds = array<i64: 2, 8, 32>}, {transform_indices = @transform_2, window_bounds = array<i64: 2, 8, 8>}, {transform_indices = @transform_3, window_bounds = array<i64: 2, 1, 8>}, {transform_indices = @transform_4, window_bounds = array<i64: 1, 3, 32>}, {transform_indices = @transform_5, window_bounds = array<i64: 1, 3, 32>}, {transform_indices = @transform_6, window_bounds = array<i64: 1, 32, 96>}, {transform_indices = @transform_7, window_bounds = array<i64: 1, 1, 96>}, {transform_indices = @transform_8, window_bounds = array<i64: 1, 32, 32>}, {transform_indices = @transform_9, window_bounds = array<i64: 1, 1, 32>}, {transform_indices = @transform_10, window_bounds = array<i64: 1, 32, 32>}, {transform_indices = @transform_11, window_bounds = array<i64: 1, 1, 32>}, {transform_indices = @transform_12, window_bounds = array<i64: 1, 32, 64>}, {transform_indices = @transform_13, window_bounds = array<i64: 1, 1, 64>}, {transform_indices = @transform_14, window_bounds = array<i64: 1, 32, 32>}, {transform_indices = @transform_15, window_bounds = array<i64: 1, 1, 32>}, {transform_indices = @transform_16, window_bounds = array<i64: 1, 32, 128>}, {transform_indices = @transform_17, window_bounds = array<i64: 1, 1, 128>}, {transform_indices = @transform_18, window_bounds = array<i64: 1, 128, 32>}, {transform_indices = @transform_19, window_bounds = array<i64: 1, 1, 32>}, {pipeline_mode = #tpu.pipeline_mode<synchronous>, transform_indices = @transform_20, window_bounds = array<i64: 1, 32>}, {pipeline_mode = #tpu.pipeline_mode<synchronous>, transform_indices = @transform_21, window_bounds = array<i64: 1, 32>}, {transform_indices = @transform_22, window_bounds = array<i64: 2, 8, 32>}]} {
    %c0_i32 = arith.constant 0 : i32
    %0 = arith.cmpi eq, %arg1, %c0_i32 : i32
    %1 = arith.extui %0 : i1 to i32
    %c0_i32_0 = arith.constant 0 : i32
    %2 = arith.cmpi ne, %1, %c0_i32_0 : i32
    scf.if %2 {
      %c0_95 = arith.constant 0 : index
      %c0_96 = arith.constant 0 : index
      %c0_97 = arith.constant 0 : index
      %337 = vector.load %arg2[%c0_95, %c0_96, %c0_97] : memref<2x8x32xf32, #tpu.memory_space<vmem>>, vector<2x8x32xf32>
      %c0_98 = arith.constant 0 : index
      %c0_99 = arith.constant 0 : index
      %c0_100 = arith.constant 0 : index
      %338 = vector.load %arg24[%c0_98, %c0_99, %c0_100] : memref<2x8x32xf32, #tpu.memory_space<vmem>>, vector<2x8x32xf32>
      tpu.vector_store %arg24[%c0_98, %c0_99, %c0_100], %337 {strides = array<i32>} : memref<2x8x32xf32, #tpu.memory_space<vmem>>, vector<2x8x32xf32>,
    } else {
    }
    %c0 = arith.constant 0 : index
    %c0_1 = arith.constant 0 : index
    %c0_2 = arith.constant 0 : index
    %3 = vector.load %arg24[%c0, %c0_1, %c0_2] : memref<2x8x32xf32, #tpu.memory_space<vmem>>, vector<2x8x32xf32>
    %4 = vector.shape_cast %3 : vector<2x8x32xf32> to vector<16x32xf32>
    %c0_3 = arith.constant 0 : index
    %c0_4 = arith.constant 0 : index
    %c0_5 = arith.constant 0 : index
    %5 = vector.load %arg3[%c0_3, %c0_4, %c0_5] : memref<2x8x32xf32, #tpu.memory_space<vmem>>, vector<2x8x32xf32>
    %6 = vector.shape_cast %5 : vector<2x8x32xf32> to vector<16x32xf32>
    %c0_6 = arith.constant 0 : index
    %c0_7 = arith.constant 0 : index
    %c0_8 = arith.constant 0 : index
    %7 = vector.load %arg4[%c0_6, %c0_7, %c0_8] : memref<2x8x8xf32, #tpu.memory_space<vmem>>, vector<2x8x8xf32>
    %c0_9 = arith.constant 0 : index
    %c0_10 = arith.constant 0 : index
    %c0_11 = arith.constant 0 : index
    %8 = vector.load %arg5[%c0_9, %c0_10, %c0_11] : memref<2x1x8xf32, #tpu.memory_space<vmem>>, vector<2x1x8xf32>
    %c0_12 = arith.constant 0 : index
    %c0_13 = arith.constant 0 : index
    %c0_14 = arith.constant 0 : index
    %9 = vector.load %arg6[%c0_12, %c0_13, %c0_14] : memref<1x3x32xf32, #tpu.memory_space<vmem>>, vector<1x3x32xf32>
    %10 = vector.shape_cast %9 : vector<1x3x32xf32> to vector<3x32xf32>
    %c0_15 = arith.constant 0 : index
    %c0_16 = arith.constant 0 : index
    %c0_17 = arith.constant 0 : index
    %11 = vector.load %arg7[%c0_15, %c0_16, %c0_17] : memref<1x3x32xf32, #tpu.memory_space<vmem>>, vector<1x3x32xf32>
    %12 = vector.shape_cast %11 : vector<1x3x32xf32> to vector<3x32xf32>
    %13 = vector.extract_strided_slice %10 {offsets = [0, 0], sizes = [1, 32], strides = [1, 1]} : vector<3x32xf32> to vector<1x32xf32>
    %14 = vector.extract_strided_slice %12 {offsets = [0, 0], sizes = [1, 32], strides = [1, 1]} : vector<3x32xf32> to vector<1x32xf32>
    %cst = arith.constant dense<0.000000e+00> : vector<16xf32>
    %15 = vector.multi_reduction <add>, %4, %cst [1] : vector<16x32xf32> to vector<16xf32>
    %16 = vector.shape_cast %15 : vector<16xf32> to vector<16x1xf32>
    %cst_18 = arith.constant 3.200000e+01 : f32
    %17 = vector.broadcast %cst_18 : f32 to vector<16x1xf32>
    %18 = arith.divf %16, %17 : vector<16x1xf32>
    %19 = vector.broadcast %18 : vector<16x1xf32> to vector<16x32xf32>
    %20 = arith.subf %4, %19 : vector<16x32xf32>
    %21 = arith.mulf %20, %20 : vector<16x32xf32>
    %cst_19 = arith.constant dense<0.000000e+00> : vector<16xf32>
    %22 = vector.multi_reduction <add>, %21, %cst_19 [1] : vector<16x32xf32> to vector<16xf32>
    %23 = vector.shape_cast %22 : vector<16xf32> to vector<16x1xf32>
    %cst_20 = arith.constant 3.200000e+01 : f32
    %24 = vector.broadcast %cst_20 : f32 to vector<16x1xf32>
    %25 = arith.divf %23, %24 : vector<16x1xf32>
    %26 = vector.broadcast %18 : vector<16x1xf32> to vector<16x32xf32>
    %27 = arith.subf %4, %26 : vector<16x32xf32>
    %cst_21 = arith.constant 9.99999997E-7 : f32
    %28 = vector.broadcast %cst_21 : f32 to vector<16x1xf32>
    %29 = arith.addf %25, %28 : vector<16x1xf32>
    %30 = math.rsqrt %29 : vector<16x1xf32>
    %31 = vector.broadcast %30 : vector<16x1xf32> to vector<16x32xf32>
    %32 = arith.mulf %27, %31 : vector<16x32xf32>
    %33 = vector.broadcast %13 : vector<1x32xf32> to vector<16x32xf32>
    %34 = arith.mulf %32, %33 : vector<16x32xf32>
    %35 = vector.broadcast %14 : vector<1x32xf32> to vector<16x32xf32>
    %36 = arith.addf %34, %35 : vector<16x32xf32>
    %37 = arith.truncf %36 : vector<16x32xf32> to vector<16x32xbf16>
    %c0_22 = arith.constant 0 : index
    %c0_23 = arith.constant 0 : index
    %c0_24 = arith.constant 0 : index
    %38 = vector.load %arg8[%c0_22, %c0_23, %c0_24] : memref<1x32x96xbf16, #tpu.memory_space<vmem>>, vector<1x32x96xbf16>
    %39 = vector.shape_cast %38 : vector<1x32x96xbf16> to vector<32x96xbf16>
    %cst_25 = arith.constant dense<0.000000e+00> : vector<16x96xf32>
    %40 = tpu.matmul %37, %39, %cst_25 {dimension_numbers = #tpu.dot_dimension_numbers<[1], [0], [0], [1], [0, 0, 1, 1], [], []>} : vector<16x32xbf16>, vector<32x96xbf16>, vector<16x96xf32> -> vector<16x96xf32>
    %c0_26 = arith.constant 0 : index
    %c0_27 = arith.constant 0 : index
    %c0_28 = arith.constant 0 : index
    %41 = vector.load %arg9[%c0_26, %c0_27, %c0_28] : memref<1x1x96xf32, #tpu.memory_space<vmem>>, vector<1x1x96xf32>
    %42 = vector.shape_cast %41 : vector<1x1x96xf32> to vector<1x96xf32>
    %43 = vector.broadcast %42 : vector<1x96xf32> to vector<16x96xf32>
    %44 = arith.addf %40, %43 : vector<16x96xf32>
    %45 = vector.extract_strided_slice %44 {offsets = [0, 0], sizes = [16, 32], strides = [1, 1]} : vector<16x96xf32> to vector<16x32xf32>
    %46 = vector.extract_strided_slice %44 {offsets = [0, 32], sizes = [16, 32], strides = [1, 1]} : vector<16x96xf32> to vector<16x32xf32>
    %47 = vector.extract_strided_slice %44 {offsets = [0, 64], sizes = [16, 32], strides = [1, 1]} : vector<16x96xf32> to vector<16x32xf32>
    %c0_29 = arith.constant 0 : index
    %c0_30 = arith.constant 0 : index
    %c0_31 = arith.constant 0 : index
    %48 = vector.load %arg10[%c0_29, %c0_30, %c0_31] : memref<1x32x32xbf16, #tpu.memory_space<vmem>>, vector<1x32x32xbf16>
    %49 = vector.shape_cast %48 : vector<1x32x32xbf16> to vector<32x32xbf16>
    %c0_32 = arith.constant 0 : index
    %c0_33 = arith.constant 0 : index
    %c0_34 = arith.constant 0 : index
    %50 = vector.load %arg11[%c0_32, %c0_33, %c0_34] : memref<1x1x32xf32, #tpu.memory_space<vmem>>, vector<1x1x32xf32>
    %51 = vector.shape_cast %50 : vector<1x1x32xf32> to vector<1x32xf32>
    %52 = arith.truncf %45 : vector<16x32xf32> to vector<16x32xbf16>
    %53 = vector.extract_strided_slice %52 {offsets = [0, 0], sizes = [16, 4], strides = [1, 1]} : vector<16x32xbf16> to vector<16x4xbf16>
    %54 = vector.shape_cast %53 : vector<16x4xbf16> to vector<2x8x4xbf16>
    %55 = vector.extract_strided_slice %52 {offsets = [0, 4], sizes = [16, 4], strides = [1, 1]} : vector<16x32xbf16> to vector<16x4xbf16>
    %56 = vector.shape_cast %55 : vector<16x4xbf16> to vector<2x8x4xbf16>
    %57 = vector.extract_strided_slice %52 {offsets = [0, 8], sizes = [16, 4], strides = [1, 1]} : vector<16x32xbf16> to vector<16x4xbf16>
    %58 = vector.shape_cast %57 : vector<16x4xbf16> to vector<2x8x4xbf16>
    %59 = vector.extract_strided_slice %52 {offsets = [0, 12], sizes = [16, 4], strides = [1, 1]} : vector<16x32xbf16> to vector<16x4xbf16>
    %60 = vector.shape_cast %59 : vector<16x4xbf16> to vector<2x8x4xbf16>
    %61 = vector.extract_strided_slice %52 {offsets = [0, 16], sizes = [16, 4], strides = [1, 1]} : vector<16x32xbf16> to vector<16x4xbf16>
    %62 = vector.shape_cast %61 : vector<16x4xbf16> to vector<2x8x4xbf16>
    %63 = vector.extract_strided_slice %52 {offsets = [0, 20], sizes = [16, 4], strides = [1, 1]} : vector<16x32xbf16> to vector<16x4xbf16>
    %64 = vector.shape_cast %63 : vector<16x4xbf16> to vector<2x8x4xbf16>
    %65 = vector.extract_strided_slice %52 {offsets = [0, 24], sizes = [16, 4], strides = [1, 1]} : vector<16x32xbf16> to vector<16x4xbf16>
    %66 = vector.shape_cast %65 : vector<16x4xbf16> to vector<2x8x4xbf16>
    %67 = vector.extract_strided_slice %52 {offsets = [0, 28], sizes = [16, 4], strides = [1, 1]} : vector<16x32xbf16> to vector<16x4xbf16>
    %68 = vector.shape_cast %67 : vector<16x4xbf16> to vector<2x8x4xbf16>
    %69 = tpu.concatenate %54, %56, %58, %60, %62, %64, %66, %68 in 0 : vector<2x8x4xbf16>, vector<2x8x4xbf16>, vector<2x8x4xbf16>, vector<2x8x4xbf16>, vector<2x8x4xbf16>, vector<2x8x4xbf16>, vector<2x8x4xbf16>, vector<2x8x4xbf16> -> vector<16x8x4xbf16>
    %70 = arith.truncf %46 : vector<16x32xf32> to vector<16x32xbf16>
    %71 = vector.extract_strided_slice %70 {offsets = [0, 0], sizes = [16, 4], strides = [1, 1]} : vector<16x32xbf16> to vector<16x4xbf16>
    %72 = vector.shape_cast %71 : vector<16x4xbf16> to vector<2x8x4xbf16>
    %73 = vector.extract_strided_slice %70 {offsets = [0, 4], sizes = [16, 4], strides = [1, 1]} : vector<16x32xbf16> to vector<16x4xbf16>
    %74 = vector.shape_cast %73 : vector<16x4xbf16> to vector<2x8x4xbf16>
    %75 = vector.extract_strided_slice %70 {offsets = [0, 8], sizes = [16, 4], strides = [1, 1]} : vector<16x32xbf16> to vector<16x4xbf16>
    %76 = vector.shape_cast %75 : vector<16x4xbf16> to vector<2x8x4xbf16>
    %77 = vector.extract_strided_slice %70 {offsets = [0, 12], sizes = [16, 4], strides = [1, 1]} : vector<16x32xbf16> to vector<16x4xbf16>
    %78 = vector.shape_cast %77 : vector<16x4xbf16> to vector<2x8x4xbf16>
    %79 = vector.extract_strided_slice %70 {offsets = [0, 16], sizes = [16, 4], strides = [1, 1]} : vector<16x32xbf16> to vector<16x4xbf16>
    %80 = vector.shape_cast %79 : vector<16x4xbf16> to vector<2x8x4xbf16>
    %81 = vector.extract_strided_slice %70 {offsets = [0, 20], sizes = [16, 4], strides = [1, 1]} : vector<16x32xbf16> to vector<16x4xbf16>
    %82 = vector.shape_cast %81 : vector<16x4xbf16> to vector<2x8x4xbf16>
    %83 = vector.extract_strided_slice %70 {offsets = [0, 24], sizes = [16, 4], strides = [1, 1]} : vector<16x32xbf16> to vector<16x4xbf16>
    %84 = vector.shape_cast %83 : vector<16x4xbf16> to vector<2x8x4xbf16>
    %85 = vector.extract_strided_slice %70 {offsets = [0, 28], sizes = [16, 4], strides = [1, 1]} : vector<16x32xbf16> to vector<16x4xbf16>
    %86 = vector.shape_cast %85 : vector<16x4xbf16> to vector<2x8x4xbf16>
    %87 = tpu.concatenate %72, %74, %76, %78, %80, %82, %84, %86 in 0 : vector<2x8x4xbf16>, vector<2x8x4xbf16>, vector<2x8x4xbf16>, vector<2x8x4xbf16>, vector<2x8x4xbf16>, vector<2x8x4xbf16>, vector<2x8x4xbf16>, vector<2x8x4xbf16> -> vector<16x8x4xbf16>
    %88 = arith.truncf %47 : vector<16x32xf32> to vector<16x32xbf16>
    %89 = vector.extract_strided_slice %88 {offsets = [0, 0], sizes = [16, 4], strides = [1, 1]} : vector<16x32xbf16> to vector<16x4xbf16>
    %90 = vector.shape_cast %89 : vector<16x4xbf16> to vector<2x8x4xbf16>
    %91 = vector.extract_strided_slice %88 {offsets = [0, 4], sizes = [16, 4], strides = [1, 1]} : vector<16x32xbf16> to vector<16x4xbf16>
    %92 = vector.shape_cast %91 : vector<16x4xbf16> to vector<2x8x4xbf16>
    %93 = vector.extract_strided_slice %88 {offsets = [0, 8], sizes = [16, 4], strides = [1, 1]} : vector<16x32xbf16> to vector<16x4xbf16>
    %94 = vector.shape_cast %93 : vector<16x4xbf16> to vector<2x8x4xbf16>
    %95 = vector.extract_strided_slice %88 {offsets = [0, 12], sizes = [16, 4], strides = [1, 1]} : vector<16x32xbf16> to vector<16x4xbf16>
    %96 = vector.shape_cast %95 : vector<16x4xbf16> to vector<2x8x4xbf16>
    %97 = vector.extract_strided_slice %88 {offsets = [0, 16], sizes = [16, 4], strides = [1, 1]} : vector<16x32xbf16> to vector<16x4xbf16>
    %98 = vector.shape_cast %97 : vector<16x4xbf16> to vector<2x8x4xbf16>
    %99 = vector.extract_strided_slice %88 {offsets = [0, 20], sizes = [16, 4], strides = [1, 1]} : vector<16x32xbf16> to vector<16x4xbf16>
    %100 = vector.shape_cast %99 : vector<16x4xbf16> to vector<2x8x4xbf16>
    %101 = vector.extract_strided_slice %88 {offsets = [0, 24], sizes = [16, 4], strides = [1, 1]} : vector<16x32xbf16> to vector<16x4xbf16>
    %102 = vector.shape_cast %101 : vector<16x4xbf16> to vector<2x8x4xbf16>
    %103 = vector.extract_strided_slice %88 {offsets = [0, 28], sizes = [16, 4], strides = [1, 1]} : vector<16x32xbf16> to vector<16x4xbf16>
    %104 = vector.shape_cast %103 : vector<16x4xbf16> to vector<2x8x4xbf16>
    %105 = tpu.concatenate %90, %92, %94, %96, %98, %100, %102, %104 in 0 : vector<2x8x4xbf16>, vector<2x8x4xbf16>, vector<2x8x4xbf16>, vector<2x8x4xbf16>, vector<2x8x4xbf16>, vector<2x8x4xbf16>, vector<2x8x4xbf16>, vector<2x8x4xbf16> -> vector<16x8x4xbf16>
    "tpu.trace_start"() <{level = 10 : i32, message = "bqd,bkd->bqk"}> : () -> ()
    %cst_35 = arith.constant dense<0.000000e+00> : vector<16x8x8xf32>
    %106 = tpu.matmul %69, %87, %cst_35 {dimension_numbers = #tpu.dot_dimension_numbers<[2], [2], [1], [1], [0, 0, 0, 1, 1, 1], [0], [0]>} : vector<16x8x4xbf16>, vector<16x8x4xbf16>, vector<16x8x8xf32> -> vector<16x8x8xf32>
    "tpu.trace_stop"() : () -> ()
    %107 = vector.shape_cast %106 : vector<16x8x8xf32> to vector<8x2x8x8xf32>
    %108 = vector.shape_cast %7 : vector<2x8x8xf32> to vector<1x2x8x8xf32>
    %109 = vector.broadcast %108 : vector<1x2x8x8xf32> to vector<8x2x8x8xf32>
    %110 = arith.addf %107, %109 : vector<8x2x8x8xf32>
    %111 = vector.shape_cast %110 : vector<8x2x8x8xf32> to vector<16x8x8xf32>
    %cst_36 = arith.constant dense<0xFF800000> : vector<16x8xf32>
    %112 = vector.multi_reduction <maximumf>, %111, %cst_36 [2] : vector<16x8x8xf32> to vector<16x8xf32>
    %113 = vector.shape_cast %112 : vector<16x8xf32> to vector<16x8x1xf32>
    %114 = vector.broadcast %113 : vector<16x8x1xf32> to vector<16x8x8xf32>
    %115 = arith.subf %111, %114 : vector<16x8x8xf32>
    %116 = math.exp %115 : vector<16x8x8xf32>
    %cst_37 = arith.constant dense<0.000000e+00> : vector<16x8xf32>
    %117 = vector.multi_reduction <add>, %116, %cst_37 [2] : vector<16x8x8xf32> to vector<16x8xf32>
    %118 = vector.shape_cast %117 : vector<16x8xf32> to vector<16x8x1xf32>
    %cst_38 = arith.constant 1.000000e+00 : f32
    %119 = vector.broadcast %cst_38 : f32 to vector<16x8x1xf32>
    %120 = arith.divf %119, %118 : vector<16x8x1xf32>
    %121 = arith.truncf %116 : vector<16x8x8xf32> to vector<16x8x8xbf16>
    "tpu.trace_start"() <{level = 10 : i32, message = "bqk,bkd->bqd"}> : () -> ()
    %cst_39 = arith.constant dense<0.000000e+00> : vector<16x8x4xf32>
    %122 = tpu.matmul %121, %105, %cst_39 {dimension_numbers = #tpu.dot_dimension_numbers<[2], [1], [1], [2], [0, 0, 0, 1, 1, 2], [0], [0]>} : vector<16x8x8xbf16>, vector<16x8x4xbf16>, vector<16x8x4xf32> -> vector<16x8x4xf32>
    "tpu.trace_stop"() : () -> ()
    %123 = vector.broadcast %120 : vector<16x8x1xf32> to vector<16x8x4xf32>
    %124 = arith.mulf %122, %123 : vector<16x8x4xf32>
    %125 = vector.extract_strided_slice %124 {offsets = [0, 0, 0], sizes = [2, 8, 4], strides = [1, 1, 1]} : vector<16x8x4xf32> to vector<2x8x4xf32>
    %126 = vector.shape_cast %125 : vector<2x8x4xf32> to vector<16x4xf32>
    %127 = vector.extract_strided_slice %124 {offsets = [2, 0, 0], sizes = [2, 8, 4], strides = [1, 1, 1]} : vector<16x8x4xf32> to vector<2x8x4xf32>
    %128 = vector.shape_cast %127 : vector<2x8x4xf32> to vector<16x4xf32>
    %129 = vector.extract_strided_slice %124 {offsets = [4, 0, 0], sizes = [2, 8, 4], strides = [1, 1, 1]} : vector<16x8x4xf32> to vector<2x8x4xf32>
    %130 = vector.shape_cast %129 : vector<2x8x4xf32> to vector<16x4xf32>
    %131 = vector.extract_strided_slice %124 {offsets = [6, 0, 0], sizes = [2, 8, 4], strides = [1, 1, 1]} : vector<16x8x4xf32> to vector<2x8x4xf32>
    %132 = vector.shape_cast %131 : vector<2x8x4xf32> to vector<16x4xf32>
    %133 = vector.extract_strided_slice %124 {offsets = [8, 0, 0], sizes = [2, 8, 4], strides = [1, 1, 1]} : vector<16x8x4xf32> to vector<2x8x4xf32>
    %134 = vector.shape_cast %133 : vector<2x8x4xf32> to vector<16x4xf32>
    %135 = vector.extract_strided_slice %124 {offsets = [10, 0, 0], sizes = [2, 8, 4], strides = [1, 1, 1]} : vector<16x8x4xf32> to vector<2x8x4xf32>
    %136 = vector.shape_cast %135 : vector<2x8x4xf32> to vector<16x4xf32>
    %137 = vector.extract_strided_slice %124 {offsets = [12, 0, 0], sizes = [2, 8, 4], strides = [1, 1, 1]} : vector<16x8x4xf32> to vector<2x8x4xf32>
    %138 = vector.shape_cast %137 : vector<2x8x4xf32> to vector<16x4xf32>
    %139 = vector.extract_strided_slice %124 {offsets = [14, 0, 0], sizes = [2, 8, 4], strides = [1, 1, 1]} : vector<16x8x4xf32> to vector<2x8x4xf32>
    %140 = vector.shape_cast %139 : vector<2x8x4xf32> to vector<16x4xf32>
    %141 = tpu.concatenate %126, %128, %130, %132, %134, %136, %138, %140 in 1 : vector<16x4xf32>, vector<16x4xf32>, vector<16x4xf32>, vector<16x4xf32>, vector<16x4xf32>, vector<16x4xf32>, vector<16x4xf32>, vector<16x4xf32> -> vector<16x32xf32>
    %142 = arith.truncf %141 : vector<16x32xf32> to vector<16x32xbf16>
    %cst_40 = arith.constant dense<0.000000e+00> : vector<16x32xf32>
    %143 = tpu.matmul %142, %49, %cst_40 {dimension_numbers = #tpu.dot_dimension_numbers<[1], [0], [0], [1], [0, 0, 1, 1], [], []>} : vector<16x32xbf16>, vector<32x32xbf16>, vector<16x32xf32> -> vector<16x32xf32>
    %144 = vector.broadcast %51 : vector<1x32xf32> to vector<16x32xf32>
    %145 = arith.addf %143, %144 : vector<16x32xf32>
    %146 = arith.addf %4, %145 : vector<16x32xf32>
    %147 = vector.extract_strided_slice %10 {offsets = [1, 0], sizes = [1, 32], strides = [1, 1]} : vector<3x32xf32> to vector<1x32xf32>
    %148 = vector.extract_strided_slice %12 {offsets = [1, 0], sizes = [1, 32], strides = [1, 1]} : vector<3x32xf32> to vector<1x32xf32>
    %cst_41 = arith.constant dense<0.000000e+00> : vector<16xf32>
    %149 = vector.multi_reduction <add>, %146, %cst_41 [1] : vector<16x32xf32> to vector<16xf32>
    %150 = vector.shape_cast %149 : vector<16xf32> to vector<16x1xf32>
    %cst_42 = arith.constant 3.200000e+01 : f32
    %151 = vector.broadcast %cst_42 : f32 to vector<16x1xf32>
    %152 = arith.divf %150, %151 : vector<16x1xf32>
    %153 = vector.broadcast %152 : vector<16x1xf32> to vector<16x32xf32>
    %154 = arith.subf %146, %153 : vector<16x32xf32>
    %155 = arith.mulf %154, %154 : vector<16x32xf32>
    %cst_43 = arith.constant dense<0.000000e+00> : vector<16xf32>
    %156 = vector.multi_reduction <add>, %155, %cst_43 [1] : vector<16x32xf32> to vector<16xf32>
    %157 = vector.shape_cast %156 : vector<16xf32> to vector<16x1xf32>
    %cst_44 = arith.constant 3.200000e+01 : f32
    %158 = vector.broadcast %cst_44 : f32 to vector<16x1xf32>
    %159 = arith.divf %157, %158 : vector<16x1xf32>
    %160 = vector.broadcast %152 : vector<16x1xf32> to vector<16x32xf32>
    %161 = arith.subf %146, %160 : vector<16x32xf32>
    %cst_45 = arith.constant 9.99999997E-7 : f32
    %162 = vector.broadcast %cst_45 : f32 to vector<16x1xf32>
    %163 = arith.addf %159, %162 : vector<16x1xf32>
    %164 = math.rsqrt %163 : vector<16x1xf32>
    %165 = vector.broadcast %164 : vector<16x1xf32> to vector<16x32xf32>
    %166 = arith.mulf %161, %165 : vector<16x32xf32>
    %167 = vector.broadcast %147 : vector<1x32xf32> to vector<16x32xf32>
    %168 = arith.mulf %166, %167 : vector<16x32xf32>
    %169 = vector.broadcast %148 : vector<1x32xf32> to vector<16x32xf32>
    %170 = arith.addf %168, %169 : vector<16x32xf32>
    %171 = arith.truncf %170 : vector<16x32xf32> to vector<16x32xbf16>
    %c0_46 = arith.constant 0 : index
    %c0_47 = arith.constant 0 : index
    %c0_48 = arith.constant 0 : index
    %172 = vector.load %arg12[%c0_46, %c0_47, %c0_48] : memref<1x32x32xbf16, #tpu.memory_space<vmem>>, vector<1x32x32xbf16>
    %173 = vector.shape_cast %172 : vector<1x32x32xbf16> to vector<32x32xbf16>
    %cst_49 = arith.constant dense<0.000000e+00> : vector<16x32xf32>
    %174 = tpu.matmul %171, %173, %cst_49 {dimension_numbers = #tpu.dot_dimension_numbers<[1], [0], [0], [1], [0, 0, 1, 1], [], []>} : vector<16x32xbf16>, vector<32x32xbf16>, vector<16x32xf32> -> vector<16x32xf32>
    %c0_50 = arith.constant 0 : index
    %c0_51 = arith.constant 0 : index
    %c0_52 = arith.constant 0 : index
    %175 = vector.load %arg13[%c0_50, %c0_51, %c0_52] : memref<1x1x32xf32, #tpu.memory_space<vmem>>, vector<1x1x32xf32>
    %176 = vector.shape_cast %175 : vector<1x1x32xf32> to vector<1x32xf32>
    %177 = vector.broadcast %176 : vector<1x32xf32> to vector<16x32xf32>
    %178 = arith.addf %174, %177 : vector<16x32xf32>
    %179 = arith.truncf %6 : vector<16x32xf32> to vector<16x32xbf16>
    %c0_53 = arith.constant 0 : index
    %c0_54 = arith.constant 0 : index
    %c0_55 = arith.constant 0 : index
    %180 = vector.load %arg14[%c0_53, %c0_54, %c0_55] : memref<1x32x64xbf16, #tpu.memory_space<vmem>>, vector<1x32x64xbf16>
    %181 = vector.shape_cast %180 : vector<1x32x64xbf16> to vector<32x64xbf16>
    %cst_56 = arith.constant dense<0.000000e+00> : vector<16x64xf32>
    %182 = tpu.matmul %179, %181, %cst_56 {dimension_numbers = #tpu.dot_dimension_numbers<[1], [0], [0], [1], [0, 0, 1, 1], [], []>} : vector<16x32xbf16>, vector<32x64xbf16>, vector<16x64xf32> -> vector<16x64xf32>
    %c0_57 = arith.constant 0 : index
    %c0_58 = arith.constant 0 : index
    %c0_59 = arith.constant 0 : index
    %183 = vector.load %arg15[%c0_57, %c0_58, %c0_59] : memref<1x1x64xf32, #tpu.memory_space<vmem>>, vector<1x1x64xf32>
    %184 = vector.shape_cast %183 : vector<1x1x64xf32> to vector<1x64xf32>
    %185 = vector.broadcast %184 : vector<1x64xf32> to vector<16x64xf32>
    %186 = arith.addf %182, %185 : vector<16x64xf32>
    %187 = vector.extract_strided_slice %186 {offsets = [0, 0], sizes = [16, 32], strides = [1, 1]} : vector<16x64xf32> to vector<16x32xf32>
    %188 = vector.extract_strided_slice %186 {offsets = [0, 32], sizes = [16, 32], strides = [1, 1]} : vector<16x64xf32> to vector<16x32xf32>
    %c0_60 = arith.constant 0 : index
    %c0_61 = arith.constant 0 : index
    %c0_62 = arith.constant 0 : index
    %189 = vector.load %arg16[%c0_60, %c0_61, %c0_62] : memref<1x32x32xbf16, #tpu.memory_space<vmem>>, vector<1x32x32xbf16>
    %190 = vector.shape_cast %189 : vector<1x32x32xbf16> to vector<32x32xbf16>
    %c0_63 = arith.constant 0 : index
    %c0_64 = arith.constant 0 : index
    %c0_65 = arith.constant 0 : index
    %191 = vector.load %arg17[%c0_63, %c0_64, %c0_65] : memref<1x1x32xf32, #tpu.memory_space<vmem>>, vector<1x1x32xf32>
    %192 = vector.shape_cast %191 : vector<1x1x32xf32> to vector<1x32xf32>
    %193 = arith.truncf %178 : vector<16x32xf32> to vector<16x32xbf16>
    %194 = vector.extract_strided_slice %193 {offsets = [0, 0], sizes = [16, 4], strides = [1, 1]} : vector<16x32xbf16> to vector<16x4xbf16>
    %195 = vector.shape_cast %194 : vector<16x4xbf16> to vector<2x8x4xbf16>
    %196 = vector.extract_strided_slice %193 {offsets = [0, 4], sizes = [16, 4], strides = [1, 1]} : vector<16x32xbf16> to vector<16x4xbf16>
    %197 = vector.shape_cast %196 : vector<16x4xbf16> to vector<2x8x4xbf16>
    %198 = vector.extract_strided_slice %193 {offsets = [0, 8], sizes = [16, 4], strides = [1, 1]} : vector<16x32xbf16> to vector<16x4xbf16>
    %199 = vector.shape_cast %198 : vector<16x4xbf16> to vector<2x8x4xbf16>
    %200 = vector.extract_strided_slice %193 {offsets = [0, 12], sizes = [16, 4], strides = [1, 1]} : vector<16x32xbf16> to vector<16x4xbf16>
    %201 = vector.shape_cast %200 : vector<16x4xbf16> to vector<2x8x4xbf16>
    %202 = vector.extract_strided_slice %193 {offsets = [0, 16], sizes = [16, 4], strides = [1, 1]} : vector<16x32xbf16> to vector<16x4xbf16>
    %203 = vector.shape_cast %202 : vector<16x4xbf16> to vector<2x8x4xbf16>
    %204 = vector.extract_strided_slice %193 {offsets = [0, 20], sizes = [16, 4], strides = [1, 1]} : vector<16x32xbf16> to vector<16x4xbf16>
    %205 = vector.shape_cast %204 : vector<16x4xbf16> to vector<2x8x4xbf16>
    %206 = vector.extract_strided_slice %193 {offsets = [0, 24], sizes = [16, 4], strides = [1, 1]} : vector<16x32xbf16> to vector<16x4xbf16>
    %207 = vector.shape_cast %206 : vector<16x4xbf16> to vector<2x8x4xbf16>
    %208 = vector.extract_strided_slice %193 {offsets = [0, 28], sizes = [16, 4], strides = [1, 1]} : vector<16x32xbf16> to vector<16x4xbf16>
    %209 = vector.shape_cast %208 : vector<16x4xbf16> to vector<2x8x4xbf16>
    %210 = tpu.concatenate %195, %197, %199, %201, %203, %205, %207, %209 in 0 : vector<2x8x4xbf16>, vector<2x8x4xbf16>, vector<2x8x4xbf16>, vector<2x8x4xbf16>, vector<2x8x4xbf16>, vector<2x8x4xbf16>, vector<2x8x4xbf16>, vector<2x8x4xbf16> -> vector<16x8x4xbf16>
    %211 = arith.truncf %187 : vector<16x32xf32> to vector<16x32xbf16>
    %212 = vector.extract_strided_slice %211 {offsets = [0, 0], sizes = [16, 4], strides = [1, 1]} : vector<16x32xbf16> to vector<16x4xbf16>
    %213 = vector.shape_cast %212 : vector<16x4xbf16> to vector<2x8x4xbf16>
    %214 = vector.extract_strided_slice %211 {offsets = [0, 4], sizes = [16, 4], strides = [1, 1]} : vector<16x32xbf16> to vector<16x4xbf16>
    %215 = vector.shape_cast %214 : vector<16x4xbf16> to vector<2x8x4xbf16>
    %216 = vector.extract_strided_slice %211 {offsets = [0, 8], sizes = [16, 4], strides = [1, 1]} : vector<16x32xbf16> to vector<16x4xbf16>
    %217 = vector.shape_cast %216 : vector<16x4xbf16> to vector<2x8x4xbf16>
    %218 = vector.extract_strided_slice %211 {offsets = [0, 12], sizes = [16, 4], strides = [1, 1]} : vector<16x32xbf16> to vector<16x4xbf16>
    %219 = vector.shape_cast %218 : vector<16x4xbf16> to vector<2x8x4xbf16>
    %220 = vector.extract_strided_slice %211 {offsets = [0, 16], sizes = [16, 4], strides = [1, 1]} : vector<16x32xbf16> to vector<16x4xbf16>
    %221 = vector.shape_cast %220 : vector<16x4xbf16> to vector<2x8x4xbf16>
    %222 = vector.extract_strided_slice %211 {offsets = [0, 20], sizes = [16, 4], strides = [1, 1]} : vector<16x32xbf16> to vector<16x4xbf16>
    %223 = vector.shape_cast %222 : vector<16x4xbf16> to vector<2x8x4xbf16>
    %224 = vector.extract_strided_slice %211 {offsets = [0, 24], sizes = [16, 4], strides = [1, 1]} : vector<16x32xbf16> to vector<16x4xbf16>
    %225 = vector.shape_cast %224 : vector<16x4xbf16> to vector<2x8x4xbf16>
    %226 = vector.extract_strided_slice %211 {offsets = [0, 28], sizes = [16, 4], strides = [1, 1]} : vector<16x32xbf16> to vector<16x4xbf16>
    %227 = vector.shape_cast %226 : vector<16x4xbf16> to vector<2x8x4xbf16>
    %228 = tpu.concatenate %213, %215, %217, %219, %221, %223, %225, %227 in 0 : vector<2x8x4xbf16>, vector<2x8x4xbf16>, vector<2x8x4xbf16>, vector<2x8x4xbf16>, vector<2x8x4xbf16>, vector<2x8x4xbf16>, vector<2x8x4xbf16>, vector<2x8x4xbf16> -> vector<16x8x4xbf16>
    %229 = arith.truncf %188 : vector<16x32xf32> to vector<16x32xbf16>
    %230 = vector.extract_strided_slice %229 {offsets = [0, 0], sizes = [16, 4], strides = [1, 1]} : vector<16x32xbf16> to vector<16x4xbf16>
    %231 = vector.shape_cast %230 : vector<16x4xbf16> to vector<2x8x4xbf16>
    %232 = vector.extract_strided_slice %229 {offsets = [0, 4], sizes = [16, 4], strides = [1, 1]} : vector<16x32xbf16> to vector<16x4xbf16>
    %233 = vector.shape_cast %232 : vector<16x4xbf16> to vector<2x8x4xbf16>
    %234 = vector.extract_strided_slice %229 {offsets = [0, 8], sizes = [16, 4], strides = [1, 1]} : vector<16x32xbf16> to vector<16x4xbf16>
    %235 = vector.shape_cast %234 : vector<16x4xbf16> to vector<2x8x4xbf16>
    %236 = vector.extract_strided_slice %229 {offsets = [0, 12], sizes = [16, 4], strides = [1, 1]} : vector<16x32xbf16> to vector<16x4xbf16>
    %237 = vector.shape_cast %236 : vector<16x4xbf16> to vector<2x8x4xbf16>
    %238 = vector.extract_strided_slice %229 {offsets = [0, 16], sizes = [16, 4], strides = [1, 1]} : vector<16x32xbf16> to vector<16x4xbf16>
    %239 = vector.shape_cast %238 : vector<16x4xbf16> to vector<2x8x4xbf16>
    %240 = vector.extract_strided_slice %229 {offsets = [0, 20], sizes = [16, 4], strides = [1, 1]} : vector<16x32xbf16> to vector<16x4xbf16>
    %241 = vector.shape_cast %240 : vector<16x4xbf16> to vector<2x8x4xbf16>
    %242 = vector.extract_strided_slice %229 {offsets = [0, 24], sizes = [16, 4], strides = [1, 1]} : vector<16x32xbf16> to vector<16x4xbf16>
    %243 = vector.shape_cast %242 : vector<16x4xbf16> to vector<2x8x4xbf16>
    %244 = vector.extract_strided_slice %229 {offsets = [0, 28], sizes = [16, 4], strides = [1, 1]} : vector<16x32xbf16> to vector<16x4xbf16>
    %245 = vector.shape_cast %244 : vector<16x4xbf16> to vector<2x8x4xbf16>
    %246 = tpu.concatenate %231, %233, %235, %237, %239, %241, %243, %245 in 0 : vector<2x8x4xbf16>, vector<2x8x4xbf16>, vector<2x8x4xbf16>, vector<2x8x4xbf16>, vector<2x8x4xbf16>, vector<2x8x4xbf16>, vector<2x8x4xbf16>, vector<2x8x4xbf16> -> vector<16x8x4xbf16>
    "tpu.trace_start"() <{level = 10 : i32, message = "bqd,bkd->bqk"}> : () -> ()
    %cst_66 = arith.constant dense<0.000000e+00> : vector<16x8x8xf32>
    %247 = tpu.matmul %210, %228, %cst_66 {dimension_numbers = #tpu.dot_dimension_numbers<[2], [2], [1], [1], [0, 0, 0, 1, 1, 1], [0], [0]>} : vector<16x8x4xbf16>, vector<16x8x4xbf16>, vector<16x8x8xf32> -> vector<16x8x8xf32>
    "tpu.trace_stop"() : () -> ()
    %248 = vector.shape_cast %247 : vector<16x8x8xf32> to vector<8x2x8x8xf32>
    %249 = vector.shape_cast %8 : vector<2x1x8xf32> to vector<1x2x1x8xf32>
    %250 = vector.broadcast %249 : vector<1x2x1x8xf32> to vector<8x2x8x8xf32>
    %251 = arith.addf %248, %250 : vector<8x2x8x8xf32>
    %252 = vector.shape_cast %251 : vector<8x2x8x8xf32> to vector<16x8x8xf32>
    %cst_67 = arith.constant dense<0xFF800000> : vector<16x8xf32>
    %253 = vector.multi_reduction <maximumf>, %252, %cst_67 [2] : vector<16x8x8xf32> to vector<16x8xf32>
    %254 = vector.shape_cast %253 : vector<16x8xf32> to vector<16x8x1xf32>
    %255 = vector.broadcast %254 : vector<16x8x1xf32> to vector<16x8x8xf32>
    %256 = arith.subf %252, %255 : vector<16x8x8xf32>
    %257 = math.exp %256 : vector<16x8x8xf32>
    %cst_68 = arith.constant dense<0.000000e+00> : vector<16x8xf32>
    %258 = vector.multi_reduction <add>, %257, %cst_68 [2] : vector<16x8x8xf32> to vector<16x8xf32>
    %259 = vector.shape_cast %258 : vector<16x8xf32> to vector<16x8x1xf32>
    %cst_69 = arith.constant 1.000000e+00 : f32
    %260 = vector.broadcast %cst_69 : f32 to vector<16x8x1xf32>
    %261 = arith.divf %260, %259 : vector<16x8x1xf32>
    %262 = arith.truncf %257 : vector<16x8x8xf32> to vector<16x8x8xbf16>
    "tpu.trace_start"() <{level = 10 : i32, message = "bqk,bkd->bqd"}> : () -> ()
    %cst_70 = arith.constant dense<0.000000e+00> : vector<16x8x4xf32>
    %263 = tpu.matmul %262, %246, %cst_70 {dimension_numbers = #tpu.dot_dimension_numbers<[2], [1], [1], [2], [0, 0, 0, 1, 1, 2], [0], [0]>} : vector<16x8x8xbf16>, vector<16x8x4xbf16>, vector<16x8x4xf32> -> vector<16x8x4xf32>
    "tpu.trace_stop"() : () -> ()
    %264 = vector.broadcast %261 : vector<16x8x1xf32> to vector<16x8x4xf32>
    %265 = arith.mulf %263, %264 : vector<16x8x4xf32>
    %266 = vector.extract_strided_slice %265 {offsets = [0, 0, 0], sizes = [2, 8, 4], strides = [1, 1, 1]} : vector<16x8x4xf32> to vector<2x8x4xf32>
    %267 = vector.shape_cast %266 : vector<2x8x4xf32> to vector<16x4xf32>
    %268 = vector.extract_strided_slice %265 {offsets = [2, 0, 0], sizes = [2, 8, 4], strides = [1, 1, 1]} : vector<16x8x4xf32> to vector<2x8x4xf32>
    %269 = vector.shape_cast %268 : vector<2x8x4xf32> to vector<16x4xf32>
    %270 = vector.extract_strided_slice %265 {offsets = [4, 0, 0], sizes = [2, 8, 4], strides = [1, 1, 1]} : vector<16x8x4xf32> to vector<2x8x4xf32>
    %271 = vector.shape_cast %270 : vector<2x8x4xf32> to vector<16x4xf32>
    %272 = vector.extract_strided_slice %265 {offsets = [6, 0, 0], sizes = [2, 8, 4], strides = [1, 1, 1]} : vector<16x8x4xf32> to vector<2x8x4xf32>
    %273 = vector.shape_cast %272 : vector<2x8x4xf32> to vector<16x4xf32>
    %274 = vector.extract_strided_slice %265 {offsets = [8, 0, 0], sizes = [2, 8, 4], strides = [1, 1, 1]} : vector<16x8x4xf32> to vector<2x8x4xf32>
    %275 = vector.shape_cast %274 : vector<2x8x4xf32> to vector<16x4xf32>
    %276 = vector.extract_strided_slice %265 {offsets = [10, 0, 0], sizes = [2, 8, 4], strides = [1, 1, 1]} : vector<16x8x4xf32> to vector<2x8x4xf32>
    %277 = vector.shape_cast %276 : vector<2x8x4xf32> to vector<16x4xf32>
    %278 = vector.extract_strided_slice %265 {offsets = [12, 0, 0], sizes = [2, 8, 4], strides = [1, 1, 1]} : vector<16x8x4xf32> to vector<2x8x4xf32>
    %279 = vector.shape_cast %278 : vector<2x8x4xf32> to vector<16x4xf32>
    %280 = vector.extract_strided_slice %265 {offsets = [14, 0, 0], sizes = [2, 8, 4], strides = [1, 1, 1]} : vector<16x8x4xf32> to vector<2x8x4xf32>
    %281 = vector.shape_cast %280 : vector<2x8x4xf32> to vector<16x4xf32>
    %282 = tpu.concatenate %267, %269, %271, %273, %275, %277, %279, %281 in 1 : vector<16x4xf32>, vector<16x4xf32>, vector<16x4xf32>, vector<16x4xf32>, vector<16x4xf32>, vector<16x4xf32>, vector<16x4xf32>, vector<16x4xf32> -> vector<16x32xf32>
    %283 = arith.truncf %282 : vector<16x32xf32> to vector<16x32xbf16>
    %cst_71 = arith.constant dense<0.000000e+00> : vector<16x32xf32>
    %284 = tpu.matmul %283, %190, %cst_71 {dimension_numbers = #tpu.dot_dimension_numbers<[1], [0], [0], [1], [0, 0, 1, 1], [], []>} : vector<16x32xbf16>, vector<32x32xbf16>, vector<16x32xf32> -> vector<16x32xf32>
    %285 = vector.broadcast %192 : vector<1x32xf32> to vector<16x32xf32>
    %286 = arith.addf %284, %285 : vector<16x32xf32>
    %287 = arith.addf %146, %286 : vector<16x32xf32>
    %288 = vector.extract_strided_slice %10 {offsets = [2, 0], sizes = [1, 32], strides = [1, 1]} : vector<3x32xf32> to vector<1x32xf32>
    %289 = vector.extract_strided_slice %12 {offsets = [2, 0], sizes = [1, 32], strides = [1, 1]} : vector<3x32xf32> to vector<1x32xf32>
    %cst_72 = arith.constant dense<0.000000e+00> : vector<16xf32>
    %290 = vector.multi_reduction <add>, %287, %cst_72 [1] : vector<16x32xf32> to vector<16xf32>
    %291 = vector.shape_cast %290 : vector<16xf32> to vector<16x1xf32>
    %cst_73 = arith.constant 3.200000e+01 : f32
    %292 = vector.broadcast %cst_73 : f32 to vector<16x1xf32>
    %293 = arith.divf %291, %292 : vector<16x1xf32>
    %294 = vector.broadcast %293 : vector<16x1xf32> to vector<16x32xf32>
    %295 = arith.subf %287, %294 : vector<16x32xf32>
    %296 = arith.mulf %295, %295 : vector<16x32xf32>
    %cst_74 = arith.constant dense<0.000000e+00> : vector<16xf32>
    %297 = vector.multi_reduction <add>, %296, %cst_74 [1] : vector<16x32xf32> to vector<16xf32>
    %298 = vector.shape_cast %297 : vector<16xf32> to vector<16x1xf32>
    %cst_75 = arith.constant 3.200000e+01 : f32
    %299 = vector.broadcast %cst_75 : f32 to vector<16x1xf32>
    %300 = arith.divf %298, %299 : vector<16x1xf32>
    %301 = vector.broadcast %293 : vector<16x1xf32> to vector<16x32xf32>
    %302 = arith.subf %287, %301 : vector<16x32xf32>
    %cst_76 = arith.constant 9.99999997E-7 : f32
    %303 = vector.broadcast %cst_76 : f32 to vector<16x1xf32>
    %304 = arith.addf %300, %303 : vector<16x1xf32>
    %305 = math.rsqrt %304 : vector<16x1xf32>
    %306 = vector.broadcast %305 : vector<16x1xf32> to vector<16x32xf32>
    %307 = arith.mulf %302, %306 : vector<16x32xf32>
    %308 = vector.broadcast %288 : vector<1x32xf32> to vector<16x32xf32>
    %309 = arith.mulf %307, %308 : vector<16x32xf32>
    %310 = vector.broadcast %289 : vector<1x32xf32> to vector<16x32xf32>
    %311 = arith.addf %309, %310 : vector<16x32xf32>
    %312 = arith.truncf %311 : vector<16x32xf32> to vector<16x32xbf16>
    %c0_77 = arith.constant 0 : index
    %c0_78 = arith.constant 0 : index
    %c0_79 = arith.constant 0 : index
    %313 = vector.load %arg18[%c0_77, %c0_78, %c0_79] : memref<1x32x128xbf16, #tpu.memory_space<vmem>>, vector<1x32x128xbf16>
    %314 = vector.shape_cast %313 : vector<1x32x128xbf16> to vector<32x128xbf16>
    %cst_80 = arith.constant dense<0.000000e+00> : vector<16x128xf32>
    %315 = tpu.matmul %312, %314, %cst_80 {dimension_numbers = #tpu.dot_dimension_numbers<[1], [0], [0], [1], [0, 0, 1, 1], [], []>} : vector<16x32xbf16>, vector<32x128xbf16>, vector<16x128xf32> -> vector<16x128xf32>
    %c0_81 = arith.constant 0 : index
    %c0_82 = arith.constant 0 : index
    %c0_83 = arith.constant 0 : index
    %316 = vector.load %arg19[%c0_81, %c0_82, %c0_83] : memref<1x1x128xf32, #tpu.memory_space<vmem>>, vector<1x1x128xf32>
    %317 = vector.shape_cast %316 : vector<1x1x128xf32> to vector<1x128xf32>
    %318 = vector.broadcast %317 : vector<1x128xf32> to vector<16x128xf32>
    %319 = arith.addf %315, %318 : vector<16x128xf32>
    %cst_84 = arith.constant 0.000000e+00 : f32
    %320 = vector.broadcast %cst_84 : f32 to vector<16x128xf32>
    %321 = arith.maximumf %319, %320 : vector<16x128xf32>
    %322 = arith.truncf %321 : vector<16x128xf32> to vector<16x128xbf16>
    %c0_85 = arith.constant 0 : index
    %c0_86 = arith.constant 0 : index
    %c0_87 = arith.constant 0 : index
    %323 = vector.load %arg20[%c0_85, %c0_86, %c0_87] : memref<1x128x32xbf16, #tpu.memory_space<vmem>>, vector<1x128x32xbf16>
    %324 = vector.shape_cast %323 : vector<1x128x32xbf16> to vector<128x32xbf16>
    %cst_88 = arith.constant dense<0.000000e+00> : vector<16x32xf32>
    %325 = tpu.matmul %322, %324, %cst_88 {dimension_numbers = #tpu.dot_dimension_numbers<[1], [0], [0], [1], [0, 0, 1, 1], [], []>} : vector<16x128xbf16>, vector<128x32xbf16>, vector<16x32xf32> -> vector<16x32xf32>
    %c0_89 = arith.constant 0 : index
    %c0_90 = arith.constant 0 : index
    %c0_91 = arith.constant 0 : index
    %326 = vector.load %arg21[%c0_89, %c0_90, %c0_91] : memref<1x1x32xf32, #tpu.memory_space<vmem>>, vector<1x1x32xf32>
    %327 = vector.shape_cast %326 : vector<1x1x32xf32> to vector<1x32xf32>
    %328 = vector.broadcast %327 : vector<1x32xf32> to vector<16x32xf32>
    %329 = arith.addf %325, %328 : vector<16x32xf32>
    %330 = arith.addf %287, %329 : vector<16x32xf32>
    %c1_i32 = arith.constant 1 : i32
    %331 = arith.cmpi slt, %arg1, %c1_i32 : i32
    %332 = arith.extui %331 : i1 to i32
    %c0_i32_92 = arith.constant 0 : i32
    %333 = arith.cmpi ne, %332, %c0_i32_92 : i32
    scf.if %333 {
      %337 = vector.shape_cast %330 : vector<16x32xf32> to vector<2x8x32xf32>
      %c0_95 = arith.constant 0 : index
      %c0_96 = arith.constant 0 : index
      %c0_97 = arith.constant 0 : index
      %338 = vector.load %arg24[%c0_95, %c0_96, %c0_97] : memref<2x8x32xf32, #tpu.memory_space<vmem>>, vector<2x8x32xf32>
      tpu.vector_store %arg24[%c0_95, %c0_96, %c0_97], %337 {strides = array<i32>} : memref<2x8x32xf32, #tpu.memory_space<vmem>>, vector<2x8x32xf32>,
    } else {
    }
    %c1_i32_93 = arith.constant 1 : i32
    %334 = arith.cmpi eq, %arg1, %c1_i32_93 : i32
    %335 = arith.extui %334 : i1 to i32
    %c0_i32_94 = arith.constant 0 : i32
    %336 = arith.cmpi ne, %335, %c0_i32_94 : i32
    scf.if %336 {
      %c0_95 = arith.constant 0 : index
      %c0_96 = arith.constant 0 : index
      %337 = vector.load %arg22[%c0_95, %c0_96] : memref<1x32xf32, #tpu.memory_space<vmem>>, vector<1x32xf32>
      %c0_97 = arith.constant 0 : index
      %c0_98 = arith.constant 0 : index
      %338 = vector.load %arg23[%c0_97, %c0_98] : memref<1x32xf32, #tpu.memory_space<vmem>>, vector<1x32xf32>
      %cst_99 = arith.constant dense<0.000000e+00> : vector<16xf32>
      %339 = vector.multi_reduction <add>, %330, %cst_99 [1] : vector<16x32xf32> to vector<16xf32>
      %340 = vector.shape_cast %339 : vector<16xf32> to vector<16x1xf32>
      %cst_100 = arith.constant 3.200000e+01 : f32
      %341 = vector.broadcast %cst_100 : f32 to vector<16x1xf32>
      %342 = arith.divf %340, %341 : vector<16x1xf32>
      %343 = vector.broadcast %342 : vector<16x1xf32> to vector<16x32xf32>
      %344 = arith.subf %330, %343 : vector<16x32xf32>
      %345 = arith.mulf %344, %344 : vector<16x32xf32>
      %cst_101 = arith.constant dense<0.000000e+00> : vector<16xf32>
      %346 = vector.multi_reduction <add>, %345, %cst_101 [1] : vector<16x32xf32> to vector<16xf32>
      %347 = vector.shape_cast %346 : vector<16xf32> to vector<16x1xf32>
      %cst_102 = arith.constant 3.200000e+01 : f32
      %348 = vector.broadcast %cst_102 : f32 to vector<16x1xf32>
      %349 = arith.divf %347, %348 : vector<16x1xf32>
      %350 = vector.broadcast %342 : vector<16x1xf32> to vector<16x32xf32>
      %351 = arith.subf %330, %350 : vector<16x32xf32>
      %cst_103 = arith.constant 9.99999974E-6 : f32
      %352 = vector.broadcast %cst_103 : f32 to vector<16x1xf32>
      %353 = arith.addf %349, %352 : vector<16x1xf32>
      %354 = math.rsqrt %353 : vector<16x1xf32>
      %355 = vector.broadcast %354 : vector<16x1xf32> to vector<16x32xf32>
      %356 = arith.mulf %351, %355 : vector<16x32xf32>
      %357 = vector.broadcast %337 : vector<1x32xf32> to vector<16x32xf32>
      %358 = arith.mulf %356, %357 : vector<16x32xf32>
      %359 = vector.broadcast %338 : vector<1x32xf32> to vector<16x32xf32>
      %360 = arith.addf %358, %359 : vector<16x32xf32>
      %361 = vector.shape_cast %360 : vector<16x32xf32> to vector<2x8x32xf32>
      %c0_104 = arith.constant 0 : index
      %c0_105 = arith.constant 0 : index
      %c0_106 = arith.constant 0 : index
      %362 = vector.load %arg24[%c0_104, %c0_105, %c0_106] : memref<2x8x32xf32, #tpu.memory_space<vmem>>, vector<2x8x32xf32>
      tpu.vector_store %arg24[%c0_104, %c0_105, %c0_106], %361 {strides = array<i32>} : memref<2x8x32xf32, #tpu.memory_space<vmem>>, vector<2x8x32xf32>,
    } else {
    }
    return
  }
  func.func @transform_0(%arg0: i32, %arg1: i32) -> (i32, i32, i32) {
    %c0_i32 = arith.constant 0 : i32
    %c0_i32_0 = arith.constant 0 : i32
    %c0_i32_1 = arith.constant 0 : i32
    return %arg0, %c0_i32, %c0_i32_0 : i32, i32, i32
  }
  func.func @transform_1(%arg0: i32, %arg1: i32) -> (i32, i32, i32) {
    %c0_i32 = arith.constant 0 : i32
    %c0_i32_0 = arith.constant 0 : i32
    %c0_i32_1 = arith.constant 0 : i32
    return %arg0, %c0_i32, %c0_i32_0 : i32, i32, i32
  }
  func.func @transform_2(%arg0: i32, %arg1: i32) -> (i32, i32, i32) {
    %c0_i32 = arith.constant 0 : i32
    %c0_i32_0 = arith.constant 0 : i32
    %c0_i32_1 = arith.constant 0 : i32
    return %arg0, %c0_i32, %c0_i32_0 : i32, i32, i32
  }
  func.func @transform_3(%arg0: i32, %arg1: i32) -> (i32, i32, i32) {
    %c0_i32 = arith.constant 0 : i32
    %c0_i32_0 = arith.constant 0 : i32
    %c0_i32_1 = arith.constant 0 : i32
    return %arg0, %c0_i32, %c0_i32_0 : i32, i32, i32
  }
  func.func @transform_4(%arg0: i32, %arg1: i32) -> (i32, i32, i32) {
    %c0_i32 = arith.constant 0 : i32
    %c0_i32_0 = arith.constant 0 : i32
    %c0_i32_1 = arith.constant 0 : i32
    return %arg1, %c0_i32, %c0_i32_0 : i32, i32, i32
  }
  func.func @transform_5(%arg0: i32, %arg1: i32) -> (i32, i32, i32) {
    %c0_i32 = arith.constant 0 : i32
    %c0_i32_0 = arith.constant 0 : i32
    %c0_i32_1 = arith.constant 0 : i32
    return %arg1, %c0_i32, %c0_i32_0 : i32, i32, i32
  }
  func.func @transform_6(%arg0: i32, %arg1: i32) -> (i32, i32, i32) {
    %c0_i32 = arith.constant 0 : i32
    %c0_i32_0 = arith.constant 0 : i32
    %c0_i32_1 = arith.constant 0 : i32
    return %arg1, %c0_i32, %c0_i32_0 : i32, i32, i32
  }
  func.func @transform_7(%arg0: i32, %arg1: i32) -> (i32, i32, i32) {
    %c0_i32 = arith.constant 0 : i32
    %c0_i32_0 = arith.constant 0 : i32
    %c0_i32_1 = arith.constant 0 : i32
    return %arg1, %c0_i32, %c0_i32_0 : i32, i32, i32
  }
  func.func @transform_8(%arg0: i32, %arg1: i32) -> (i32, i32, i32) {
    %c0_i32 = arith.constant 0 : i32
    %c0_i32_0 = arith.constant 0 : i32
    %c0_i32_1 = arith.constant 0 : i32
    return %arg1, %c0_i32, %c0_i32_0 : i32, i32, i32
  }
  func.func @transform_9(%arg0: i32, %arg1: i32) -> (i32, i32, i32) {
    %c0_i32 = arith.constant 0 : i32
    %c0_i32_0 = arith.constant 0 : i32
    %c0_i32_1 = arith.constant 0 : i32
    return %arg1, %c0_i32, %c0_i32_0 : i32, i32, i32
  }
  func.func @transform_10(%arg0: i32, %arg1: i32) -> (i32, i32, i32) {
    %c0_i32 = arith.constant 0 : i32
    %c0_i32_0 = arith.constant 0 : i32
    %c0_i32_1 = arith.constant 0 : i32
    return %arg1, %c0_i32, %c0_i32_0 : i32, i32, i32
  }
  func.func @transform_11(%arg0: i32, %arg1: i32) -> (i32, i32, i32) {
    %c0_i32 = arith.constant 0 : i32
    %c0_i32_0 = arith.constant 0 : i32
    %c0_i32_1 = arith.constant 0 : i32
    return %arg1, %c0_i32, %c0_i32_0 : i32, i32, i32
  }
  func.func @transform_12(%arg0: i32, %arg1: i32) -> (i32, i32, i32) {
    %c0_i32 = arith.constant 0 : i32
    %c0_i32_0 = arith.constant 0 : i32
    %c0_i32_1 = arith.constant 0 : i32
    return %arg1, %c0_i32, %c0_i32_0 : i32, i32, i32
  }
  func.func @transform_13(%arg0: i32, %arg1: i32) -> (i32, i32, i32) {
    %c0_i32 = arith.constant 0 : i32
    %c0_i32_0 = arith.constant 0 : i32
    %c0_i32_1 = arith.constant 0 : i32
    return %arg1, %c0_i32, %c0_i32_0 : i32, i32, i32
  }
  func.func @transform_14(%arg0: i32, %arg1: i32) -> (i32, i32, i32) {
    %c0_i32 = arith.constant 0 : i32
    %c0_i32_0 = arith.constant 0 : i32
    %c0_i32_1 = arith.constant 0 : i32
    return %arg1, %c0_i32, %c0_i32_0 : i32, i32, i32
  }
  func.func @transform_15(%arg0: i32, %arg1: i32) -> (i32, i32, i32) {
    %c0_i32 = arith.constant 0 : i32
    %c0_i32_0 = arith.constant 0 : i32
    %c0_i32_1 = arith.constant 0 : i32
    return %arg1, %c0_i32, %c0_i32_0 : i32, i32, i32
  }
  func.func @transform_16(%arg0: i32, %arg1: i32) -> (i32, i32, i32) {
    %c0_i32 = arith.constant 0 : i32
    %c0_i32_0 = arith.constant 0 : i32
    %c0_i32_1 = arith.constant 0 : i32
    return %arg1, %c0_i32, %c0_i32_0 : i32, i32, i32
  }
  func.func @transform_17(%arg0: i32, %arg1: i32) -> (i32, i32, i32) {
    %c0_i32 = arith.constant 0 : i32
    %c0_i32_0 = arith.constant 0 : i32
    %c0_i32_1 = arith.constant 0 : i32
    return %arg1, %c0_i32, %c0_i32_0 : i32, i32, i32
  }
  func.func @transform_18(%arg0: i32, %arg1: i32) -> (i32, i32, i32) {
    %c0_i32 = arith.constant 0 : i32
    %c0_i32_0 = arith.constant 0 : i32
    %c0_i32_1 = arith.constant 0 : i32
    return %arg1, %c0_i32, %c0_i32_0 : i32, i32, i32
  }
  func.func @transform_19(%arg0: i32, %arg1: i32) -> (i32, i32, i32) {
    %c0_i32 = arith.constant 0 : i32
    %c0_i32_0 = arith.constant 0 : i32
    %c0_i32_1 = arith.constant 0 : i32
    return %arg1, %c0_i32, %c0_i32_0 : i32, i32, i32
  }
  func.func @transform_20(%arg0: i32, %arg1: i32) -> (i32, i32) {
    %c0_i32 = arith.constant 0 : i32
    %c0_i32_0 = arith.constant 0 : i32
    %c0_i32_1 = arith.constant 0 : i32
    return %c0_i32, %c0_i32_0 : i32, i32
  }
  func.func @transform_21(%arg0: i32, %arg1: i32) -> (i32, i32) {
    %c0_i32 = arith.constant 0 : i32
    %c0_i32_0 = arith.constant 0 : i32
    %c0_i32_1 = arith.constant 0 : i32
    return %c0_i32, %c0_i32_0 : i32, i32
  }
  func.func @transform_22(%arg0: i32, %arg1: i32) -> (i32, i32, i32) {
    %c0_i32 = arith.constant 0 : i32
    %c0_i32_0 = arith.constant 0 : i32
    %c0_i32_1 = arith.constant 0 : i32
    return %arg0, %c0_i32, %c0_i32_0 : i32, i32, i32
  }
}

</mosaic_0001>

<bundles_post_ra>
// kernel: decoder_forward.1
= control target key start
LH: loop header
LB: loop body
LE: loop exit
PB: predicated region body
PF: predicated region fallthrough
CT: control target
= control target key end

     0   :  { %s8327_s0 = inlined_call_operand.vmem [shape: f32[2,8,32], index: 0, kind: input, shape index: {}]   ;;  %s8328_s1 = inlined_call_operand.vmem [shape: f32[2,8,32], index: 1, kind: input, shape index: {}]   ;;  %s8329_s2 = inlined_call_operand.vmem [shape: f32[2,8,8], index: 2, kind: input, shape index: {}]   ;;  %s8330_s3 = inlined_call_operand.vmem [shape: f32[2,1,8], index: 3, kind: input, shape index: {}]   ;;  %s8331_s4 = inlined_call_operand.vmem [shape: f32[2,3,32], index: 4, kind: input, shape index: {}]   ;;  %s8332_s5 = inlined_call_operand.vmem [shape: f32[2,3,32], index: 5, kind: input, shape index: {}]   ;;  %s8333_s6 = inlined_call_operand.vmem [shape: bf16[2,32,96], index: 6, kind: input, shape index: {}]   ;;  %s8334_s7 = inlined_call_operand.vmem [shape: f32[2,1,96], index: 7, kind: input, shape index: {}]   ;;  %s8335_s8 = inlined_call_operand.vmem [shape: bf16[2,32,32], index: 8, kind: input, shape index: {}]   ;;  %s8336_s9 = inlined_call_operand.vmem [shape: f32[2,1,32], index: 9, kind: input, shape index: {}]   ;;  %s8337_s10 = inlined_call_operand.vmem [shape: bf16[2,32,32], index: 10, kind: input, shape index: {}]   ;;  %s8338_s11 = inlined_call_operand.vmem [shape: f32[2,1,32], index: 11, kind: input, shape index: {}]   ;;  %s8339_s12 = inlined_call_operand.vmem [shape: bf16[2,32,64], index: 12, kind: input, shape index: {}]   ;;  %s8340_s13 = inlined_call_operand.vmem [shape: f32[2,1,64], index: 13, kind: input, shape index: {}]   ;;  %s8341_s14 = inlined_call_operand.vmem [shape: bf16[2,32,32], index: 14, kind: input, shape index: {}]   ;;  %s8342_s15 = inlined_call_operand.vmem [shape: f32[2,1,32], index: 15, kind: input, shape index: {}]   ;;  %s8343_s16 = inlined_call_operand.vmem [shape: bf16[2,32,128], index: 16, kind: input, shape index: {}]   ;;  %s8344_s17 = inlined_call_operand.vmem [shape: f32[2,1,128], index: 17, kind: input, shape index: {}]   ;;  %s8345_s18 = inlined_call_operand.vmem [shape: bf16[2,128,32], index: 18, kind: input, shape index: {}]   ;;  %s8346_s19 = inlined_call_operand.vmem [shape: f32[2,1,32], index: 19, kind: input, shape index: {}]   ;;  %s8347_s20 = inlined_call_operand.vmem [shape: f32[1,32], index: 20, kind: input, shape index: {}]   ;;  %s8348_s21 = inlined_call_operand.vmem [shape: f32[1,32], index: 21, kind: input, shape index: {}]   ;;  %s8349_s22 = inlined_call_operand.hbm [shape: f32[2,8,32], index: 22, kind: output, shape index: {}]  }
   0x1   :  { %8362 = sst [smem:[#allocation10_spill]] %s8327_s0 }
   0x2   :  { %8363 = sst [smem:[#allocation11_spill]] %s8328_s1 }
   0x3   :  { %8364 = sst [smem:[#allocation12_spill]] %s8329_s2 }
   0x4   :  { %8365 = sst [smem:[#allocation13_spill]] %s8330_s3 }
   0x5   :  { %8366 = sst [smem:[#allocation14_spill]] %s8331_s4 }
   0x6   :  { %8367 = sst [smem:[#allocation15_spill]] %s8332_s5 }
   0x7   :  { %8368 = sst [smem:[#allocation16_spill]] %s8333_s6 }
   0x8   :  { %8369 = sst [smem:[#allocation17_spill]] %s8335_s8 }
   0x9   :  { %8370 = sst [smem:[#allocation18_spill]] %s8337_s10 }
   0xa   :  { %8371 = sst [smem:[#allocation19_spill]] %s8338_s11 }
   0xb   :  { %8372 = sst [smem:[#allocation20_spill]] %s8339_s12 }
   0xc   :  { %8373 = sst [smem:[#allocation21_spill]] %s8340_s13 }
   0xd   :  { %8374 = sst [smem:[#allocation22_spill]] %s8341_s14 }
   0xe   :  { %8375 = sst [smem:[#allocation23_spill]] %s8345_s18 }
   0xf   :  { %8376 = sst [smem:[#allocation24_spill]] %s8346_s19 }
  0x10   :  { %8377 = sst [smem:[#allocation25_spill]] %s8347_s20 }
  0x11   :  { %8378 = sst [smem:[#allocation26_spill]] %s8348_s21 }
  0x12   :  { %8379 = sst [smem:[#allocation27_spill]] %s8349_s22 }
  0x13   :  { %27 = vsyncpa [#allocation3], 0  ;;  %s7095_s3 = smov 0   ;;  %s7097_s28 = smov 0  }
  0x14   :  { %s7099_s29 = smov 0  }
  0x15 LB: > { %8380 = sst [smem:[#allocation5_spill]] %s6950_s3  ;;  %s42_s4 = sadd.s32 1, %s6954_s28  ;;  %s6958_s29 = sphi %s7099_s29, %s33_s29   ;;  %s6954_s28 = sphi %s7097_s28, %s8425_s28   ;;  %s6950_s3 = sphi %s7095_s3, %s8424_s3  }
  0x16   : > { %8381 = sst [smem:[#allocation6_spill]] %s6954_s28  ;;  %p43_p0 = scmp.ge.s32.totalorder %s42_s4, 2 }
  0x17   : > { %8382 = sst [smem:[#allocation7_spill]] %s6958_s29  ;;  %p5837_p1 = scmp.ge.s32.totalorder %s6958_s29, 1 }
  0x18   : > { %p802_p2 = scmp.lt.s32.totalorder %s6958_s29, 3  ;;  %s8427_s4 = smov (%p43_p0, %s42_s4), 0 }
  0x19   : > { %8383 = sst [smem:[#allocation8_spill]] %s8427_s4 }
  0x1a   : > { %p803_p3 = pnand %p5837_p1, %p802_p2 }
  0x1c   : > { %806 = sbr.rel (%p803_p3) target bundleno = 4654 (0x122e), region = 108 }
  0x23   : > { %p960_p4 = scmp.lt.s32.totalorder %s6950_s3, 1  ;;  %s8384_s6 = sld [smem:[#allocation14_spill]] }
  0x24   : > { %s8385_s27 = sld [smem:[#allocation15_spill]]  ;;  %s8386_s22 = sld [smem:[#allocation16_spill]] }
  0x25   : > { %s7118_s0 = scalar_select %p960_p4, %s6950_s3, 1 }
  0x26   : > { %s8387_s8 = sld [smem:[#allocation17_spill]]  ;;  %s8388_s10 = sld [smem:[#allocation18_spill]] }
  0x27   : > { %s5838_s23 = sshll.u32 %s7118_s0, 2  ;;  %s5996_s1 = sshll.u32 %s7118_s0, 4 }
  0x28   : > { %s8390_s12 = sld [smem:[#allocation20_spill]]  ;;  %s8392_s14 = sld [smem:[#allocation22_spill]] }
  0x29   : > { %s7125_s25 = scalar_lea.vmem %s8384_s6, %s5838_s23  ;;  %s7180_s4 = scalar_lea.vmem %s8343_s16, %s5996_s1 }
  0x2a   : > { %s7130_s30 = scalar_lea.vmem %s8385_s27, %s5838_s23  ;;  %s7135_s29 = scalar_lea.vmem %s8386_s22, %s5996_s1 }
  0x2b   : > { %s6002_s18 = sshll.u32 %s7118_s0, 6  ;;  %s8396_s23 = sld [smem:[#allocation5_spill]] }
  0x2c   : > { %s7144_s5 = scalar_lea.vmem %s8387_s8, %s5996_s1  ;;  %s7153_s27 = scalar_lea.vmem %s8388_s10, %s5996_s1 }
  0x2e   : > { %s7162_s3 = scalar_lea.vmem %s8390_s12, %s5996_s1  ;;  %s7171_s26 = scalar_lea.vmem %s8392_s14, %s5996_s1 }
  0x2f   : > { %8393 = sst [smem:[#allocation9_spill]] %s7171_s26  ;;  %s8395_s26 = sld [smem:[#allocation23_spill]] }
  0x31   : > { %p5854_p5 = scmp.ne.s32.totalorder %s8396_s23, 0 }
  0x32   : > { %s8397_s22 = sld [smem:[#allocation10_spill]] (!%p5854_p5)  ;;  %vm1032_vm0 = vcmask (!%p5854_p5), 261120  }
  0x33   : > { %1029 = sbr.rel (%p5854_p5) target bundleno = 58 (0x3a), region = 112 }
  0x35   : > { %s7194_s13 = scalar_lea.vmem %s8395_s26, %s6002_s18 }
  0x38   : > { %v1030_v0 = vld [vmem:[%s8397_s22] sm:$0xff] (!%p5854_p5)  ;;  %v1031_v1 = vld [vmem:[%s8397_s22 + $0x8] sm:$0xff] (!%p5854_p5) }
  0x39   : > { %1033 = vst.msk [vmem:[#allocation2] sm:$0xff] (!%p5854_p5), %vm1032_vm0, %v1030_v0  ;;  %1034 = vst.msk [vmem:[#allocation2 + $0x8] sm:$0xff] (!%p5854_p5), %vm1032_vm0, %v1031_v1 }
  0x3a PF: > { %vm1045_vm1 = vcmask 261120   ;;  %v6736_v16 = vld [vmem:[%s7135_s29] sm:$0xff]   ;;  %v6960_v17 = vmov 0.0   ;;  %vm6961_vm2 = vmmov 0   ;;  %v6737_v18 = vld [vmem:[%s7135_s29 + $0x8] sm:$0xff]   ;;  %v1073_v23 = vlaneseq  ;;  %s8398_s14 = scalar_lea.vmem %s8334_s7, %s7118_s0  ;;  %s6962_s29 = smov 124  }
  0x3b   : > { %6164 = vmatprep.subr.bf16.mxu1 %v6960_v17  ;;  %6168 = vmatprep.mubr.msk.bf16.mxu1 %vm6961_vm2, %v6960_v17  ;;  %v1043_v28 = vld [vmem:[%s7125_s25] sm:$0x7]  ;;  %s6963_s26 = smov 116   ;;  %s6964_s21 = smov 120   ;;  %vm1194_vm3 = vcmask 31744   ;;  %vm2203_vm4 = vcmask 1043456  }
  0x3c   : > { %6165 = vmatpush3.bf16.msra.mxu1 %v6736_v16  ;;  %6190 = vmatprep.subr.bf16.mxu0 %v6960_v17  ;;  %v7217_v26 = vshrl.u32 %v1073_v23, 7  ;;  %v1044_v32 = vld [vmem:[%s7130_s30] sm:$0x7]  ;;  %s6965_s18 = smov 112   ;;  %s6966_s19 = smov 108   ;;  %vm2005_vm5 = vcmask 64512  }
  0x3d   : > { %6166 = vmatprep.subr.bf16.mxu1 %v6960_v17  ;;  %6192 = vmatprep.mubr.msk.bf16.mxu0 %vm6961_vm2, %v6960_v17  ;;  %v5855_v41 = vld [vmem:[%s8398_s14] ss:$0 sm:$0xff]  ;;  %s6967_s6 = smov 104   ;;  %s6968_s23 = smov 96   ;;  %vm3043_vm6 = vcmask 97280   ;;  %vm3046_vm7 = vcmask 130048  }
  0x3e   : > { %v1075_v27 = vsub.s32 0, %v7217_v26  ;;  %s6969_s2 = smov 100   ;;  %s6970_s1 = smov 64   ;;  %vm3049_vm8 = vcmask 162816   ;;  %vm3052_vm9 = vcmask 195584   ;;  %vm3055_vm10 = vcmask 228352  }
  0x3f   : > { %s8399_s8 = sld [smem:[#allocation12_spill]]  ;;  %s6972_s28 = smov 8  }
  0x40   : > { %v1035_v2 = vld [vmem:[#allocation2] sm:$0xff]  ;;  %v1036_v3 = vld [vmem:[#allocation2 + $0x8] sm:$0xff]  ;;  %6167 = vmatpush3.bf16.msra.mxu1 %v6737_v18  ;;  %v1076_v31 = vrot.slane %v1043_v28, %v1075_v27  ;;  %v1082_v36 = vrot.slane %v1044_v32, %v1075_v27  ;;  %s6973_s20 = smov 12   ;;  %s6974_s11 = smov 16  }
  0x41   : > { %v1046_v4 = vsel %vm1045_vm1, %v1035_v2, 0.0  ;;  %v1049_v5 = vsel %vm1045_vm1, %v1036_v3, 0.0  ;;  %6172 = vmatprep.subr.bf16.mxu1 %v6960_v17  ;;  %s8361_s14 = smov 20   ;;  %s8360_s24 = smov 24  }
  0x42   : > { %1047 = vadd.xlane.f32.xlu0 %v1046_v4  ;;  %s8413_s12 = sld [smem:[#allocation24_spill]] }
  0x46   : > { %1050 = vadd.xlane.f32.xlu0 %v1049_v5 }
  0xcf   : > { %v1048_v6 = vpop.xlane.xlu0 %1047 }
  0xd0   : > { %v1053_v7 = vmul.f32 0.03125, %v1048_v6 }
  0xd2   : > { %v1055_v8 = vsub.f32 %v1035_v2, %v1053_v7 }
  0xd3   : > { %v1051_v9 = vpop.xlane.xlu0 %1050 }
  0xd4   : > { %v1054_v10 = vmul.f32 0.03125, %v1051_v9  ;;  %v1057_v11 = vmul.f32 %v1055_v8, %v1055_v8 }
  0xd6   : > { %v1056_v12 = vsub.f32 %v1036_v3, %v1054_v10  ;;  %v1059_v13 = vsel %vm1045_vm1, %v1057_v11, 0.0 }
  0xd7   : > { %1060 = vadd.xlane.f32.xlu1 %v1059_v13 }
  0xd8   : > { %v1058_v14 = vmul.f32 %v1056_v12, %v1056_v12 }
  0xda   : > { %v1062_v15 = vsel %vm1045_vm1, %v1058_v14, 0.0 }
  0xdb   : > { %1063 = vadd.xlane.f32.xlu1 %v1062_v15 }
 0x164   : > { %v1061_v19 = vpop.xlane.xlu1 %1060 }
 0x165   : > { %v1065_v20 = vmul.f32 0.03125, %v1061_v19 }
 0x167   : > { %v1067_v21 = vadd.f32 1e-06, %v1065_v20 }
 0x168   : > { %v1064_v22 = vpop.xlane.xlu1 %1063 }
 0x169   : > { %6756 = vrsqrt.f32 %v1067_v21  ;;  %v1066_v24 = vmul.f32 0.03125, %v1064_v22 }
 0x16b   : > { %v1068_v25 = vadd.f32 1e-06, %v1066_v24 }
 0x16d   : > { %6758 = vrsqrt.f32 %v1068_v25 }
 0x173   : > { %v6757_v29 = vpop.eup %6756 }
 0x174   : > { %v1071_v30 = vmul.f32 %v6757_v29, %v1055_v8 }
 0x176   : > { %v1077_v35 = vmul.f32 %v1076_v31, %v1071_v30 }
 0x177   : > { %v6759_v33 = vpop.eup %6758 }
 0x178   : > { %v1072_v34 = vmul.f32 %v6759_v33, %v1056_v12  ;;  %v1083_v38 = vadd.f32 %v1082_v36, %v1077_v35 }
 0x17a   : > { %v1078_v37 = vmul.f32 %v1076_v31, %v1072_v34 }
 0x17c   : > { %v1084_v39 = vadd.f32 %v1082_v36, %v1078_v37 }
 0x17e   : > { %v1085_v40 = vpack.c.bf16 %v1084_v39, %v1083_v38 }
 0x180   : > { %6169 = vmatmul.mubr.msk.bf16.vlgmr.msra.gmra.mrb[0].mxu1 %vm1045_vm1, %v1085_v40 }
 0x181   : > { %6174 = vmatprep.mubr.msk.bf16.mxu1 %vm6961_vm2, %v6960_v17 }
 0x253   : > { %v1146_v42 = vpop.f32.mrb[0].mxu1 }
 0x254   : > { %v1147_v43 = vadd.f32 %v5855_v41, %v1146_v42  ;;  %v6170_v44 = vpop.f32.mrb[1].mxu1 }
 0x255   : > { %v1149_v45 = vpop.f32.mrb[2].mxu1 }
 0x256   : > { %v7230_v46 = vpack.c.bf16 %v1147_v43, %v1147_v43  ;;  %v1150_v47 = vadd.f32 %v5855_v41, %v1149_v45  ;;  %v6171_v48 = vpop.f32.mrb[3].mxu1 }
 0x258   : > { %v7232_v49 = vpack.c.bf16 %v1150_v47, %v1150_v47  ;;  %1164 = vrot.lane.b32.xlu0 %v7230_v46, %s6962_s29 }
 0x25a   : > { %1166 = vrot.lane.b32.xlu1 %v7232_v49, %s6962_s29 }
 0x25c   : > { %1172 = vrot.lane.b32.xlu0 %v7230_v46, %s6963_s26 }
 0x25e   : > { %1168 = vrot.lane.b32.xlu1 %v7230_v46, %s6964_s21 }
 0x260   : > { %1176 = vrot.lane.b32.xlu0 %v7230_v46, %s6965_s18 }
 0x262   : > { %1170 = vrot.lane.b32.xlu1 %v7232_v49, %s6964_s21 }
 0x264   : > { %1180 = vrot.lane.b32.xlu0 %v7230_v46, %s6966_s19 }
 0x266   : > { %1174 = vrot.lane.b32.xlu1 %v7232_v49, %s6963_s26 }
 0x268   : > { %1184 = vrot.lane.b32.xlu0 %v7230_v46, %s6967_s6 }
 0x26a   : > { %1178 = vrot.lane.b32.xlu1 %v7232_v49, %s6965_s18 }
 0x26c   : > { %1192 = vrot.lane.b32.xlu0 %v7230_v46, %s6968_s23 }
 0x26e   : > { %1182 = vrot.lane.b32.xlu1 %v7232_v49, %s6966_s19 }
 0x270   : > { %1190 = vrot.lane.b32.xlu0 %v7232_v49, %s6969_s2 }
 0x272   : > { %1186 = vrot.lane.b32.xlu1 %v7232_v49, %s6967_s6 }
 0x276   : > { %1188 = vrot.lane.b32.xlu1 %v7230_v46, %s6969_s2 }
 0x27a   : > { %1241 = vrot.lane.b32.xlu1 %v7232_v49, %s6968_s23 }
 0x2ca   : > { %v7266_v50 = vpop.permute.xlu0 %1164 }
 0x2cb   : > { %v5863_v51 = vcombine.low %v7266_v50, %v7266_v50 }
 0x2cc   : > { %v7270_v52 = vpop.permute.xlu1 %1166 }
 0x2cd   : > { %v5865_v53 = vcombine.low %v7270_v52, %v7270_v52  ;;  %1291 = vrot.lane.b32.xlu0 %v5863_v51, %s6968_s23 }
 0x2ce   : > { %v7275_v54 = vpop.permute.xlu0 %1172 }
 0x2cf   : > { %1341 = vrot.lane.b32.xlu1 %v5865_v53, %s6968_s23  ;;  %v5871_v59 = vcombine.low %v7275_v54, %v7275_v54 }
 0x2d0   : > { %v7278_v55 = vpop.permute.xlu1 %1168 }
 0x2d1   : > { %v5867_v56 = vcombine.low %v7278_v55, %v7278_v55 }
 0x2d2   : > { %v7282_v57 = vpop.permute.xlu0 %1176 }
 0x2d3   : > { %1391 = vrot.lane.b32.xlu0 %v5867_v56, %s6968_s23  ;;  %v5875_v63 = vcombine.low %v7282_v57, %v7282_v57 }
 0x2d4   : > { %v7285_v58 = vpop.permute.xlu1 %1170 }
 0x2d5   : > { %v5869_v60 = vcombine.low %v7285_v58, %v7285_v58 }
 0x2d6   : > { %v7291_v61 = vpop.permute.xlu0 %1180 }
 0x2d7   : > { %1491 = vrot.lane.b32.xlu0 %v5871_v59, %s6968_s23  ;;  %1441 = vrot.lane.b32.xlu1 %v5869_v60, %s6968_s23  ;;  %v5879_v3 = vcombine.low %v7291_v61, %v7291_v61 }
 0x2d8   : > { %v7295_v62 = vpop.permute.xlu1 %1174 }
 0x2d9   : > { %v5873_v0 = vcombine.low %v7295_v62, %v7295_v62 }
 0x2da   : > { %v7301_v1 = vpop.permute.xlu0 %1184 }
 0x2db   : > { %1591 = vrot.lane.b32.xlu0 %v5875_v63, %s6968_s23  ;;  %1541 = vrot.lane.b32.xlu1 %v5873_v0, %s6968_s23  ;;  %v7318_v8 = vcombine.low %v7301_v1, %v7301_v1 }
 0x2dc   : > { %v7305_v2 = vpop.permute.xlu1 %1178 }
 0x2dd   : > { %v5877_v4 = vcombine.low %v7305_v2, %v7305_v2 }
 0x2de   : > { %v1193_v5 = vpop.permute.xlu0 %1192 }
 0x2df   : > { %v1199_v6 = vsel %vm1194_vm3, %v1193_v5, 0  ;;  %1691 = vrot.lane.b32.xlu0 %v5879_v3, %s6968_s23  ;;  %1641 = vrot.lane.b32.xlu1 %v5877_v4, %s6968_s23 }
 0x2e0   : > { %6173 = vmatpush3.bf16.xpose.msra.mxu1 %v1199_v6  ;;  %v7314_v7 = vpop.permute.xlu1 %1182 }
 0x2e1   : > { %v5881_v9 = vcombine.low %v7314_v7, %v7314_v7  ;;  %6178 = vmatprep.subr.bf16.mxu1 %v6960_v17 }
 0x2e2   : > { %v7332_v12 = vpop.permute.xlu0 %1190 }
 0x2e3   : > { %1791 = vrot.lane.b32.xlu0 %v7318_v8, %s6968_s23  ;;  %1741 = vrot.lane.b32.xlu1 %v5881_v9, %s6968_s23  ;;  %v7344_v14 = vcombine.low %v7332_v12, %v7332_v12 }
 0x2e4   : > { %v7326_v10 = vpop.permute.xlu1 %1186 }
 0x2e5   : > { %v7330_v11 = vcombine.low %v7326_v10, %v7326_v10 }
 0x2e7   : > { %6175 = vmatmul.mubr.msk.bf16.vlgmr.msra.gmra.mrb[4].mxu1 %vm1194_vm3, %v7230_v46  ;;  %1841 = vrot.lane.b32.xlu1 %v7330_v11, %s6968_s23 }
 0x2e8   : > { %v7338_v13 = vpop.permute.xlu1 %1188  ;;  %6180 = vmatprep.mubr.msk.bf16.mxu1 %vm6961_vm2, %v6960_v17 }
 0x2e9   : > { %v7348_v15 = vcombine.low %v7338_v13, %v7338_v13 }
 0x2eb   : > { %1941 = vrot.lane.b32.xlu1 %v7344_v14, %s6968_s23  ;;  %1891 = vrot.lane.b32.xlu0 %v7348_v15, %s6968_s23 }
 0x2ec   : > { %v1242_v16 = vpop.permute.xlu1 %1241 }
 0x2ed   : > { %v1247_v18 = vsel %vm1194_vm3, %v1242_v16, 0 }
 0x2ee   : > { %6179 = vmatpush3.bf16.xpose.msra.mxu1 %v1247_v18 }
 0x2ef   : > { %2247 = vrot.lane.b32.xlu1 %v7232_v49, %s6970_s1  ;;  %2198 = vrot.lane.b32.xlu0 %v7230_v46, %s6970_s1 }
 0x2f0   : > { %6184 = vmatprep.subr.bf16.mxu1 %v6960_v17 }
 0x2f3   : > { %2679 = vrot.lane.b32.xlu1 %v5879_v3, %s6970_s1  ;;  %2295 = vrot.lane.b32.xlu0 %v5863_v51, %s6970_s1 }
 0x2f5   : > { %6181 = vmatmul.mubr.msk.bf16.vlgmr.msra.gmra.mrb[8].mxu1 %vm1194_vm3, %v7232_v49 }
 0x2f6   : > { %6186 = vmatprep.mubr.msk.bf16.mxu1 %vm6961_vm2, %v6960_v17 }
 0x2f7   : > { %2343 = vrot.lane.b32.xlu1 %v5865_v53, %s6970_s1  ;;  %2391 = vrot.lane.b32.xlu0 %v5867_v56, %s6970_s1 }
 0x2fb   : > { %2439 = vrot.lane.b32.xlu1 %v5869_v60, %s6970_s1  ;;  %2487 = vrot.lane.b32.xlu0 %v5871_v59, %s6970_s1  ;;  %v7475_v59 = vld [vmem:[%s8399_s8 + $0x8] sm:$0xff] }
 0x2ff   : > { %2535 = vrot.lane.b32.xlu1 %v5873_v0, %s6970_s1  ;;  %2583 = vrot.lane.b32.xlu0 %v5875_v63, %s6970_s1 }
 0x303   : > { %2631 = vrot.lane.b32.xlu1 %v5877_v4, %s6970_s1 }
 0x307   : > { %2727 = vrot.lane.b32.xlu1 %v5881_v9, %s6970_s1 }
 0x33f   : > { %v1292_v19 = vpop.permute.xlu0 %1291 }
 0x340   : > { %v1297_v20 = vsel %vm1194_vm3, %v1292_v19, 0 }
 0x341   : > { %6185 = vmatpush3.bf16.xpose.msra.mxu1 %v1297_v20  ;;  %v1342_v21 = vpop.permute.xlu1 %1341 }
 0x342   : > { %v1347_v22 = vsel %vm1194_vm3, %v1342_v21, 0  ;;  %6196 = vmatprep.subr.bf16.mxu1 %v6960_v17 }
 0x343   : > { %6191 = vmatpush3.bf16.xpose.msra.mxu0 %v1347_v22 }
 0x344   : > { %6202 = vmatprep.subr.bf16.mxu0 %v6960_v17 }
 0x345   : > { %v1392_v23 = vpop.permute.xlu0 %1391 }
 0x346   : > { %v1397_v24 = vsel %vm1194_vm3, %v1392_v23, 0 }
 0x348   : > { %6187 = vmatmul.mubr.msk.bf16.vlgmr.msra.gmra.mrb[12].mxu1 %vm1194_vm3, %v7266_v50 }
 0x349   : > { %6197 = vmatpush3.bf16.xpose.msra.mxu1 %v1397_v24  ;;  %v1442_v25 = vpop.permute.xlu1 %1441  ;;  %6198 = vmatprep.mubr.msk.bf16.mxu1 %vm6961_vm2, %v6960_v17  ;;  %v1492_v28 = vpop.permute.xlu0 %1491 }
 0x34a   : > { %v1447_v27 = vsel %vm1194_vm3, %v1442_v25, 0  ;;  %6193 = vmatmul.mubr.msk.bf16.vlgmr.msra.gmra.mrb[0].mxu0 %vm1194_vm3, %v7270_v52  ;;  %6208 = vmatprep.subr.bf16.mxu1 %v6960_v17  ;;  %v1497_v30 = vsel %vm1194_vm3, %v1492_v28, 0  ;;  %v7465_v52 = vld [vmem:[%s8399_s8] sm:$0xff] }
 0x34b   : > { %6203 = vmatpush3.bf16.xpose.msra.mxu0 %v1447_v27  ;;  %6204 = vmatprep.mubr.msk.bf16.mxu0 %vm6961_vm2, %v6960_v17 }
 0x34c   : > { %6214 = vmatprep.subr.bf16.mxu0 %v6960_v17 }
 0x34d   : > { %v1542_v29 = vpop.permute.xlu1 %1541  ;;  %v1592_v32 = vpop.permute.xlu0 %1591 }
 0x34e   : > { %v1547_v31 = vsel %vm1194_vm3, %v1542_v29, 0  ;;  %v1597_v34 = vsel %vm1194_vm3, %v1592_v32, 0 }
 0x350   : > { %6199 = vmatmul.mubr.msk.bf16.vlgmr.msra.gmra.mrb[16].mxu1 %vm1194_vm3, %v7278_v55 }
 0x351   : > { %6209 = vmatpush3.bf16.xpose.msra.mxu1 %v1497_v30  ;;  %6210 = vmatprep.mubr.msk.bf16.mxu1 %vm6961_vm2, %v6960_v17  ;;  %v1642_v33 = vpop.permute.xlu1 %1641  ;;  %v1692_v36 = vpop.permute.xlu0 %1691 }
 0x352   : > { %6205 = vmatmul.mubr.msk.bf16.vlgmr.msra.gmra.mrb[4].mxu0 %vm1194_vm3, %v7285_v58  ;;  %6220 = vmatprep.subr.bf16.mxu1 %v6960_v17  ;;  %v1647_v35 = vsel %vm1194_vm3, %v1642_v33, 0  ;;  %v1697_v38 = vsel %vm1194_vm3, %v1692_v36, 0 }
 0x353   : > { %6215 = vmatpush3.bf16.xpose.msra.mxu0 %v1547_v31  ;;  %6216 = vmatprep.mubr.msk.bf16.mxu0 %vm6961_vm2, %v6960_v17 }
 0x354   : > { %6226 = vmatprep.subr.bf16.mxu0 %v6960_v17 }
 0x355   : > { %v1742_v37 = vpop.permute.xlu1 %1741  ;;  %v1792_v40 = vpop.permute.xlu0 %1791 }
 0x356   : > { %v1747_v39 = vsel %vm1194_vm3, %v1742_v37, 0  ;;  %v1797_v42 = vsel %vm1194_vm3, %v1792_v40, 0 }
 0x358   : > { %6211 = vmatmul.mubr.msk.bf16.vlgmr.msra.gmra.mrb[20].mxu1 %vm1194_vm3, %v7275_v54 }
 0x359   : > { %6221 = vmatpush3.bf16.xpose.msra.mxu1 %v1597_v34  ;;  %6222 = vmatprep.mubr.msk.bf16.mxu1 %vm6961_vm2, %v6960_v17  ;;  %v1842_v41 = vpop.permute.xlu1 %1841 }
 0x35a   : > { %6217 = vmatmul.mubr.msk.bf16.vlgmr.msra.gmra.mrb[8].mxu0 %vm1194_vm3, %v7295_v62  ;;  %6232 = vmatprep.subr.bf16.mxu1 %v6960_v17  ;;  %v1847_v43 = vsel %vm1194_vm3, %v1842_v41, 0 }
 0x35b   : > { %6227 = vmatpush3.bf16.xpose.msra.mxu0 %v1647_v35  ;;  %6228 = vmatprep.mubr.msk.bf16.mxu0 %vm6961_vm2, %v6960_v17 }
 0x35c   : > { %6238 = vmatprep.subr.bf16.mxu0 %v6960_v17 }
 0x35d   : > { %v1892_v44 = vpop.permute.xlu0 %1891  ;;  %v1942_v45 = vpop.permute.xlu1 %1941 }
 0x35e   : > { %v1897_v46 = vsel %vm1194_vm3, %v1892_v44, 0  ;;  %v1947_v47 = vsel %vm1194_vm3, %v1942_v45, 0 }
 0x360   : > { %6223 = vmatmul.mubr.msk.bf16.vlgmr.msra.gmra.mrb[24].mxu1 %vm1194_vm3, %v7282_v57 }
 0x361   : > { %6233 = vmatpush3.bf16.xpose.msra.mxu1 %v1697_v38  ;;  %6234 = vmatprep.mubr.msk.bf16.mxu1 %vm6961_vm2, %v6960_v17  ;;  %v2199_v48 = vpop.permute.xlu0 %2198  ;;  %v2248_v49 = vpop.permute.xlu1 %2247 }
 0x362   : > { %6229 = vmatmul.mubr.msk.bf16.vlgmr.msra.gmra.mrb[12].mxu0 %vm1194_vm3, %v7305_v2  ;;  %6244 = vmatprep.subr.bf16.mxu1 %v6960_v17  ;;  %v2205_v50 = vsel %vm2203_vm4, %v2199_v48, 0  ;;  %v2253_v51 = vsel %vm2203_vm4, %v2248_v49, 0 }
 0x363   : > { %6239 = vmatpush3.bf16.xpose.msra.mxu0 %v1747_v39  ;;  %6240 = vmatprep.mubr.msk.bf16.mxu0 %vm6961_vm2, %v6960_v17 }
 0x364   : > { %6250 = vmatprep.subr.bf16.mxu0 %v6960_v17 }
 0x365   : > { %v7512_v44 = vpop.permute.xlu0 %2295 }
 0x368   : > { %6235 = vmatmul.mubr.msk.bf16.vlgmr.msra.gmra.mrb[28].mxu1 %vm1194_vm3, %v7291_v61 }
 0x369   : > { %6245 = vmatpush3.bf16.xpose.msra.mxu1 %v1797_v42  ;;  %6246 = vmatprep.mubr.msk.bf16.mxu1 %vm6961_vm2, %v6960_v17 }
 0x36a   : > { %6241 = vmatmul.mubr.msk.bf16.vlgmr.msra.gmra.mrb[16].mxu0 %vm1194_vm3, %v7314_v7  ;;  %6256 = vmatprep.subr.bf16.mxu1 %v6960_v17 }
 0x36b   : > { %6251 = vmatpush3.bf16.xpose.msra.mxu0 %v1847_v43  ;;  %6252 = vmatprep.mubr.msk.bf16.mxu0 %vm6961_vm2, %v6960_v17 }
 0x36c   : > { %6262 = vmatprep.subr.bf16.mxu0 %v6960_v17 }
 0x370   : > { %6247 = vmatmul.mubr.msk.bf16.vlgmr.msra.gmra.mrb[32].mxu1 %vm1194_vm3, %v7301_v1 }
 0x371   : > { %6257 = vmatpush3.bf16.xpose.msra.mxu1 %v1897_v46  ;;  %6258 = vmatprep.mubr.msk.bf16.mxu1 %vm6961_vm2, %v6960_v17  ;;  %v7514_v46 = vpop.permute.xlu1 %2679 }
 0x372   : > { %6253 = vmatmul.mubr.msk.bf16.vlgmr.msra.gmra.mrb[20].mxu0 %vm1194_vm3, %v7326_v10  ;;  %6268 = vmatprep.subr.bf16.mxu1 %v6960_v17 }
 0x373   : > { %6263 = vmatpush3.bf16.xpose.msra.mxu0 %v1947_v47  ;;  %6264 = vmatprep.mubr.msk.bf16.mxu0 %vm6961_vm2, %v6960_v17 }
 0x374   : > { %6274 = vmatprep.subr.bf16.mxu0 %v6960_v17 }
 0x378   : > { %6259 = vmatmul.mubr.msk.bf16.vlgmr.msra.gmra.mrb[36].mxu1 %vm1194_vm3, %v7338_v13 }
 0x379   : > { %6269 = vmatpush3.bf16.msra.mxu1 %v2205_v50  ;;  %6270 = vmatprep.mubr.msk.bf16.mxu1 %vm6961_vm2, %v6960_v17 }
 0x37a   : > { %6265 = vmatmul.mubr.msk.bf16.vlgmr.msra.gmra.mrb[24].mxu0 %vm1194_vm3, %v7332_v12  ;;  %6280 = vmatprep.subr.bf16.mxu1 %v6960_v17 }
 0x37b   : > { %6275 = vmatpush3.bf16.msra.mxu0 %v2253_v51  ;;  %6276 = vmatprep.mubr.msk.bf16.mxu0 %vm6961_vm2, %v6960_v17 }
 0x37c   : > { %6286 = vmatprep.subr.bf16.mxu0 %v6960_v17 }
 0x3ba   : > { %v1235_v53 = vpop.f32.mrb[4].mxu1 }
 0x3bb   : > { %v7468_v54 = vadd.f32 %v1235_v53, %v7465_v52  ;;  %v6176_v55 = vpop.f32.mrb[5].mxu1 }
 0x3bc   : > { %v1238_v56 = vpop.f32.mrb[6].mxu1 }
 0x3bd   : > { %v6177_v57 = vpop.f32.mrb[7].mxu1  ;;  %v2006_v58 = vsel %vm2005_vm5, %v7468_v54, -inf }
 0x3be   : > { %2007 = vmax.xlane.f32.xlu0 %v2006_v58 }
 0x3c8   : > { %v1283_v60 = vpop.f32.mrb[8].mxu1 }
 0x3c9   : > { %v7478_v61 = vadd.f32 %v1283_v60, %v7475_v59  ;;  %v6182_v62 = vpop.f32.mrb[9].mxu1 }
 0x3ca   : > { %v1286_v63 = vpop.f32.mrb[10].mxu1  ;;  %v7526_v62 = vpop.permute.xlu0 %2391 }
 0x3cb   : > { %v6183_v0 = vpop.f32.mrb[11].mxu1  ;;  %v2009_v1 = vsel %vm2005_vm5, %v7478_v61, -inf }
 0x3cc   : > { %2010 = vmax.xlane.f32.xlu1 %v2009_v1  ;;  %v2344_v0 = vpop.permute.xlu1 %2343 }
 0x41b   : > { %v1333_v2 = vpop.f32.mrb[12].mxu1 }
 0x41c   : > { %v7483_v3 = vadd.f32 %v1333_v2, %v7465_v52  ;;  %v6188_v4 = vpop.f32.mrb[13].mxu1 }
 0x41d   : > { %v1336_v5 = vpop.f32.mrb[14].mxu1  ;;  %v1383_v6 = vpop.f32.mrb[0].mxu0 }
 0x41e   : > { %v7486_v7 = vadd.f32 %v1383_v6, %v7475_v59  ;;  %v6189_v9 = vpop.f32.mrb[15].mxu1  ;;  %v6194_v10 = vpop.f32.mrb[1].mxu0  ;;  %v2012_v12 = vsel %vm2005_vm5, %v7483_v3, -inf }
 0x41f   : > { %v1386_v13 = vpop.f32.mrb[2].mxu0  ;;  %2013 = vmax.xlane.f32.xlu0 %v2012_v12 }
 0x420   : > { %v6195_v16 = vpop.f32.mrb[3].mxu0  ;;  %v2015_v18 = vsel %vm2005_vm5, %v7486_v7, -inf }
 0x423   : > { %2016 = vmax.xlane.f32.xlu0 %v2015_v18  ;;  %v1433_v19 = vpop.f32.mrb[16].mxu1 }
 0x424   : > { %v7493_v20 = vadd.f32 %v1433_v19, %v7465_v52  ;;  %v6200_v21 = vpop.f32.mrb[17].mxu1  ;;  %v7538_v19 = vpop.permute.xlu0 %2487 }
 0x425   : > { %v1436_v22 = vpop.f32.mrb[18].mxu1  ;;  %v1483_v23 = vpop.f32.mrb[4].mxu0 }
 0x426   : > { %v7496_v24 = vadd.f32 %v1483_v23, %v7475_v59  ;;  %v6201_v25 = vpop.f32.mrb[19].mxu1  ;;  %v6206_v27 = vpop.f32.mrb[5].mxu0  ;;  %v2018_v28 = vsel %vm2005_vm5, %v7493_v20, -inf }
 0x427   : > { %v1486_v29 = vpop.f32.mrb[6].mxu0  ;;  %2019 = vmax.xlane.f32.xlu0 %v2018_v28  ;;  %v7540_v21 = vpop.permute.xlu1 %2439 }
 0x428   : > { %v6207_v30 = vpop.f32.mrb[7].mxu0  ;;  %v2021_v31 = vsel %vm2005_vm5, %v7496_v24, -inf }
 0x429   : > { %2022 = vmax.xlane.f32.xlu1 %v2021_v31  ;;  %v7542_v30 = vpop.permute.xlu0 %2583 }
 0x42b   : > { %v1533_v32 = vpop.f32.mrb[20].mxu1 }
 0x42c   : > { %v7503_v33 = vadd.f32 %v1533_v32, %v7465_v52  ;;  %v6212_v34 = vpop.f32.mrb[21].mxu1 }
 0x42d   : > { %v1536_v35 = vpop.f32.mrb[22].mxu1  ;;  %v1583_v36 = vpop.f32.mrb[8].mxu0 }
 0x42e   : > { %v7506_v37 = vadd.f32 %v1583_v36, %v7475_v59  ;;  %v6213_v38 = vpop.f32.mrb[23].mxu1  ;;  %v6218_v39 = vpop.f32.mrb[9].mxu0  ;;  %v2024_v40 = vsel %vm2005_vm5, %v7503_v33, -inf }
 0x42f   : > { %v1586_v41 = vpop.f32.mrb[10].mxu0  ;;  %2025 = vmax.xlane.f32.xlu0 %v2024_v40  ;;  %v7544_v34 = vpop.permute.xlu1 %2535 }
 0x430   : > { %v6219_v42 = vpop.f32.mrb[11].mxu0  ;;  %v2027_v43 = vsel %vm2005_vm5, %v7506_v37, -inf }
 0x431   : > { %2028 = vmax.xlane.f32.xlu1 %v2027_v43 }
 0x433   : > { %v1633_v45 = vpop.f32.mrb[24].mxu1 }
 0x434   : > { %v7517_v47 = vadd.f32 %v1633_v45, %v7465_v52  ;;  %v6224_v48 = vpop.f32.mrb[25].mxu1 }
 0x435   : > { %v1636_v49 = vpop.f32.mrb[26].mxu1  ;;  %v1683_v50 = vpop.f32.mrb[12].mxu0 }
 0x436   : > { %v7520_v51 = vadd.f32 %v1683_v50, %v7475_v59  ;;  %v6225_v53 = vpop.f32.mrb[27].mxu1  ;;  %v6230_v55 = vpop.f32.mrb[13].mxu0  ;;  %v2030_v56 = vsel %vm2005_vm5, %v7517_v47, -inf }
 0x437   : > { %v1686_v57 = vpop.f32.mrb[14].mxu0  ;;  %2031 = vmax.xlane.f32.xlu1 %v2030_v56  ;;  %v7547_v48 = vpop.permute.xlu1 %2631 }
 0x438   : > { %v6231_v58 = vpop.f32.mrb[15].mxu0  ;;  %v2033_v60 = vsel %vm2005_vm5, %v7520_v51, -inf }
 0x439   : > { %2034 = vmax.xlane.f32.xlu0 %v2033_v60  ;;  %v2301_v60 = vsel %vm2203_vm4, %v7512_v44, 0 }
 0x43b   : > { %v1733_v63 = vpop.f32.mrb[28].mxu1  ;;  %v7551_v53 = vpop.permute.xlu1 %2727 }
 0x43c   : > { %v7529_v1 = vadd.f32 %v1733_v63, %v7465_v52  ;;  %v6236_v2 = vpop.f32.mrb[29].mxu1 }
 0x43d   : > { %v1736_v4 = vpop.f32.mrb[30].mxu1  ;;  %v1783_v5 = vpop.f32.mrb[16].mxu0 }
 0x43e   : > { %v7532_v6 = vadd.f32 %v1783_v5, %v7475_v59  ;;  %v6237_v9 = vpop.f32.mrb[31].mxu1  ;;  %v6242_v10 = vpop.f32.mrb[17].mxu0  ;;  %v2036_v12 = vsel %vm2005_vm5, %v7529_v1, -inf }
 0x43f   : > { %v1786_v13 = vpop.f32.mrb[18].mxu0  ;;  %2037 = vmax.xlane.f32.xlu1 %v2036_v12 }
 0x440   : > { %v6243_v16 = vpop.f32.mrb[19].mxu0  ;;  %v2039_v18 = vsel %vm2005_vm5, %v7532_v6, -inf }
 0x441   : > { %2040 = vmax.xlane.f32.xlu0 %v2039_v18 }
 0x443   : > { %v1833_v22 = vpop.f32.mrb[32].mxu1 }
 0x444   : > { %v6248_v23 = vpop.f32.mrb[33].mxu1  ;;  %v7576_v44 = vadd.f32 %v1833_v22, %v7465_v52 }
 0x445   : > { %v1836_v25 = vpop.f32.mrb[34].mxu1  ;;  %v1883_v27 = vpop.f32.mrb[20].mxu0 }
 0x446   : > { %v6249_v28 = vpop.f32.mrb[35].mxu1  ;;  %v6254_v29 = vpop.f32.mrb[21].mxu0  ;;  %v7579_v63 = vadd.f32 %v1883_v27, %v7475_v59 }
 0x447   : > { %v1886_v31 = vpop.f32.mrb[22].mxu0 }
 0x448   : > { %v6255_v32 = vpop.f32.mrb[23].mxu0  ;;  %v2045_v5 = vsel %vm2005_vm5, %v7579_v63, -inf }
 0x44b   : > { %v2008_v35 = vpop.xlane.xlu0 %2007  ;;  %v1933_v36 = vpop.f32.mrb[36].mxu1 }
 0x44c   : > { %v2054_v38 = vsub.f32 %v7468_v54, %v2008_v35  ;;  %v6260_v39 = vpop.f32.mrb[37].mxu1  ;;  %v7582_v2 = vadd.f32 %v1933_v36, %v7465_v52 }
 0x44d   : > { %v1936_v40 = vpop.f32.mrb[38].mxu1  ;;  %v1983_v41 = vpop.f32.mrb[24].mxu0 }
 0x44e   : > { %v2070_v42 = vmul.f32 1.442695, %v2054_v38  ;;  %v6261_v43 = vpop.f32.mrb[39].mxu1  ;;  %v6266_v45 = vpop.f32.mrb[25].mxu0  ;;  %v7587_v4 = vadd.f32 %v1983_v41, %v7475_v59  ;;  %v2048_v9 = vsel %vm2005_vm5, %v7582_v2, -inf }
 0x44f   : > { %v1986_v49 = vpop.f32.mrb[26].mxu0 }
 0x450   : > { %6760 = vpow2.f32 %v2070_v42  ;;  %v6267_v50 = vpop.f32.mrb[27].mxu0  ;;  %2823 = vrot.lane.b32.xlu1 %v7330_v11, %s6970_s1  ;;  %v2051_v10 = vsel %vm2005_vm5, %v7587_v4, -inf }
 0x457   : > { %2775 = vrot.lane.b32.xlu0 %v7318_v8, %s6970_s1 }
 0x459   : > { %v2011_v54 = vpop.xlane.xlu1 %2010 }
 0x45a   : > { %v7555_v55 = vpop.eup %6760  ;;  %v2055_v56 = vsub.f32 %v7478_v61, %v2011_v54  ;;  %v2349_v61 = vsel %vm2203_vm4, %v2344_v0, 0  ;;  %v2042_v0 = vsel %vm2005_vm5, %v7576_v44, -inf }
 0x45b   : > { %v2182_v57 = vpack.c.bf16 %v7555_v55, %v7555_v55 }
 0x45c   : > { %v2072_v58 = vmul.f32 1.442695, %v2055_v56 }
 0x45d   : > { %6271 = vmatmul.mubr.msk.bf16.vlgmr.msra.gmra.mrb[40].mxu1 %vm2005_vm5, %v2182_v57 }
 0x45e   : > { %6762 = vpow2.f32 %v2072_v58  ;;  %6281 = vmatpush3.bf16.msra.mxu1 %v2301_v60  ;;  %6282 = vmatprep.mubr.msk.bf16.mxu1 %vm6961_vm2, %v6960_v17 }
 0x45f   : > { %6292 = vmatprep.subr.bf16.mxu1 %v6960_v17 }
 0x468   : > { %v7566_v8 = vpop.eup %6762 }
 0x469   : > { %v2183_v11 = vpack.c.bf16 %v7566_v8, %v7566_v8 }
 0x46b   : > { %6277 = vmatmul.mubr.msk.bf16.vlgmr.msra.gmra.mrb[28].mxu0 %vm2005_vm5, %v2183_v11 }
 0x46c   : > { %6287 = vmatpush3.bf16.msra.mxu0 %v2349_v61  ;;  %6288 = vmatprep.mubr.msk.bf16.mxu0 %vm6961_vm2, %v6960_v17 }
 0x46d   : > { %6298 = vmatprep.subr.bf16.mxu0 %v6960_v17 }
 0x474   : > { %2043 = vmax.xlane.f32.xlu1 %v2042_v0 }
 0x476   : > { %2046 = vmax.xlane.f32.xlu0 %v2045_v5 }
 0x478   : > { %2049 = vmax.xlane.f32.xlu1 %v2048_v9 }
 0x47a   : > { %2052 = vmax.xlane.f32.xlu0 %v2051_v10 }
 0x489   : > { %2919 = vrot.lane.b32.xlu1 %v7344_v14, %s6970_s1 }
 0x490   : > { %2871 = vrot.lane.b32.xlu0 %v7348_v15, %s6970_s1  ;;  %s6971_s1 = smov 4  }
 0x4ac   : > { %v2014_v52 = vpop.xlane.xlu0 %2013 }
 0x4ad   : > { %v2056_v59 = vsub.f32 %v7483_v3, %v2014_v52 }
 0x4af   : > { %v2074_v12 = vmul.f32 1.442695, %v2056_v59 }
 0x4b0   : > { %v2017_v13 = vpop.xlane.xlu0 %2016 }
 0x4b1   : > { %6764 = vpow2.f32 %v2074_v12  ;;  %v2057_v16 = vsub.f32 %v7486_v7, %v2017_v13  ;;  %v2397_v7 = vsel %vm2203_vm4, %v7526_v62, 0  ;;  %v2445_v62 = vsel %vm2203_vm4, %v7540_v21, 0 }
 0x4b2   : > { %v2493_v21 = vsel %vm2203_vm4, %v7538_v19, 0  ;;  %v2541_v19 = vsel %vm2203_vm4, %v7544_v34, 0  ;;  %v2589_v34 = vsel %vm2203_vm4, %v7542_v30, 0  ;;  %v2637_v30 = vsel %vm2203_vm4, %v7547_v48, 0 }
 0x4b3   : > { %v2076_v18 = vmul.f32 1.442695, %v2057_v16 }
 0x4b4   : > { %v2020_v22 = vpop.xlane.xlu0 %2019 }
 0x4b5   : > { %6766 = vpow2.f32 %v2076_v18  ;;  %v2058_v23 = vsub.f32 %v7493_v20, %v2020_v22  ;;  %v2685_v18 = vsel %vm2203_vm4, %v7514_v46, 0 }
 0x4b6   : > { %v2023_v25 = vpop.xlane.xlu1 %2022 }
 0x4b7   : > { %v2078_v27 = vmul.f32 1.442695, %v2058_v23  ;;  %v2059_v14 = vsub.f32 %v7496_v24, %v2023_v25  ;;  %v2733_v23 = vsel %vm2203_vm4, %v7551_v53, 0 }
 0x4b9   : > { %6768 = vpow2.f32 %v2078_v27  ;;  %v2080_v28 = vmul.f32 1.442695, %v2059_v14 }
 0x4bb   : > { %v6765_v15 = vpop.eup %6764  ;;  %6770 = vpow2.f32 %v2080_v28 }
 0x4bc   : > { %v2026_v29 = vpop.xlane.xlu0 %2025  ;;  %v2108_v3 = vsel %vm2005_vm5, %v6765_v15, 0.0  ;;  %v2184_v31 = vpack.c.bf16 %v6765_v15, %v6765_v15 }
 0x4bd   : > { %v2060_v32 = vsub.f32 %v7503_v33, %v2026_v29  ;;  %2109 = vadd.xlane.f32.xlu0 %v2108_v3 }
 0x4be   : > { %v2029_v35 = vpop.xlane.xlu1 %2028  ;;  %6283 = vmatmul.mubr.msk.bf16.vlgmr.msra.gmra.mrb[44].mxu1 %vm2005_vm5, %v2184_v31 }
 0x4bf   : > { %v6767_v20 = vpop.eup %6766  ;;  %v2082_v36 = vmul.f32 1.442695, %v2060_v32  ;;  %v2061_v24 = vsub.f32 %v7506_v37, %v2029_v35  ;;  %6293 = vmatpush3.bf16.msra.mxu1 %v2397_v7  ;;  %6294 = vmatprep.mubr.msk.bf16.mxu1 %vm6961_vm2, %v6960_v17 }
 0x4c0   : > { %v2111_v38 = vsel %vm2005_vm5, %v6767_v20, 0.0  ;;  %v2185_v39 = vpack.c.bf16 %v6767_v20, %v6767_v20  ;;  %6304 = vmatprep.subr.bf16.mxu1 %v6960_v17 }
 0x4c1   : > { %6772 = vpow2.f32 %v2082_v36  ;;  %v2084_v33 = vmul.f32 1.442695, %v2061_v24  ;;  %2112 = vadd.xlane.f32.xlu1 %v2111_v38 }
 0x4c2   : > { %6289 = vmatmul.mubr.msk.bf16.vlgmr.msra.gmra.mrb[32].mxu0 %vm2005_vm5, %v2185_v39 }
 0x4c3   : > { %v6769_v40 = vpop.eup %6768  ;;  %6774 = vpow2.f32 %v2084_v33  ;;  %6299 = vmatpush3.bf16.msra.mxu0 %v2445_v62  ;;  %6300 = vmatprep.mubr.msk.bf16.mxu0 %vm6961_vm2, %v6960_v17 }
 0x4c4   : > { %v2032_v37 = vpop.xlane.xlu1 %2031  ;;  %v2114_v41 = vsel %vm2005_vm5, %v6769_v40, 0.0  ;;  %v2186_v42 = vpack.c.bf16 %v6769_v40, %v6769_v40  ;;  %6310 = vmatprep.subr.bf16.mxu0 %v6960_v17 }
 0x4c5   : > { %v6771_v43 = vpop.eup %6770  ;;  %v2062_v45 = vsub.f32 %v7517_v47, %v2032_v37  ;;  %2115 = vadd.xlane.f32.xlu0 %v2114_v41 }
 0x4c6   : > { %6295 = vmatmul.mubr.msk.bf16.vlgmr.msra.gmra.mrb[48].mxu1 %vm2005_vm5, %v2186_v42  ;;  %v2035_v49 = vpop.xlane.xlu0 %2034  ;;  %v2117_v56 = vsel %vm2005_vm5, %v6771_v43, 0.0  ;;  %v2187_v57 = vpack.c.bf16 %v6771_v43, %v6771_v43 }
 0x4c7   : > { %v2086_v50 = vmul.f32 1.442695, %v2062_v45  ;;  %6305 = vmatpush3.bf16.msra.mxu1 %v2493_v21  ;;  %v2063_v54 = vsub.f32 %v7520_v51, %v2035_v49  ;;  %6306 = vmatprep.mubr.msk.bf16.mxu1 %vm6961_vm2, %v6960_v17 }
 0x4c8   : > { %6316 = vmatprep.subr.bf16.mxu1 %v6960_v17 }
 0x4c9   : > { %6776 = vpow2.f32 %v2086_v50  ;;  %v2088_v47 = vmul.f32 1.442695, %v2063_v54  ;;  %2118 = vadd.xlane.f32.xlu0 %v2117_v56 }
 0x4ca   : > { %6301 = vmatmul.mubr.msk.bf16.vlgmr.msra.gmra.mrb[36].mxu0 %vm2005_vm5, %v2187_v57 }
 0x4cb   : > { %v6773_v58 = vpop.eup %6772  ;;  %6778 = vpow2.f32 %v2088_v47  ;;  %6311 = vmatpush3.bf16.msra.mxu0 %v2541_v19  ;;  %6312 = vmatprep.mubr.msk.bf16.mxu0 %vm6961_vm2, %v6960_v17  ;;  %v2102_v47 = vsel %vm2005_vm5, %v7555_v55, 0.0 }
 0x4cc   : > { %v2038_v51 = vpop.xlane.xlu1 %2037  ;;  %v2120_v60 = vsel %vm2005_vm5, %v6773_v58, 0.0  ;;  %v2188_v11 = vpack.c.bf16 %v6773_v58, %v6773_v58  ;;  %6322 = vmatprep.subr.bf16.mxu0 %v6960_v17  ;;  %v2105_v58 = vsel %vm2005_vm5, %v7566_v8, 0.0 }
 0x4cd   : > { %v6775_v61 = vpop.eup %6774  ;;  %v2064_v0 = vsub.f32 %v7529_v1, %v2038_v51  ;;  %2121 = vadd.xlane.f32.xlu0 %v2120_v60 }
 0x4ce   : > { %6307 = vmatmul.mubr.msk.bf16.vlgmr.msra.gmra.mrb[52].mxu1 %vm2005_vm5, %v2188_v11  ;;  %v2041_v5 = vpop.xlane.xlu0 %2040  ;;  %v2123_v9 = vsel %vm2005_vm5, %v6775_v61, 0.0  ;;  %v2189_v59 = vpack.c.bf16 %v6775_v61, %v6775_v61 }
 0x4cf   : > { %v2090_v10 = vmul.f32 1.442695, %v2064_v0  ;;  %6317 = vmatpush3.bf16.msra.mxu1 %v2589_v34  ;;  %v2065_v52 = vsub.f32 %v7532_v6, %v2041_v5  ;;  %2124 = vadd.xlane.f32.xlu1 %v2123_v9 }
 0x4d0   : > { %6318 = vmatprep.mubr.msk.bf16.mxu1 %vm6961_vm2, %v6960_v17  ;;  %6328 = vmatprep.subr.bf16.mxu1 %v6960_v17  ;;  %v2824_v29 = vpop.permute.xlu1 %2823 }
 0x4d1   : > { %6780 = vpow2.f32 %v2090_v10  ;;  %v2092_v1 = vmul.f32 1.442695, %v2065_v52  ;;  %v2829_v31 = vsel %vm2203_vm4, %v2824_v29, 0 }
 0x4d2   : > { %6313 = vmatmul.mubr.msk.bf16.vlgmr.msra.gmra.mrb[40].mxu0 %vm2005_vm5, %v2189_v59  ;;  %v2776_v27 = vpop.permute.xlu0 %2775 }
 0x4d3   : > { %v6777_v12 = vpop.eup %6776  ;;  %6782 = vpow2.f32 %v2092_v1  ;;  %6323 = vmatpush3.bf16.msra.mxu0 %v2637_v30  ;;  %6324 = vmatprep.mubr.msk.bf16.mxu0 %vm6961_vm2, %v6960_v17  ;;  %v2781_v15 = vsel %vm2203_vm4, %v2776_v27, 0 }
 0x4d4   : > { %v2126_v6 = vsel %vm2005_vm5, %v6777_v12, 0.0  ;;  %v2190_v13 = vpack.c.bf16 %v6777_v12, %v6777_v12  ;;  %6334 = vmatprep.subr.bf16.mxu0 %v6960_v17 }
 0x4d5   : > { %v6779_v16 = vpop.eup %6778  ;;  %2127 = vadd.xlane.f32.xlu0 %v2126_v6 }
 0x4d6   : > { %6319 = vmatmul.mubr.msk.bf16.vlgmr.msra.gmra.mrb[56].mxu1 %vm2005_vm5, %v2190_v13  ;;  %v2129_v48 = vsel %vm2005_vm5, %v6779_v16, 0.0  ;;  %v2191_v22 = vpack.c.bf16 %v6779_v16, %v6779_v16 }
 0x4d7   : > { %6329 = vmatpush3.bf16.msra.mxu1 %v2685_v18  ;;  %2130 = vadd.xlane.f32.xlu1 %v2129_v48 }
 0x4d8   : > { %6330 = vmatprep.mubr.msk.bf16.mxu1 %vm6961_vm2, %v6960_v17  ;;  %6340 = vmatprep.subr.bf16.mxu1 %v6960_v17 }
 0x4da   : > { %6325 = vmatmul.mubr.msk.bf16.vlgmr.msra.gmra.mrb[44].mxu0 %vm2005_vm5, %v2191_v22 }
 0x4db   : > { %v6781_v25 = vpop.eup %6780  ;;  %6335 = vmatpush3.bf16.msra.mxu0 %v2733_v23  ;;  %6336 = vmatprep.mubr.msk.bf16.mxu0 %vm6961_vm2, %v6960_v17 }
 0x4dc   : > { %v2132_v46 = vsel %vm2005_vm5, %v6781_v25, 0.0  ;;  %v2192_v14 = vpack.c.bf16 %v6781_v25, %v6781_v25  ;;  %6346 = vmatprep.subr.bf16.mxu0 %v6960_v17 }
 0x4dd   : > { %v6783_v28 = vpop.eup %6782  ;;  %2133 = vadd.xlane.f32.xlu0 %v2132_v46 }
 0x4de   : > { %6331 = vmatmul.mubr.msk.bf16.vlgmr.msra.gmra.mrb[60].mxu1 %vm2005_vm5, %v2192_v14  ;;  %v2135_v53 = vsel %vm2005_vm5, %v6783_v28, 0.0  ;;  %v2193_v3 = vpack.c.bf16 %v6783_v28, %v6783_v28 }
 0x4df   : > { %6341 = vmatpush3.bf16.msra.mxu1 %v2781_v15  ;;  %2136 = vadd.xlane.f32.xlu1 %v2135_v53 }
 0x4e0   : > { %6342 = vmatprep.mubr.msk.bf16.mxu1 %vm6961_vm2, %v6960_v17  ;;  %6352 = vmatprep.subr.bf16.mxu1 %v6960_v17 }
 0x4e2   : > { %6337 = vmatmul.mubr.msk.bf16.vlgmr.msra.gmra.mrb[48].mxu0 %vm2005_vm5, %v2193_v3 }
 0x4e3   : > { %6347 = vmatpush3.bf16.msra.mxu0 %v2829_v31  ;;  %6348 = vmatprep.mubr.msk.bf16.mxu0 %vm6961_vm2, %v6960_v17 }
 0x4e4   : > { %6358 = vmatprep.subr.bf16.mxu0 %v6960_v17 }
 0x501   : > { %v2044_v32 = vpop.xlane.xlu1 %2043 }
 0x502   : > { %v2066_v7 = vsub.f32 %v7576_v44, %v2044_v32 }
 0x503   : > { %v2047_v35 = vpop.xlane.xlu0 %2046 }
 0x504   : > { %v2094_v20 = vmul.f32 1.442695, %v2066_v7  ;;  %v2067_v36 = vsub.f32 %v7579_v63, %v2047_v35 }
 0x505   : > { %v2050_v24 = vpop.xlane.xlu1 %2049 }
 0x506   : > { %6784 = vpow2.f32 %v2094_v20  ;;  %v2096_v38 = vmul.f32 1.442695, %v2067_v36  ;;  %v2068_v39 = vsub.f32 %v7582_v2, %v2050_v24 }
 0x507   : > { %v2053_v33 = vpop.xlane.xlu0 %2052 }
 0x508   : > { %6786 = vpow2.f32 %v2096_v38  ;;  %v2098_v62 = vmul.f32 1.442695, %v2068_v39  ;;  %v2069_v40 = vsub.f32 %v7587_v4, %v2053_v33 }
 0x509   : > { %v2920_v63 = vpop.permute.xlu1 %2919 }
 0x50a   : > { %6788 = vpow2.f32 %v2098_v62  ;;  %v2100_v37 = vmul.f32 1.442695, %v2069_v40  ;;  %v2925_v4 = vsel %vm2203_vm4, %v2920_v63, 0 }
 0x50b   : > { %v2872_v42 = vpop.permute.xlu0 %2871 }
 0x50c   : > { %6790 = vpow2.f32 %v2100_v37  ;;  %v2877_v21 = vsel %vm2203_vm4, %v2872_v42, 0 }
 0x510   : > { %v6785_v41 = vpop.eup %6784 }
 0x511   : > { %v2138_v44 = vsel %vm2005_vm5, %v6785_v41, 0.0  ;;  %v2194_v43 = vpack.c.bf16 %v6785_v41, %v6785_v41 }
 0x512   : > { %v6787_v45 = vpop.eup %6786  ;;  %2139 = vadd.xlane.f32.xlu0 %v2138_v44 }
 0x513   : > { %6343 = vmatmul.mubr.msk.bf16.vlgmr.msra.gmra.mrb[64].mxu1 %vm2005_vm5, %v2194_v43  ;;  %v2141_v2 = vsel %vm2005_vm5, %v6787_v45, 0.0  ;;  %v2195_v49 = vpack.c.bf16 %v6787_v45, %v6787_v45 }
 0x514   : > { %v6789_v50 = vpop.eup %6788  ;;  %6353 = vmatpush3.bf16.msra.mxu1 %v2877_v21  ;;  %2142 = vadd.xlane.f32.xlu1 %v2141_v2 }
 0x515   : > { %6349 = vmatmul.mubr.msk.bf16.vlgmr.msra.gmra.mrb[52].mxu0 %vm2005_vm5, %v2195_v49  ;;  %v2144_v54 = vsel %vm2005_vm5, %v6789_v50, 0.0  ;;  %6354 = vmatprep.mubr.msk.bf16.mxu1 %vm6961_vm2, %v6960_v17  ;;  %v2196_v19 = vpack.c.bf16 %v6789_v50, %v6789_v50 }
 0x516   : > { %v6791_v56 = vpop.eup %6790  ;;  %6359 = vmatpush3.bf16.msra.mxu0 %v2925_v4  ;;  %2145 = vadd.xlane.f32.xlu0 %v2144_v54 }
 0x517   : > { %v2147_v57 = vsel %vm2005_vm5, %v6791_v56, 0.0  ;;  %6360 = vmatprep.mubr.msk.bf16.mxu0 %vm6961_vm2, %v6960_v17  ;;  %6364 = vmatprep.subr.bf16.mxu1 %v6960_v17  ;;  %v2197_v51 = vpack.c.bf16 %v6791_v56, %v6791_v56 }
 0x518   : > { %2148 = vadd.xlane.f32.xlu1 %v2147_v57  ;;  %6372 = vmatprep.subr.bf16.mxu0 %v6960_v17 }
 0x51a   : > { %2103 = vadd.xlane.f32.xlu0 %v2102_v47 }
 0x51b   : > { %6355 = vmatmul.mubr.msk.bf16.vlgmr.msra.gmra.mrb[68].mxu1 %vm2005_vm5, %v2196_v19 }
 0x51c   : > { %2106 = vadd.xlane.f32.xlu1 %v2105_v58  ;;  %6368 = vmatprep.mubr.msk.bf16.mxu1 %vm6961_vm2, %v6960_v17 }
 0x51d   : > { %6361 = vmatmul.mubr.msk.bf16.vlgmr.msra.gmra.mrb[56].mxu0 %vm2005_vm5, %v2197_v51 }
 0x51e   : > { %6376 = vmatprep.mubr.msk.bf16.mxu0 %vm6961_vm2, %v6960_v17 }
 0x530   : > { %v7705_v60 = vpop.f32.mrb[40].mxu1 }
 0x531   : > { %v6272_v55 = vpop.f32.mrb[41].mxu1 }
 0x532   : > { %v2244_v11 = vpop.f32.mrb[42].mxu1 }
 0x533   : > { %v6273_v61 = vpop.f32.mrb[43].mxu1 }
 0x53e   : > { %v7707_v0 = vpop.f32.mrb[28].mxu0 }
 0x53f   : > { %v6278_v34 = vpop.f32.mrb[29].mxu0 }
 0x540   : > { %v2292_v5 = vpop.f32.mrb[30].mxu0 }
 0x541   : > { %v6279_v8 = vpop.f32.mrb[31].mxu0 }
 0x54a   : > { %v2110_v9 = vpop.xlane.xlu0 %2109 }
 0x54b   : > { %6792 = vrcp.f32 %v2110_v9 }
 0x54e   : > { %v2113_v10 = vpop.xlane.xlu1 %2112 }
 0x54f   : > { %6794 = vrcp.f32 %v2113_v10 }
 0x552   : > { %v2116_v52 = vpop.xlane.xlu0 %2115 }
 0x553   : > { %6796 = vrcp.f32 %v2116_v52 }
 0x555   : > { %v6793_v6 = vpop.eup %6792 }
 0x556   : > { %v2119_v59 = vpop.xlane.xlu0 %2118 }
 0x557   : > { %6798 = vrcp.f32 %v2119_v59 }
 0x559   : > { %v6795_v16 = vpop.eup %6794 }
 0x55a   : > { %v2122_v25 = vpop.xlane.xlu0 %2121 }
 0x55b   : > { %6800 = vrcp.f32 %v2122_v25 }
 0x55c   : > { %v2125_v46 = vpop.xlane.xlu1 %2124 }
 0x55d   : > { %6802 = vrcp.f32 %v2125_v46  ;;  %v6797_v3 = vpop.eup %6796 }
 0x561   : > { %v6799_v32 = vpop.eup %6798 }
 0x562   : > { %v2128_v24 = vpop.xlane.xlu0 %2127 }
 0x563   : > { %6804 = vrcp.f32 %v2128_v24 }
 0x564   : > { %v2131_v39 = vpop.xlane.xlu1 %2130 }
 0x565   : > { %6806 = vrcp.f32 %v2131_v39  ;;  %v6801_v42 = vpop.eup %6800 }
 0x567   : > { %v6803_v43 = vpop.eup %6802 }
 0x56a   : > { %v2134_v49 = vpop.xlane.xlu0 %2133 }
 0x56b   : > { %6808 = vrcp.f32 %v2134_v49 }
 0x56c   : > { %v2137_v4 = vpop.xlane.xlu1 %2136 }
 0x56d   : > { %6810 = vrcp.f32 %v2137_v4  ;;  %v6805_v58 = vpop.eup %6804 }
 0x56f   : > { %v6807_v55 = vpop.eup %6806 }
 0x591   : > { %v2337_v1 = vpop.f32.mrb[44].mxu1 }
 0x592   : > { %v6284_v30 = vpop.f32.mrb[45].mxu1  ;;  %v2969_v48 = vmul.f32 %v6793_v6, %v2337_v1 }
 0x593   : > { %v2340_v12 = vpop.f32.mrb[46].mxu1  ;;  %v6809_v30 = vpop.eup %6808 }
 0x594   : > { %v6285_v13 = vpop.f32.mrb[47].mxu1  ;;  %v6811_v6 = vpop.eup %6810 }
 0x595   : > { %v2385_v18 = vpop.f32.mrb[32].mxu0 }
 0x596   : > { %v2970_v22 = vmul.f32 %v6795_v16, %v2385_v18  ;;  %v6290_v23 = vpop.f32.mrb[33].mxu0 }
 0x597   : > { %v2388_v27 = vpop.f32.mrb[34].mxu0 }
 0x598   : > { %v6666_v14 = vpack.i.bf16 %v2970_v22, %v2969_v48  ;;  %v6291_v28 = vpop.f32.mrb[35].mxu0 }
 0x599   : > { %v2433_v15 = vpop.f32.mrb[48].mxu1  ;;  %v6738_v28 = vld [vmem:[%s7144_s5] sm:$0xff]  }
 0x59a   : > { %6667 = vrot.lane.b32.xlu0 %v6666_v14, %s6971_s1  ;;  %v6296_v53 = vpop.f32.mrb[49].mxu1  ;;  %v2971_v35 = vmul.f32 %v6797_v3, %v2433_v15  ;;  %6365 = vmatpush3.bf16.msra.mxu1 %v6738_v28 }
 0x59b   : > { %v2436_v29 = vpop.f32.mrb[50].mxu1  ;;  %6366 = vmatprep.subr.bf16.mxu1 %v6960_v17 }
 0x59c   : > { %v6297_v31 = vpop.f32.mrb[51].mxu1 }
 0x59d   : > { %v2481_v7 = vpop.f32.mrb[36].mxu0 }
 0x59e   : > { %v2972_v20 = vmul.f32 %v6799_v32, %v2481_v7  ;;  %v6302_v36 = vpop.f32.mrb[37].mxu0 }
 0x59f   : > { %v2484_v38 = vpop.f32.mrb[38].mxu0  ;;  %v2140_v27 = vpop.xlane.xlu0 %2139 }
 0x5a0   : > { %v6671_v33 = vpack.i.bf16 %v2972_v20, %v2971_v35  ;;  %v6303_v62 = vpop.f32.mrb[39].mxu0  ;;  %6812 = vrcp.f32 %v2140_v27  ;;  %v6739_v38 = vld [vmem:[%s7144_s5 + $0x8] sm:$0xff]   ;;  %s8359_s5 = smov 28  }
 0x5a1   : > { %v2529_v40 = vpop.f32.mrb[52].mxu1  ;;  %v2143_v46 = vpop.xlane.xlu1 %2142  ;;  %6367 = vmatpush3.bf16.msra.mxu1 %v6739_v38 }
 0x5a2   : > { %6672 = vrot.lane.b32.xlu1 %v6671_v33, %s6972_s28  ;;  %v6308_v37 = vpop.f32.mrb[53].mxu1  ;;  %v2973_v63 = vmul.f32 %v6801_v42, %v2529_v40  ;;  %6814 = vrcp.f32 %v2143_v46  ;;  %6380 = vmatprep.subr.bf16.mxu1 %v6960_v17 }
 0x5a3   : > { %v2532_v41 = vpop.f32.mrb[54].mxu1  ;;  %v2146_v14 = vpop.xlane.xlu0 %2145 }
 0x5a4   : > { %v6309_v44 = vpop.f32.mrb[55].mxu1  ;;  %6816 = vrcp.f32 %v2146_v14 }
 0x5a5   : > { %v2577_v45 = vpop.f32.mrb[40].mxu0  ;;  %v2149_v15 = vpop.xlane.xlu1 %2148 }
 0x5a6   : > { %v2974_v21 = vmul.f32 %v6803_v43, %v2577_v45  ;;  %v6314_v2 = vpop.f32.mrb[41].mxu0  ;;  %6818 = vrcp.f32 %v2149_v15 }
 0x5a7   : > { %v2580_v50 = vpop.f32.mrb[42].mxu0 }
 0x5a8   : > { %v6676_v54 = vpack.i.bf16 %v2974_v21, %v2973_v63  ;;  %v6315_v56 = vpop.f32.mrb[43].mxu0 }
 0x5a9   : > { %v2625_v57 = vpop.f32.mrb[56].mxu1  ;;  %v2107_v56 = vpop.xlane.xlu1 %2106 }
 0x5aa   : > { %6677 = vrot.lane.b32.xlu1 %v6676_v54, %s6973_s20  ;;  %v6320_v47 = vpop.f32.mrb[57].mxu1  ;;  %v2975_v61 = vmul.f32 %v6805_v58, %v2625_v57  ;;  %v6813_v29 = vpop.eup %6812 }
 0x5ab   : > { %v2628_v19 = vpop.f32.mrb[58].mxu1  ;;  %v2104_v54 = vpop.xlane.xlu0 %2103 }
 0x5ac   : > { %v6321_v51 = vpop.f32.mrb[59].mxu1  ;;  %v6815_v31 = vpop.eup %6814  ;;  %6820 = vrcp.f32 %v2104_v54 }
 0x5ad   : > { %v2673_v11 = vpop.f32.mrb[44].mxu0  ;;  %6822 = vrcp.f32 %v2107_v56 }
 0x5ae   : > { %v2976_v34 = vmul.f32 %v6807_v55, %v2673_v11  ;;  %v6326_v5 = vpop.f32.mrb[45].mxu0  ;;  %v6817_v37 = vpop.eup %6816 }
 0x5af   : > { %v2676_v8 = vpop.f32.mrb[46].mxu0 }
 0x5b0   : > { %v6681_v9 = vpack.i.bf16 %v2976_v34, %v2975_v61  ;;  %v6327_v10 = vpop.f32.mrb[47].mxu0  ;;  %v6819_v42 = vpop.eup %6818 }
 0x5b1   : > { %v2721_v52 = vpop.f32.mrb[60].mxu1 }
 0x5b2   : > { %6682 = vrot.lane.b32.xlu1 %v6681_v9, %s6974_s11  ;;  %v6332_v59 = vpop.f32.mrb[61].mxu1  ;;  %v2977_v16 = vmul.f32 %v6809_v30, %v2721_v52 }
 0x5b3   : > { %v2724_v1 = vpop.f32.mrb[62].mxu1 }
 0x5b4   : > { %v6333_v12 = vpop.f32.mrb[63].mxu1 }
 0x5b5   : > { %v2769_v13 = vpop.f32.mrb[48].mxu0 }
 0x5b6   : > { %v2978_v18 = vmul.f32 %v6811_v6, %v2769_v13  ;;  %v6338_v48 = vpop.f32.mrb[49].mxu0  ;;  %v6821_v58 = vpop.eup %6820 }
 0x5b7   : > { %v2772_v22 = vpop.f32.mrb[50].mxu0  ;;  %v6823_v55 = vpop.eup %6822  ;;  %v2967_v9 = vmul.f32 %v6821_v58, %v7705_v60 }
 0x5b8   : > { %v6686_v23 = vpack.i.bf16 %v2978_v18, %v2977_v16  ;;  %v6339_v25 = vpop.f32.mrb[51].mxu0  ;;  %v2968_v10 = vmul.f32 %v6823_v55, %v7707_v0 }
 0x5ba   : > { %6687 = vrot.lane.b32.xlu0 %v6686_v23, %s8361_s14 }
 0x5e6   : > { %v2817_v53 = vpop.f32.mrb[64].mxu1 }
 0x5e7   : > { %v6344_v3 = vpop.f32.mrb[65].mxu1  ;;  %v2979_v35 = vmul.f32 %v6813_v29, %v2817_v53 }
 0x5e8   : > { %v2820_v32 = vpop.f32.mrb[66].mxu1  ;;  %v2865_v7 = vpop.f32.mrb[52].mxu0 }
 0x5e9   : > { %v2980_v20 = vmul.f32 %v6815_v31, %v2865_v7  ;;  %v6345_v36 = vpop.f32.mrb[67].mxu1  ;;  %v6350_v24 = vpop.f32.mrb[53].mxu0 }
 0x5ea   : > { %v2868_v39 = vpop.f32.mrb[54].mxu0 }
 0x5eb   : > { %v6691_v33 = vpack.i.bf16 %v2980_v20, %v2979_v35  ;;  %v6351_v62 = vpop.f32.mrb[55].mxu0 }
 0x5ed   : > { %6692 = vrot.lane.b32.xlu1 %v6691_v33, %s8360_s24  ;;  %v6896_v33 = vld [vmem:[#allocation2] sm:$0xff]  ;;  %s8402_s24 = sld [smem:[#allocation21_spill]] }
 0x5ee   : > { %v2913_v40 = vpop.f32.mrb[68].mxu1 }
 0x5ef   : > { %v6356_v41 = vpop.f32.mrb[69].mxu1  ;;  %v2981_v45 = vmul.f32 %v6817_v37, %v2913_v40 }
 0x5f0   : > { %v2916_v44 = vpop.f32.mrb[70].mxu1  ;;  %v2961_v43 = vpop.f32.mrb[56].mxu0  ;;  %v6897_v41 = vld [vmem:[#allocation2 + $0x8] sm:$0xff] }
 0x5f1   : > { %v2982_v63 = vmul.f32 %v6819_v42, %v2961_v43  ;;  %v6357_v21 = vpop.f32.mrb[71].mxu1  ;;  %v6362_v2 = vpop.f32.mrb[57].mxu0 }
 0x5f2   : > { %v2964_v49 = vpop.f32.mrb[58].mxu0 }
 0x5f3   : > { %v6696_v50 = vpack.i.bf16 %v2982_v63, %v2981_v45  ;;  %v6363_v4 = vpop.f32.mrb[59].mxu0  ;;  %s8403_s14 = scalar_lea.vmem %s8402_s24, %s7118_s0  ;;  %s8411_s24 = scalar_lea.vmem %s8342_s15, %s7118_s0 }
 0x5f5   : > { %6697 = vrot.lane.b32.xlu0 %v6696_v50, %s8359_s5  ;;  %s8400_s5 = scalar_lea.vmem %s8336_s9, %s7118_s0 }
 0x5f6   : > { %v5907_v20 = vld [vmem:[%s8400_s5] ss:$0 sm:$0xff]  ;;  %s8401_s5 = sld [smem:[#allocation11_spill]] }
 0x5fc   : > { %v1037_v58 = vld [vmem:[%s8401_s5] sm:$0xff] }
 0x60c   : > { %v6668_v19 = vpop.permute.xlu0 %6667 }
 0x60d   : > { %v6670_v11 = vunpack.i.h.bf16 %v6668_v19  ;;  %v6669_v61 = vunpack.i.l.bf16 %v6668_v19  ;;  %v6741_v19 = vld [vmem:[%s7162_s3 + $0x8] sm:$0xff]  }
 0x60f   : > { %v3040_v6 = vsel %vm1194_vm3, %v2968_v10, %v6670_v11  ;;  %v3039_v13 = vsel %vm1194_vm3, %v2967_v9, %v6669_v61  ;;  %v6742_v11 = vld [vmem:[%s7153_s27] sm:$0xff]   ;;  %v6743_v61 = vld [vmem:[%s7153_s27 + $0x8] sm:$0xff]  }
 0x610   : > { %6373 = vmatpush3.bf16.msra.mxu0 %v6742_v11 }
 0x611   : > { %6374 = vmatprep.subr.bf16.mxu0 %v6960_v17 }
 0x614   : > { %v6673_v57 = vpop.permute.xlu1 %6672  ;;  %6375 = vmatpush3.bf16.msra.mxu0 %v6743_v61 }
 0x615   : > { %v6675_v34 = vunpack.i.h.bf16 %v6673_v57  ;;  %v6674_v5 = vunpack.i.l.bf16 %v6673_v57  ;;  %6388 = vmatprep.subr.bf16.mxu0 %v6960_v17 }
 0x617   : > { %v3042_v48 = vsel %vm2005_vm5, %v3040_v6, %v6675_v34  ;;  %v3041_v22 = vsel %vm2005_vm5, %v3039_v13, %v6674_v5 }
 0x61c   : > { %v6678_v47 = vpop.permute.xlu1 %6677 }
 0x61d   : > { %v6680_v52 = vunpack.i.h.bf16 %v6678_v47  ;;  %v6679_v59 = vunpack.i.l.bf16 %v6678_v47  ;;  %v6740_v47 = vld [vmem:[%s7162_s3] sm:$0xff]   ;;  %s8404_s3 = sld [smem:[#allocation19_spill]] }
 0x61f   : > { %v3045_v0 = vsel %vm3043_vm6, %v3042_v48, %v6680_v52  ;;  %v3044_v25 = vsel %vm3043_vm6, %v3041_v22, %v6679_v59  ;;  %v3151_v59 = vsub.s32 1, %v7217_v26  ;;  %v6899_v48 = vld [vmem:[%s7130_s30] sm:$0x7] }
 0x621   : > { %v3158_v22 = vrot.slane %v6899_v48, %v3151_v59 }
 0x623   : > { %s8405_s27 = scalar_lea.vmem %s8404_s3, %s7118_s0  ;;  %s8415_s3 = sld [smem:[#allocation5_spill]] }
 0x624   : > { %v6683_v51 = vpop.permute.xlu1 %6682 }
 0x625   : > { %v6685_v30 = vunpack.i.h.bf16 %v6683_v51  ;;  %v6684_v12 = vunpack.i.l.bf16 %v6683_v51  ;;  %v1038_v51 = vld [vmem:[%s8401_s5 + $0x8] sm:$0xff] }
 0x626   : > { %v3229_v55 = vpack.c.bf16 %v1038_v51, %v1037_v58 }
 0x627   : > { %v3048_v27 = vsel %vm3046_vm7, %v3045_v0, %v6685_v30  ;;  %v3047_v46 = vsel %vm3046_vm7, %v3044_v25, %v6684_v12  ;;  %v6898_v30 = vld [vmem:[%s7125_s25] sm:$0x7] }
 0x628   : > { %v3152_v12 = vrot.slane %v6898_v30, %v3151_v59 }
 0x629   : > { %p5988_p6 = scmp.ge.s32.totalorder %s8415_s3, 1 }
 0x62c   : > { %v6688_v8 = vpop.permute.xlu0 %6687 }
 0x62d   : > { %v6690_v16 = vunpack.i.h.bf16 %v6688_v8  ;;  %v6689_v18 = vunpack.i.l.bf16 %v6688_v8 }
 0x62f   : > { %v3051_v28 = vsel %vm3049_vm8, %v3048_v27, %v6690_v16  ;;  %v3050_v15 = vsel %vm3049_vm8, %v3047_v46, %v6689_v18  ;;  %v5915_v27 = vld [vmem:[%s8403_s14] ss:$0 sm:$0xff]  ;;  %s8412_s14 = scalar_lea.vmem %s8344_s17, %s7118_s0 }
 0x65f   : > { %v6693_v1 = vpop.permute.xlu1 %6692 }
 0x660   : > { %v6695_v60 = vunpack.i.h.bf16 %v6693_v1  ;;  %v6694_v23 = vunpack.i.l.bf16 %v6693_v1 }
 0x662   : > { %v3054_v3 = vsel %vm3052_vm9, %v3051_v28, %v6695_v60  ;;  %v3053_v31 = vsel %vm3052_vm9, %v3050_v15, %v6694_v23 }
 0x667   : > { %v6698_v14 = vpop.permute.xlu0 %6697 }
 0x668   : > { %v6700_v53 = vunpack.i.h.bf16 %v6698_v14  ;;  %v6699_v29 = vunpack.i.l.bf16 %v6698_v14 }
 0x66a   : > { %v3057_v32 = vsel %vm3055_vm10, %v3054_v3, %v6700_v53  ;;  %v3056_v7 = vsel %vm3055_vm10, %v3053_v31, %v6699_v29 }
 0x66b   : > { %v3058_v35 = vpack.c.bf16 %v3057_v32, %v3056_v7 }
 0x66d   : > { %6369 = vmatmul.mubr.msk.bf16.vlgmr.msra.gmra.mrb[72].mxu1 %vm1045_vm1, %v3058_v35  ;;  %v5911_v35 = vld [vmem:[%s8405_s27] ss:$0 sm:$0xff] }
 0x66e   : > { %6384 = vmatprep.mubr.msk.bf16.mxu1 %vm6961_vm2, %v6960_v17  ;;  %6381 = vmatpush3.bf16.msra.mxu1 %v6740_v47 }
 0x66f   : > { %6382 = vmatprep.subr.bf16.mxu1 %v6960_v17 }
 0x672   : > { %6383 = vmatpush3.bf16.msra.mxu1 %v6741_v19 }
 0x673   : > { %6394 = vmatprep.subr.bf16.mxu1 %v6960_v17 }
 0x675   : > { %6385 = vmatmul.mubr.msk.bf16.vlgmr.msra.gmra.mrb[76].mxu1 %vm1045_vm1, %v3229_v55 }
 0x676   : > { %6396 = vmatprep.mubr.msk.bf16.mxu1 %vm6961_vm2, %v6960_v17 }
 0x740   : > { %v3114_v36 = vpop.f32.mrb[72].mxu1 }
 0x741   : > { %v3115_v24 = vadd.f32 %v5907_v20, %v3114_v36  ;;  %v6370_v38 = vpop.f32.mrb[73].mxu1 }
 0x742   : > { %v3117_v39 = vpop.f32.mrb[74].mxu1 }
 0x743   : > { %v7744_v62 = vadd.f32 %v6896_v33, %v3115_v24  ;;  %v3118_v40 = vadd.f32 %v5907_v20, %v3117_v39  ;;  %v6371_v37 = vpop.f32.mrb[75].mxu1 }
 0x745   : > { %v7746_v42 = vadd.f32 %v6897_v41, %v3118_v40  ;;  %v3123_v44 = vsel %vm1045_vm1, %v7744_v62, 0.0 }
 0x746   : > { %3124 = vadd.xlane.f32.xlu1 %v3123_v44 }
 0x747   : > { %v3126_v43 = vsel %vm1045_vm1, %v7746_v42, 0.0 }
 0x748   : > { %3127 = vadd.xlane.f32.xlu0 %v3126_v43  ;;  %v3290_v46 = vpop.f32.mrb[76].mxu1 }
 0x749   : > { %v3291_v14 = vadd.f32 %v5915_v27, %v3290_v46  ;;  %v6386_v28 = vpop.f32.mrb[77].mxu1 }
 0x74a   : > { %v3293_v15 = vpop.f32.mrb[78].mxu1 }
 0x74b   : > { %v7784_v53 = vpack.c.bf16 %v3291_v14, %v3291_v14  ;;  %v3294_v29 = vadd.f32 %v5915_v27, %v3293_v15  ;;  %v6387_v3 = vpop.f32.mrb[79].mxu1 }
 0x74d   : > { %v6008_v31 = vpack.c.bf16 %v3294_v29, %v3294_v29  ;;  %v3374_v32 = vsel %vm1194_vm3, %v7784_v53, 0 }
 0x74f   : > { %v3420_v7 = vsel %vm1194_vm3, %v6008_v31, 0 }
 0x750   : > { %6395 = vmatpush3.bf16.xpose.msra.mxu1 %v3420_v7 }
 0x751   : > { %6406 = vmatprep.subr.bf16.mxu1 %v6960_v17 }
 0x757   : > { %3342 = vrot.lane.b32.xlu1 %v7784_v53, %s6962_s29 }
 0x75b   : > { %3346 = vrot.lane.b32.xlu1 %v7784_v53, %s6964_s21 }
 0x7d3   : > { %v3125_v45 = vpop.xlane.xlu1 %3124 }
 0x7d4   : > { %v3129_v63 = vmul.f32 0.03125, %v3125_v45 }
 0x7d5   : > { %v3128_v21 = vpop.xlane.xlu0 %3127 }
 0x7d6   : > { %v3131_v2 = vsub.f32 %v7744_v62, %v3129_v63  ;;  %v3130_v49 = vmul.f32 0.03125, %v3128_v21 }
 0x7d7   : > { %v3343_v39 = vpop.permute.xlu1 %3342 }
 0x7d8   : > { %v3132_v50 = vsub.f32 %v7746_v42, %v3130_v49  ;;  %v3133_v4 = vmul.f32 %v3131_v2, %v3131_v2  ;;  %v3466_v41 = vsel %vm1194_vm3, %v3343_v39, 0 }
 0x7da   : > { %v3135_v54 = vsel %vm1045_vm1, %v3133_v4, 0.0  ;;  %v3134_v56 = vmul.f32 %v3132_v50, %v3132_v50  ;;  %v5943_v4 = vcombine.low %v3343_v39, %v3343_v39 }
 0x7db   : > { %3136 = vadd.xlane.f32.xlu0 %v3135_v54  ;;  %v3347_v54 = vpop.permute.xlu1 %3346 }
 0x7dc   : > { %v3138_v57 = vsel %vm1045_vm1, %v3134_v56, 0.0  ;;  %v5947_v56 = vcombine.low %v3347_v54, %v3347_v54  ;;  %v3558_v47 = vsel %vm1194_vm3, %v3347_v54, 0 }
 0x7df   : > { %3139 = vadd.xlane.f32.xlu0 %v3138_v57 }
 0x7f5   : > { %3344 = vrot.lane.b32.xlu0 %v6008_v31, %s6962_s29 }
 0x7f9   : > { %3348 = vrot.lane.b32.xlu0 %v6008_v31, %s6964_s21 }
 0x7fd   : > { %3352 = vrot.lane.b32.xlu0 %v6008_v31, %s6963_s26 }
 0x868   : > { %v3137_v34 = vpop.xlane.xlu0 %3136 }
 0x869   : > { %v3141_v5 = vmul.f32 0.03125, %v3137_v34 }
 0x86b   : > { %v3143_v8 = vadd.f32 1e-06, %v3141_v5 }
 0x86c   : > { %v3140_v9 = vpop.xlane.xlu0 %3139 }
 0x86d   : > { %6824 = vrsqrt.f32 %v3143_v8  ;;  %v3142_v10 = vmul.f32 0.03125, %v3140_v9 }
 0x86f   : > { %v3144_v52 = vadd.f32 1e-06, %v3142_v10 }
 0x870   : > { %v3345_v44 = vpop.permute.xlu0 %3344 }
 0x871   : > { %6826 = vrsqrt.f32 %v3144_v52  ;;  %v3512_v45 = vsel %vm1194_vm3, %v3345_v44, 0  ;;  %v5945_v21 = vcombine.low %v3345_v44, %v3345_v44 }
 0x874   : > { %v3349_v63 = vpop.permute.xlu0 %3348 }
 0x875   : > { %v3604_v51 = vsel %vm1194_vm3, %v3349_v63, 0 }
 0x877   : > { %v6825_v1 = vpop.eup %6824 }
 0x878   : > { %v3147_v6 = vmul.f32 %v6825_v1, %v3131_v2  ;;  %v5949_v2 = vcombine.low %v3349_v63, %v3349_v63  ;;  %v3353_v49 = vpop.permute.xlu0 %3352 }
 0x879   : > { %v3696_v8 = vsel %vm1194_vm3, %v3353_v49, 0 }
 0x87a   : > { %v3153_v16 = vmul.f32 %v3152_v12, %v3147_v6 }
 0x87b   : > { %v6827_v13 = vpop.eup %6826 }
 0x87c   : > { %v3148_v18 = vmul.f32 %v6827_v13, %v3132_v50  ;;  %v3159_v23 = vadd.f32 %v3158_v22, %v3153_v16  ;;  %v5953_v50 = vcombine.low %v3353_v49, %v3353_v49 }
 0x87e   : > { %v3154_v60 = vmul.f32 %v3152_v12, %v3148_v18 }
 0x880   : > { %v3160_v0 = vadd.f32 %v3158_v22, %v3154_v60 }
 0x882   : > { %v3161_v25 = vpack.c.bf16 %v3160_v0, %v3159_v23 }
 0x884   : > { %6377 = vmatmul.mubr.msk.bf16.vlgmr.msra.gmra.mrb[60].mxu0 %vm1045_vm1, %v3161_v25 }
 0x885   : > { %6390 = vmatprep.mubr.msk.bf16.mxu0 %vm6961_vm2, %v6960_v17  ;;  %6389 = vmatpush3.bf16.xpose.msra.mxu0 %v3374_v32 }
 0x886   : > { %6400 = vmatprep.subr.bf16.mxu0 %v6960_v17 }
 0x957   : > { %v3222_v20 = vpop.f32.mrb[60].mxu0 }
 0x958   : > { %v3223_v36 = vadd.f32 %v5911_v35, %v3222_v20  ;;  %v6378_v24 = vpop.f32.mrb[61].mxu0 }
 0x959   : > { %v3225_v38 = vpop.f32.mrb[62].mxu0 }
 0x95a   : > { %v6005_v33 = vpack.c.bf16 %v3223_v36, %v3223_v36  ;;  %v3226_v40 = vadd.f32 %v5911_v35, %v3225_v38  ;;  %v6379_v37 = vpop.f32.mrb[63].mxu0 }
 0x95c   : > { %v6006_v43 = vpack.c.bf16 %v3226_v40, %v3226_v40  ;;  %3308 = vrot.lane.b32.xlu1 %v6005_v33, %s6962_s29  ;;  %6391 = vmatmul.mubr.msk.bf16.vlgmr.msra.gmra.mrb[64].mxu0 %vm1194_vm3, %v6005_v33 }
 0x95d   : > { %6401 = vmatpush3.bf16.xpose.msra.mxu0 %v3466_v41  ;;  %6402 = vmatprep.mubr.msk.bf16.mxu0 %vm6961_vm2, %v6960_v17 }
 0x95e   : > { %3314 = vrot.lane.b32.xlu0 %v6006_v43, %s6964_s21  ;;  %6397 = vmatmul.mubr.msk.bf16.vlgmr.msra.gmra.mrb[80].mxu1 %vm1194_vm3, %v6006_v43 }
 0x95f   : > { %6407 = vmatpush3.bf16.xpose.msra.mxu1 %v3512_v45  ;;  %6412 = vmatprep.subr.bf16.mxu0 %v6960_v17 }
 0x960   : > { %3310 = vrot.lane.b32.xlu1 %v6006_v43, %s6962_s29  ;;  %6408 = vmatprep.mubr.msk.bf16.mxu1 %vm6961_vm2, %v6960_v17 }
 0x961   : > { %6418 = vmatprep.subr.bf16.mxu1 %v6960_v17 }
 0x962   : > { %3356 = vrot.lane.b32.xlu0 %v6008_v31, %s6965_s18 }
 0x964   : > { %3312 = vrot.lane.b32.xlu1 %v6005_v33, %s6964_s21  ;;  %s8406_s21 = sld [smem:[#allocation13_spill]] }
 0x966   : > { %3318 = vrot.lane.b32.xlu0 %v6006_v43, %s6963_s26 }
 0x968   : > { %3350 = vrot.lane.b32.xlu1 %v7784_v53, %s6963_s26 }
 0x96a   : > { %3360 = vrot.lane.b32.xlu0 %v6008_v31, %s6966_s19  ;;  %v7939_v39 = vld [vmem:[%s8406_s21] ss:$0 sm:$0xff]  ;;  %v7944_v40 = vld [vmem:[%s8406_s21 + $0x1] ss:$0 sm:$0xff] }
 0x96c   : > { %3316 = vrot.lane.b32.xlu1 %v6005_v33, %s6963_s26 }
 0x96e   : > { %3322 = vrot.lane.b32.xlu0 %v6006_v43, %s6965_s18 }
 0x970   : > { %3354 = vrot.lane.b32.xlu1 %v7784_v53, %s6965_s18 }
 0x972   : > { %3364 = vrot.lane.b32.xlu0 %v6008_v31, %s6967_s6 }
 0x974   : > { %3320 = vrot.lane.b32.xlu1 %v6005_v33, %s6965_s18 }
 0x976   : > { %3326 = vrot.lane.b32.xlu0 %v6006_v43, %s6966_s19 }
 0x978   : > { %3358 = vrot.lane.b32.xlu1 %v7784_v53, %s6966_s19 }
 0x97a   : > { %3330 = vrot.lane.b32.xlu0 %v6006_v43, %s6967_s6 }
 0x97c   : > { %3324 = vrot.lane.b32.xlu1 %v6005_v33, %s6966_s19 }
 0x97e   : > { %3368 = vrot.lane.b32.xlu0 %v6008_v31, %s6969_s2 }
 0x980   : > { %3362 = vrot.lane.b32.xlu1 %v7784_v53, %s6967_s6 }
 0x982   : > { %3334 = vrot.lane.b32.xlu0 %v6006_v43, %s6969_s2 }
 0x984   : > { %3328 = vrot.lane.b32.xlu1 %v6005_v33, %s6967_s6  ;;  %s8407_s6 = sld [smem:[#allocation9_spill]] }
 0x986   : > { %4374 = vrot.lane.b32.xlu0 %v6008_v31, %s6968_s23 }
 0x988   : > { %3366 = vrot.lane.b32.xlu1 %v7784_v53, %s6969_s2 }
 0x98a   : > { %4474 = vrot.lane.b32.xlu0 %v5945_v21, %s6968_s23 }
 0x98c   : > { %3332 = vrot.lane.b32.xlu1 %v6005_v33, %s6969_s2  ;;  %s8409_s2 = smov 24  }
 0x98e   : > { %4574 = vrot.lane.b32.xlu0 %v5949_v2, %s6968_s23 }
 0x990   : > { %4326 = vrot.lane.b32.xlu1 %v7784_v53, %s6968_s23 }
 0x992   : > { %4674 = vrot.lane.b32.xlu0 %v5953_v50, %s6968_s23 }
 0x994   : > { %4424 = vrot.lane.b32.xlu1 %v5943_v4, %s6968_s23 }
 0x998   : > { %4524 = vrot.lane.b32.xlu1 %v5947_v56, %s6968_s23 }
 0x9ce   : > { %v3309_v57 = vpop.permute.xlu1 %3308 }
 0x9cf   : > { %6403 = vmatmul.mubr.msk.bf16.vlgmr.msra.gmra.mrb[68].mxu0 %vm1194_vm3, %v3309_v57 }
 0x9d0   : > { %6413 = vmatpush3.bf16.xpose.msra.mxu0 %v3558_v47  ;;  %v3315_v19 = vpop.permute.xlu0 %3314  ;;  %6414 = vmatprep.mubr.msk.bf16.mxu0 %vm6961_vm2, %v6960_v17 }
 0x9d1   : > { %6424 = vmatprep.subr.bf16.mxu0 %v6960_v17 }
 0x9d2   : > { %v3311_v58 = vpop.permute.xlu1 %3310 }
 0x9d3   : > { %6409 = vmatmul.mubr.msk.bf16.vlgmr.msra.gmra.mrb[84].mxu1 %vm1194_vm3, %v3311_v58 }
 0x9d4   : > { %6419 = vmatpush3.bf16.xpose.msra.mxu1 %v3604_v51  ;;  %v3357_v55 = vpop.permute.xlu0 %3356  ;;  %6420 = vmatprep.mubr.msk.bf16.mxu1 %vm6961_vm2, %v6960_v17 }
 0x9d5   : > { %v5957_v11 = vcombine.low %v3357_v55, %v3357_v55  ;;  %6430 = vmatprep.subr.bf16.mxu1 %v6960_v17  ;;  %v3788_v12 = vsel %vm1194_vm3, %v3357_v55, 0 }
 0x9d6   : > { %v3313_v61 = vpop.permute.xlu1 %3312 }
 0x9d7   : > { %6415 = vmatmul.mubr.msk.bf16.vlgmr.msra.gmra.mrb[72].mxu0 %vm1194_vm3, %v3313_v61  ;;  %4774 = vrot.lane.b32.xlu0 %v5957_v11, %s6968_s23 }
 0x9d8   : > { %v3319_v34 = vpop.permute.xlu0 %3318  ;;  %6426 = vmatprep.mubr.msk.bf16.mxu0 %vm6961_vm2, %v6960_v17 }
 0x9da   : > { %v3351_v5 = vpop.permute.xlu1 %3350 }
 0x9db   : > { %v3650_v9 = vsel %vm1194_vm3, %v3351_v5, 0  ;;  %v5951_v10 = vcombine.low %v3351_v5, %v3351_v5  ;;  %6421 = vmatmul.mubr.msk.bf16.vlgmr.msra.gmra.mrb[88].mxu1 %vm1194_vm3, %v3315_v19 }
 0x9dc   : > { %6431 = vmatpush3.bf16.xpose.msra.mxu1 %v3696_v8  ;;  %6425 = vmatpush3.bf16.xpose.msra.mxu0 %v3650_v9  ;;  %v3361_v52 = vpop.permute.xlu0 %3360 }
 0x9dd   : > { %4624 = vrot.lane.b32.xlu1 %v5951_v10, %s6968_s23  ;;  %6432 = vmatprep.mubr.msk.bf16.mxu1 %vm6961_vm2, %v6960_v17  ;;  %v3880_v60 = vsel %vm1194_vm3, %v3361_v52, 0  ;;  %v5961_v46 = vcombine.low %v3361_v52, %v3361_v52 }
 0x9de   : > { %v3317_v59 = vpop.permute.xlu1 %3316  ;;  %6442 = vmatprep.subr.bf16.mxu1 %v6960_v17  ;;  %6436 = vmatprep.subr.bf16.mxu0 %v6960_v17 }
 0x9e0   : > { %v3323_v1 = vpop.permute.xlu0 %3322 }
 0x9e2   : > { %v3355_v30 = vpop.permute.xlu1 %3354 }
 0x9e3   : > { %v3742_v6 = vsel %vm1194_vm3, %v3355_v30, 0  ;;  %v5955_v13 = vcombine.low %v3355_v30, %v3355_v30  ;;  %6427 = vmatmul.mubr.msk.bf16.vlgmr.msra.gmra.mrb[76].mxu0 %vm1194_vm3, %v3317_v59  ;;  %6433 = vmatmul.mubr.msk.bf16.vlgmr.msra.gmra.mrb[92].mxu1 %vm1194_vm3, %v3319_v34 }
 0x9e4   : > { %6443 = vmatpush3.bf16.xpose.msra.mxu1 %v3788_v12  ;;  %6437 = vmatpush3.bf16.xpose.msra.mxu0 %v3742_v6  ;;  %v7875_v16 = vpop.permute.xlu0 %3364 }
 0x9e5   : > { %4724 = vrot.lane.b32.xlu1 %v5955_v13, %s6968_s23  ;;  %6438 = vmatprep.mubr.msk.bf16.mxu0 %vm6961_vm2, %v6960_v17  ;;  %v3972_v28 = vsel %vm1194_vm3, %v7875_v16, 0 }
 0x9e6   : > { %v3321_v18 = vpop.permute.xlu1 %3320  ;;  %6444 = vmatprep.mubr.msk.bf16.mxu1 %vm6961_vm2, %v6960_v17  ;;  %6454 = vmatprep.subr.bf16.mxu1 %v6960_v17 }
 0x9e7   : > { %6448 = vmatprep.subr.bf16.mxu0 %v6960_v17 }
 0x9e8   : > { %v3327_v48 = vpop.permute.xlu0 %3326 }
 0x9ea   : > { %v3359_v22 = vpop.permute.xlu1 %3358 }
 0x9eb   : > { %v3834_v23 = vsel %vm1194_vm3, %v3359_v22, 0  ;;  %v5959_v0 = vcombine.low %v3359_v22, %v3359_v22  ;;  %6439 = vmatmul.mubr.msk.bf16.vlgmr.msra.gmra.mrb[80].mxu0 %vm1194_vm3, %v3321_v18  ;;  %6445 = vmatmul.mubr.msk.bf16.vlgmr.msra.gmra.mrb[96].mxu1 %vm1194_vm3, %v3323_v1 }
 0x9ec   : > { %6455 = vmatpush3.bf16.xpose.msra.mxu1 %v3880_v60  ;;  %6449 = vmatpush3.bf16.xpose.msra.mxu0 %v3834_v23  ;;  %v3331_v25 = vpop.permute.xlu0 %3330 }
 0x9ed   : > { %4824 = vrot.lane.b32.xlu1 %v5959_v0, %s6968_s23  ;;  %6450 = vmatprep.mubr.msk.bf16.mxu0 %vm6961_vm2, %v6960_v17 }
 0x9ee   : > { %v3325_v27 = vpop.permute.xlu1 %3324  ;;  %6456 = vmatprep.mubr.msk.bf16.mxu1 %vm6961_vm2, %v6960_v17  ;;  %6466 = vmatprep.subr.bf16.mxu1 %v6960_v17 }
 0x9ef   : > { %6460 = vmatprep.subr.bf16.mxu0 %v6960_v17 }
 0x9f0   : > { %v7904_v53 = vpop.permute.xlu0 %3368 }
 0x9f1   : > { %4874 = vrot.lane.b32.xlu1 %v5961_v46, %s6968_s23  ;;  %v4064_v32 = vsel %vm1194_vm3, %v7904_v53, 0 }
 0x9f2   : > { %v7896_v14 = vpop.permute.xlu1 %3362 }
 0x9f3   : > { %v3926_v15 = vsel %vm1194_vm3, %v7896_v14, 0  ;;  %6451 = vmatmul.mubr.msk.bf16.vlgmr.msra.gmra.mrb[84].mxu0 %vm1194_vm3, %v3325_v27  ;;  %6457 = vmatmul.mubr.msk.bf16.vlgmr.msra.gmra.mrb[100].mxu1 %vm1194_vm3, %v3327_v48 }
 0x9f4   : > { %6467 = vmatpush3.bf16.xpose.msra.mxu1 %v3972_v28  ;;  %6461 = vmatpush3.bf16.xpose.msra.mxu0 %v3926_v15  ;;  %v3335_v3 = vpop.permute.xlu0 %3334 }
 0x9f5   : > { %6462 = vmatprep.mubr.msk.bf16.mxu0 %vm6961_vm2, %v6960_v17  ;;  %6468 = vmatprep.mubr.msk.bf16.mxu1 %vm6961_vm2, %v6960_v17 }
 0x9f6   : > { %v3329_v29 = vpop.permute.xlu1 %3328  ;;  %6478 = vmatprep.subr.bf16.mxu1 %v6960_v17  ;;  %6472 = vmatprep.subr.bf16.mxu0 %v6960_v17 }
 0x9f8   : > { %v4375_v20 = vpop.permute.xlu0 %4374 }
 0x9f9   : > { %v4380_v24 = vsel %vm2203_vm4, %v4375_v20, 0 }
 0x9fa   : > { %v7912_v31 = vpop.permute.xlu1 %3366 }
 0x9fb   : > { %v4018_v7 = vsel %vm1194_vm3, %v7912_v31, 0  ;;  %6463 = vmatmul.mubr.msk.bf16.vlgmr.msra.gmra.mrb[88].mxu0 %vm1194_vm3, %v3329_v29  ;;  %6469 = vmatmul.mubr.msk.bf16.vlgmr.msra.gmra.mrb[104].mxu1 %vm1194_vm3, %v3331_v25 }
 0x9fc   : > { %6479 = vmatpush3.bf16.xpose.msra.mxu1 %v4064_v32  ;;  %6473 = vmatpush3.bf16.xpose.msra.mxu0 %v4018_v7  ;;  %v7966_v34 = vpop.permute.xlu0 %4474 }
 0x9fd   : > { %6474 = vmatprep.mubr.msk.bf16.mxu0 %vm6961_vm2, %v6960_v17  ;;  %6480 = vmatprep.mubr.msk.bf16.mxu1 %vm6961_vm2, %v6960_v17 }
 0x9fe   : > { %v3333_v35 = vpop.permute.xlu1 %3332  ;;  %6490 = vmatprep.subr.bf16.mxu1 %v6960_v17  ;;  %6484 = vmatprep.subr.bf16.mxu0 %v6960_v17 }
 0xa00   : > { %v7979_v48 = vpop.permute.xlu0 %4574 }
 0xa02   : > { %v4327_v36 = vpop.permute.xlu1 %4326 }
 0xa03   : > { %v4332_v38 = vsel %vm2203_vm4, %v4327_v36, 0  ;;  %6475 = vmatmul.mubr.msk.bf16.vlgmr.msra.gmra.mrb[92].mxu0 %vm1194_vm3, %v3333_v35  ;;  %6481 = vmatmul.mubr.msk.bf16.vlgmr.msra.gmra.mrb[108].mxu1 %vm1194_vm3, %v3335_v3 }
 0xa04   : > { %6491 = vmatpush3.bf16.msra.mxu1 %v4380_v24  ;;  %6485 = vmatpush3.bf16.msra.mxu0 %v4332_v38  ;;  %v7988_v46 = vpop.permute.xlu0 %4674 }
 0xa05   : > { %6486 = vmatprep.mubr.msk.bf16.mxu0 %vm6961_vm2, %v6960_v17  ;;  %6496 = vmatprep.subr.bf16.mxu0 %v6960_v17 }
 0xa06   : > { %6492 = vmatprep.mubr.msk.bf16.mxu1 %vm6961_vm2, %v6960_v17  ;;  %6502 = vmatprep.subr.bf16.mxu1 %v6960_v17  ;;  %v7956_v56 = vpop.permute.xlu1 %4424 }
 0xa0a   : > { %v7968_v8 = vpop.permute.xlu1 %4524 }
 0xa2f   : > { %v3410_v33 = vpop.f32.mrb[64].mxu0 }
 0xa30   : > { %v7947_v37 = vadd.f32 %v7939_v39, %v3410_v33  ;;  %v6392_v41 = vpop.f32.mrb[65].mxu0 }
 0xa31   : > { %v3413_v44 = vpop.f32.mrb[66].mxu0  ;;  %v3456_v43 = vpop.f32.mrb[80].mxu1 }
 0xa32   : > { %v7950_v45 = vadd.f32 %v7944_v40, %v3456_v43  ;;  %v6393_v63 = vpop.f32.mrb[67].mxu0  ;;  %v6398_v21 = vpop.f32.mrb[81].mxu1  ;;  %v4134_v2 = vsel %vm2005_vm5, %v7947_v37, -inf }
 0xa33   : > { %4135 = vmax.xlane.f32.xlu1 %v4134_v2  ;;  %v3459_v49 = vpop.f32.mrb[82].mxu1 }
 0xa34   : > { %v6399_v50 = vpop.f32.mrb[83].mxu1  ;;  %v4137_v4 = vsel %vm2005_vm5, %v7950_v45, -inf }
 0xa35   : > { %4138 = vmax.xlane.f32.xlu0 %v4137_v4 }
 0xa49   : > { %v8004_v43 = vpop.permute.xlu0 %4774 }
 0xa4f   : > { %v7975_v12 = vpop.permute.xlu1 %4624 }
 0xa57   : > { %v7984_v0 = vpop.permute.xlu1 %4724 }
 0xa5f   : > { %v7990_v28 = vpop.permute.xlu1 %4824 }
 0xa63   : > { %v8002_v44 = vpop.permute.xlu1 %4874 }
 0xaa2   : > { %v3502_v54 = vpop.f32.mrb[68].mxu0 }
 0xaa3   : > { %v7959_v57 = vadd.f32 %v7939_v39, %v3502_v54  ;;  %v6404_v47 = vpop.f32.mrb[69].mxu0 }
 0xaa4   : > { %v3505_v19 = vpop.f32.mrb[70].mxu0 }
 0xaa5   : > { %v6405_v58 = vpop.f32.mrb[71].mxu0  ;;  %v4140_v51 = vsel %vm2005_vm5, %v7959_v57, -inf }
 0xaa6   : > { %4141 = vmax.xlane.f32.xlu0 %v4140_v51  ;;  %v3548_v55 = vpop.f32.mrb[84].mxu1 }
 0xaa7   : > { %v7964_v11 = vadd.f32 %v7944_v40, %v3548_v55  ;;  %v6410_v61 = vpop.f32.mrb[85].mxu1 }
 0xaa8   : > { %v3551_v5 = vpop.f32.mrb[86].mxu1 }
 0xaa9   : > { %v6411_v9 = vpop.f32.mrb[87].mxu1  ;;  %v4143_v10 = vsel %vm2005_vm5, %v7964_v11, -inf }
 0xaaa   : > { %v3594_v52 = vpop.f32.mrb[72].mxu0  ;;  %4144 = vmax.xlane.f32.xlu0 %v4143_v10 }
 0xaab   : > { %v7973_v59 = vadd.f32 %v7939_v39, %v3594_v52  ;;  %v6416_v1 = vpop.f32.mrb[73].mxu0 }
 0xaac   : > { %v3597_v30 = vpop.f32.mrb[74].mxu0 }
 0xaad   : > { %v6417_v6 = vpop.f32.mrb[75].mxu0  ;;  %v4146_v13 = vsel %vm2005_vm5, %v7973_v59, -inf }
 0xaae   : > { %4147 = vmax.xlane.f32.xlu1 %v4146_v13  ;;  %v3640_v18 = vpop.f32.mrb[88].mxu1 }
 0xaaf   : > { %v7982_v22 = vadd.f32 %v7944_v40, %v3640_v18  ;;  %v6422_v60 = vpop.f32.mrb[89].mxu1 }
 0xab0   : > { %v3643_v23 = vpop.f32.mrb[90].mxu1 }
 0xab1   : > { %v6423_v25 = vpop.f32.mrb[91].mxu1  ;;  %v4149_v27 = vsel %vm2005_vm5, %v7982_v22, -inf }
 0xab2   : > { %4150 = vmax.xlane.f32.xlu0 %v4149_v27 }
 0xab6   : > { %v3686_v15 = vpop.f32.mrb[76].mxu0  ;;  %v3732_v29 = vpop.f32.mrb[92].mxu1 }
 0xab7   : > { %v7993_v3 = vadd.f32 %v7939_v39, %v3686_v15  ;;  %v7996_v32 = vadd.f32 %v7944_v40, %v3732_v29  ;;  %v6428_v7 = vpop.f32.mrb[77].mxu0  ;;  %v6434_v35 = vpop.f32.mrb[93].mxu1 }
 0xab8   : > { %v3689_v20 = vpop.f32.mrb[78].mxu0  ;;  %v3735_v36 = vpop.f32.mrb[94].mxu1 }
 0xab9   : > { %v6429_v24 = vpop.f32.mrb[79].mxu0  ;;  %v6435_v38 = vpop.f32.mrb[95].mxu1  ;;  %v4152_v33 = vsel %vm2005_vm5, %v7993_v3, -inf  ;;  %v4155_v41 = vsel %vm2005_vm5, %v7996_v32, -inf }
 0xaba   : > { %4153 = vmax.xlane.f32.xlu1 %v4152_v33  ;;  %4156 = vmax.xlane.f32.xlu0 %v4155_v41  ;;  %v5963_v41 = vcombine.low %v7896_v14, %v7896_v14 }
 0xabe   : > { %v3778_v63 = vpop.f32.mrb[80].mxu0  ;;  %v3824_v21 = vpop.f32.mrb[96].mxu1 }
 0xabf   : > { %v8007_v2 = vadd.f32 %v7939_v39, %v3778_v63  ;;  %v8010_v49 = vadd.f32 %v7944_v40, %v3824_v21  ;;  %v6440_v50 = vpop.f32.mrb[81].mxu0  ;;  %v6446_v4 = vpop.f32.mrb[97].mxu1 }
 0xac0   : > { %v3781_v54 = vpop.f32.mrb[82].mxu0  ;;  %v4136_v47 = vpop.xlane.xlu1 %4135  ;;  %v4430_v50 = vsel %vm2203_vm4, %v7956_v56, 0 }
 0xac1   : > { %v4182_v19 = vsub.f32 %v7947_v37, %v4136_v47  ;;  %v3827_v58 = vpop.f32.mrb[98].mxu1  ;;  %v6441_v51 = vpop.f32.mrb[83].mxu0  ;;  %v4158_v55 = vsel %vm2005_vm5, %v8007_v2, -inf  ;;  %v4161_v61 = vsel %vm2005_vm5, %v8010_v49, -inf  ;;  %v4480_v54 = vsel %vm2203_vm4, %v7966_v34, 0 }
 0xac2   : > { %v6447_v5 = vpop.f32.mrb[99].mxu1  ;;  %4159 = vmax.xlane.f32.xlu1 %v4158_v55  ;;  %v4139_v9 = vpop.xlane.xlu0 %4138  ;;  %4162 = vmax.xlane.f32.xlu0 %v4161_v61  ;;  %v5965_v61 = vcombine.low %v7875_v16, %v7875_v16 }
 0xac3   : > { %v4198_v10 = vmul.f32 1.442695, %v4182_v19  ;;  %v4183_v52 = vsub.f32 %v7950_v45, %v4139_v9 }
 0xac5   : > { %6828 = vpow2.f32 %v4198_v10  ;;  %v4200_v1 = vmul.f32 1.442695, %v4183_v52 }
 0xac6   : > { %v3870_v30 = vpop.f32.mrb[84].mxu0  ;;  %v3916_v6 = vpop.f32.mrb[100].mxu1 }
 0xac7   : > { %6830 = vpow2.f32 %v4200_v1  ;;  %v8019_v37 = vadd.f32 %v7944_v40, %v3916_v6  ;;  %v6452_v13 = vpop.f32.mrb[85].mxu0  ;;  %v6458_v18 = vpop.f32.mrb[101].mxu1  ;;  %v8050_v5 = vadd.f32 %v7939_v39, %v3870_v30 }
 0xac8   : > { %v3873_v60 = vpop.f32.mrb[86].mxu0  ;;  %v3919_v23 = vpop.f32.mrb[102].mxu1 }
 0xac9   : > { %v6453_v25 = vpop.f32.mrb[87].mxu0  ;;  %v6459_v27 = vpop.f32.mrb[103].mxu1  ;;  %v4167_v15 = vsel %vm2005_vm5, %v8019_v37, -inf  ;;  %v4164_v10 = vsel %vm2005_vm5, %v8050_v5, -inf }
 0xaca   : > { %4168 = vmax.xlane.f32.xlu0 %v4167_v15 }
 0xace   : > { %v3962_v29 = vpop.f32.mrb[88].mxu0  ;;  %v4008_v45 = vpop.f32.mrb[104].mxu1 }
 0xacf   : > { %v8023_v7 = vpop.eup %6828  ;;  %v6464_v35 = vpop.f32.mrb[89].mxu0  ;;  %v8053_v9 = vadd.f32 %v7939_v39, %v3962_v29  ;;  %v8058_v52 = vadd.f32 %v7944_v40, %v4008_v45 }
 0xad0   : > { %v6470_v20 = vpop.f32.mrb[105].mxu1  ;;  %v3965_v36 = vpop.f32.mrb[90].mxu0  ;;  %v4310_v38 = vpack.c.bf16 %v8023_v7, %v8023_v7 }
 0xad1   : > { %v4011_v24 = vpop.f32.mrb[106].mxu1  ;;  %v8027_v33 = vpop.eup %6830  ;;  %v4170_v16 = vsel %vm2005_vm5, %v8053_v9, -inf  ;;  %v4173_v13 = vsel %vm2005_vm5, %v8058_v52, -inf }
 0xad2   : > { %v6465_v63 = vpop.f32.mrb[91].mxu0  ;;  %v6471_v21 = vpop.f32.mrb[107].mxu1  ;;  %6487 = vmatmul.mubr.msk.bf16.vlgmr.msra.gmra.mrb[96].mxu0 %vm2005_vm5, %v4310_v38  ;;  %v4311_v4 = vpack.c.bf16 %v8027_v33, %v8027_v33 }
 0xad3   : > { %6497 = vmatpush3.bf16.msra.mxu0 %v4430_v50  ;;  %4924 = vrot.lane.b32.xlu1 %v5963_v41, %s6968_s23 }
 0xad4   : > { %6493 = vmatmul.mubr.msk.bf16.vlgmr.msra.gmra.mrb[112].mxu1 %vm2005_vm5, %v4311_v4  ;;  %6498 = vmatprep.mubr.msk.bf16.mxu0 %vm6961_vm2, %v6960_v17 }
 0xad5   : > { %6503 = vmatpush3.bf16.msra.mxu1 %v4480_v54  ;;  %6508 = vmatprep.subr.bf16.mxu0 %v6960_v17 }
 0xad6   : > { %v4054_v14 = vpop.f32.mrb[92].mxu0  ;;  %v4100_v56 = vpop.f32.mrb[108].mxu1  ;;  %6504 = vmatprep.mubr.msk.bf16.mxu1 %vm6961_vm2, %v6960_v17  ;;  %6514 = vmatprep.subr.bf16.mxu1 %v6960_v17 }
 0xad7   : > { %v6476_v47 = vpop.f32.mrb[93].mxu0  ;;  %v6482_v19 = vpop.f32.mrb[109].mxu1  ;;  %v8061_v1 = vadd.f32 %v7939_v39, %v4054_v14  ;;  %v8066_v30 = vadd.f32 %v7944_v40, %v4100_v56  ;;  %v5967_v39 = vcombine.low %v7912_v31, %v7912_v31  ;;  %v5969_v40 = vcombine.low %v7904_v53, %v7904_v53 }
 0xad8   : > { %v4057_v58 = vpop.f32.mrb[94].mxu0  ;;  %v4103_v51 = vpop.f32.mrb[110].mxu1 }
 0xad9   : > { %v6477_v34 = vpop.f32.mrb[95].mxu0  ;;  %v6483_v55 = vpop.f32.mrb[111].mxu1  ;;  %v4176_v6 = vsel %vm2005_vm5, %v8061_v1, -inf  ;;  %v4179_v18 = vsel %vm2005_vm5, %v8066_v30, -inf }
 0xae0   : > { %4974 = vrot.lane.b32.xlu0 %v5965_v61, %s6968_s23 }
 0xaf7   : > { %4165 = vmax.xlane.f32.xlu1 %v4164_v10 }
 0xafb   : > { %4171 = vmax.xlane.f32.xlu1 %v4170_v16 }
 0xaff   : > { %4177 = vmax.xlane.f32.xlu1 %v4176_v6  ;;  %4174 = vmax.xlane.f32.xlu0 %v4173_v13 }
 0xb03   : > { %4180 = vmax.xlane.f32.xlu0 %v4179_v18 }
 0xb10   : > { %5024 = vrot.lane.b32.xlu1 %v5967_v39, %s6968_s23 }
 0xb19   : > { %5074 = vrot.lane.b32.xlu0 %v5969_v40, %s6968_s23  ;;  %s8408_s23 = smov 20  }
 0xb33   : > { %v4142_v60 = vpop.xlane.xlu0 %4141 }
 0xb34   : > { %v4184_v23 = vsub.f32 %v7959_v57, %v4142_v60  ;;  %v4730_v60 = vsel %vm2203_vm4, %v7984_v0, 0 }
 0xb36   : > { %v4202_v25 = vmul.f32 1.442695, %v4184_v23  ;;  %v4780_v23 = vsel %vm2203_vm4, %v8004_v43, 0 }
 0xb37   : > { %v4145_v27 = vpop.xlane.xlu0 %4144 }
 0xb38   : > { %6832 = vpow2.f32 %v4202_v25  ;;  %v4185_v15 = vsub.f32 %v7964_v11, %v4145_v27  ;;  %v4530_v11 = vsel %vm2203_vm4, %v7968_v8, 0  ;;  %v4580_v8 = vsel %vm2203_vm4, %v7979_v48, 0 }
 0xb3a   : > { %v4204_v29 = vmul.f32 1.442695, %v4185_v15 }
 0xb3b   : > { %v4148_v45 = vpop.xlane.xlu1 %4147 }
 0xb3c   : > { %6834 = vpow2.f32 %v4204_v29  ;;  %v4186_v31 = vsub.f32 %v7973_v59, %v4148_v45  ;;  %v4830_v45 = vsel %vm2203_vm4, %v7990_v28, 0 }
 0xb3e   : > { %v4206_v35 = vmul.f32 1.442695, %v4186_v31  ;;  %v4880_v31 = vsel %vm2203_vm4, %v8002_v44, 0 }
 0xb3f   : > { %v4151_v20 = vpop.xlane.xlu0 %4150 }
 0xb40   : > { %6836 = vpow2.f32 %v4206_v35  ;;  %v4187_v53 = vsub.f32 %v7982_v22, %v4151_v20 }
 0xb42   : > { %v6833_v36 = vpop.eup %6832  ;;  %v4208_v24 = vmul.f32 1.442695, %v4187_v53 }
 0xb43   : > { %v4236_v38 = vsel %vm2005_vm5, %v6833_v36, 0.0  ;;  %v4312_v57 = vpack.c.bf16 %v6833_v36, %v6833_v36 }
 0xb44   : > { %6838 = vpow2.f32 %v4208_v24  ;;  %4237 = vadd.xlane.f32.xlu1 %v4236_v38 }
 0xb45   : > { %6499 = vmatmul.mubr.msk.bf16.vlgmr.msra.gmra.mrb[100].mxu0 %vm2005_vm5, %v4312_v57 }
 0xb46   : > { %v6835_v41 = vpop.eup %6834  ;;  %6509 = vmatpush3.bf16.msra.mxu0 %v4530_v11  ;;  %6510 = vmatprep.mubr.msk.bf16.mxu0 %vm6961_vm2, %v6960_v17 }
 0xb47   : > { %v4154_v59 = vpop.xlane.xlu1 %4153  ;;  %v4157_v63 = vpop.xlane.xlu0 %4156  ;;  %v4239_v22 = vsel %vm2005_vm5, %v6835_v41, 0.0  ;;  %v4313_v21 = vpack.c.bf16 %v6835_v41, %v6835_v41  ;;  %6520 = vmatprep.subr.bf16.mxu0 %v6960_v17 }
 0xb48   : > { %v4188_v50 = vsub.f32 %v7993_v3, %v4154_v59  ;;  %v4189_v4 = vsub.f32 %v7996_v32, %v4157_v63  ;;  %4240 = vadd.xlane.f32.xlu0 %v4239_v22  ;;  %v4630_v3 = vsel %vm2203_vm4, %v7975_v12, 0  ;;  %v4680_v12 = vsel %vm2203_vm4, %v7988_v46, 0 }
 0xb49   : > { %6505 = vmatmul.mubr.msk.bf16.vlgmr.msra.gmra.mrb[116].mxu1 %vm2005_vm5, %v4313_v21 }
 0xb4a   : > { %v6837_v54 = vpop.eup %6836  ;;  %v4210_v14 = vmul.f32 1.442695, %v4188_v50  ;;  %v4212_v56 = vmul.f32 1.442695, %v4189_v4  ;;  %6515 = vmatpush3.bf16.msra.mxu1 %v4580_v8  ;;  %6516 = vmatprep.mubr.msk.bf16.mxu1 %vm6961_vm2, %v6960_v17 }
 0xb4b   : > { %v4242_v47 = vsel %vm2005_vm5, %v6837_v54, 0.0  ;;  %v4314_v19 = vpack.c.bf16 %v6837_v54, %v6837_v54  ;;  %6526 = vmatprep.subr.bf16.mxu1 %v6960_v17 }
 0xb4c   : > { %6840 = vpow2.f32 %v4210_v14  ;;  %4243 = vadd.xlane.f32.xlu0 %v4242_v47 }
 0xb4d   : > { %6842 = vpow2.f32 %v4212_v56  ;;  %6511 = vmatmul.mubr.msk.bf16.vlgmr.msra.gmra.mrb[104].mxu0 %vm2005_vm5, %v4314_v19 }
 0xb4e   : > { %v6839_v48 = vpop.eup %6838  ;;  %6521 = vmatpush3.bf16.msra.mxu0 %v4630_v3  ;;  %6522 = vmatprep.mubr.msk.bf16.mxu0 %vm6961_vm2, %v6960_v17 }
 0xb4f   : > { %v4160_v32 = vpop.xlane.xlu1 %4159  ;;  %v4163_v58 = vpop.xlane.xlu0 %4162  ;;  %v4245_v51 = vsel %vm2005_vm5, %v6839_v48, 0.0  ;;  %v4315_v34 = vpack.c.bf16 %v6839_v48, %v6839_v48  ;;  %6532 = vmatprep.subr.bf16.mxu0 %v6960_v17 }
 0xb50   : > { %v4190_v55 = vsub.f32 %v8007_v2, %v4160_v32  ;;  %v4191_v61 = vsub.f32 %v8010_v49, %v4163_v58  ;;  %4246 = vadd.xlane.f32.xlu0 %v4245_v51 }
 0xb51   : > { %6517 = vmatmul.mubr.msk.bf16.vlgmr.msra.gmra.mrb[120].mxu1 %vm2005_vm5, %v4315_v34 }
 0xb52   : > { %v4214_v10 = vmul.f32 1.442695, %v4190_v55  ;;  %v4216_v16 = vmul.f32 1.442695, %v4191_v61  ;;  %6527 = vmatpush3.bf16.msra.mxu1 %v4680_v12  ;;  %6528 = vmatprep.mubr.msk.bf16.mxu1 %vm6961_vm2, %v6960_v17 }
 0xb53   : > { %6538 = vmatprep.subr.bf16.mxu1 %v6960_v17  ;;  %v4925_v36 = vpop.permute.xlu1 %4924 }
 0xb54   : > { %6844 = vpow2.f32 %v4214_v10  ;;  %v4930_v19 = vsel %vm2203_vm4, %v4925_v36, 0 }
 0xb55   : > { %6846 = vpow2.f32 %v4216_v16  ;;  %v4230_v16 = vsel %vm2005_vm5, %v8023_v7, 0.0  ;;  %v4233_v7 = vsel %vm2005_vm5, %v8027_v33, 0.0 }
 0xb56   : > { %v6841_v6 = vpop.eup %6840 }
 0xb57   : > { %v6843_v2 = vpop.eup %6842  ;;  %v4169_v13 = vpop.xlane.xlu0 %4168  ;;  %v4248_v49 = vsel %vm2005_vm5, %v6841_v6, 0.0  ;;  %v4316_v18 = vpack.c.bf16 %v6841_v6, %v6841_v6 }
 0xb58   : > { %v4193_v46 = vsub.f32 %v8019_v37, %v4169_v13  ;;  %4249 = vadd.xlane.f32.xlu1 %v4248_v49  ;;  %v4251_v39 = vsel %vm2005_vm5, %v6843_v2, 0.0  ;;  %v4317_v40 = vpack.c.bf16 %v6843_v2, %v6843_v2 }
 0xb59   : > { %4252 = vadd.xlane.f32.xlu0 %v4251_v39  ;;  %6523 = vmatmul.mubr.msk.bf16.vlgmr.msra.gmra.mrb[108].mxu0 %vm2005_vm5, %v4316_v18 }
 0xb5a   : > { %v4220_v25 = vmul.f32 1.442695, %v4193_v46  ;;  %6529 = vmatmul.mubr.msk.bf16.vlgmr.msra.gmra.mrb[124].mxu1 %vm2005_vm5, %v4317_v40  ;;  %6533 = vmatpush3.bf16.msra.mxu0 %v4730_v60 }
 0xb5b   : > { %6539 = vmatpush3.bf16.msra.mxu1 %v4780_v23  ;;  %6534 = vmatprep.mubr.msk.bf16.mxu0 %vm6961_vm2, %v6960_v17  ;;  %v4975_v35 = vpop.permute.xlu0 %4974 }
 0xb5c   : > { %6848 = vpow2.f32 %v4220_v25  ;;  %6544 = vmatprep.subr.bf16.mxu0 %v6960_v17  ;;  %6540 = vmatprep.mubr.msk.bf16.mxu1 %vm6961_vm2, %v6960_v17  ;;  %v4980_v44 = vsel %vm2203_vm4, %v4975_v35, 0 }
 0xb5d   : > { %6550 = vmatprep.subr.bf16.mxu1 %v6960_v17 }
 0xb5e   : > { %v6845_v0 = vpop.eup %6844 }
 0xb5f   : > { %v6847_v37 = vpop.eup %6846  ;;  %v4254_v43 = vsel %vm2005_vm5, %v6845_v0, 0.0  ;;  %v4318_v27 = vpack.c.bf16 %v6845_v0, %v6845_v0 }
 0xb60   : > { %4255 = vadd.xlane.f32.xlu1 %v4254_v43  ;;  %v4257_v15 = vsel %vm2005_vm5, %v6847_v37, 0.0  ;;  %v4319_v29 = vpack.c.bf16 %v6847_v37, %v6847_v37 }
 0xb61   : > { %4258 = vadd.xlane.f32.xlu0 %v4257_v15  ;;  %6535 = vmatmul.mubr.msk.bf16.vlgmr.msra.gmra.mrb[112].mxu0 %vm2005_vm5, %v4318_v27 }
 0xb62   : > { %6541 = vmatmul.mubr.msk.bf16.vlgmr.msra.gmra.mrb[128].mxu1 %vm2005_vm5, %v4319_v29  ;;  %6545 = vmatpush3.bf16.msra.mxu0 %v4830_v45 }
 0xb63   : > { %6551 = vmatpush3.bf16.msra.mxu1 %v4880_v31  ;;  %6552 = vmatprep.mubr.msk.bf16.mxu1 %vm6961_vm2, %v6960_v17 }
 0xb64   : > { %6562 = vmatprep.subr.bf16.mxu1 %v6960_v17  ;;  %6546 = vmatprep.mubr.msk.bf16.mxu0 %vm6961_vm2, %v6960_v17 }
 0xb65   : > { %6556 = vmatprep.subr.bf16.mxu0 %v6960_v17 }
 0xb66   : > { %v6849_v28 = vpop.eup %6848 }
 0xb67   : > { %v4263_v20 = vsel %vm2005_vm5, %v6849_v28, 0.0  ;;  %v4321_v53 = vpack.c.bf16 %v6849_v28, %v6849_v28 }
 0xb68   : > { %4264 = vadd.xlane.f32.xlu0 %v4263_v20 }
 0xb6a   : > { %6553 = vmatmul.mubr.msk.bf16.vlgmr.msra.gmra.mrb[132].mxu1 %vm2005_vm5, %v4321_v53 }
 0xb6b   : > { %6563 = vmatpush3.bf16.msra.mxu1 %v4980_v44  ;;  %6564 = vmatprep.mubr.msk.bf16.mxu1 %vm6961_vm2, %v6960_v17 }
 0xb6c   : > { %6574 = vmatprep.subr.bf16.mxu1 %v6960_v17 }
 0xb84   : > { %v4166_v24 = vpop.xlane.xlu1 %4165 }
 0xb85   : > { %v4192_v38 = vsub.f32 %v8050_v5, %v4166_v24 }
 0xb87   : > { %v4218_v57 = vmul.f32 1.442695, %v4192_v38 }
 0xb88   : > { %v4172_v11 = vpop.xlane.xlu1 %4171 }
 0xb89   : > { %6850 = vpow2.f32 %v4218_v57  ;;  %v4194_v41 = vsub.f32 %v8053_v9, %v4172_v11 }
 0xb8b   : > { %v4222_v59 = vmul.f32 1.442695, %v4194_v41 }
 0xb8c   : > { %v4178_v63 = vpop.xlane.xlu1 %4177  ;;  %v4175_v22 = vpop.xlane.xlu0 %4174 }
 0xb8d   : > { %6852 = vpow2.f32 %v4222_v59  ;;  %v4196_v21 = vsub.f32 %v8061_v1, %v4178_v63  ;;  %v4195_v50 = vsub.f32 %v8058_v52, %v4175_v22 }
 0xb8f   : > { %v4226_v4 = vmul.f32 1.442695, %v4196_v21  ;;  %v4224_v8 = vmul.f32 1.442695, %v4195_v50 }
 0xb90   : > { %v4181_v54 = vpop.xlane.xlu0 %4180  ;;  %v5025_v3 = vpop.permute.xlu1 %5024 }
 0xb91   : > { %6854 = vpow2.f32 %v4226_v4  ;;  %v4197_v14 = vsub.f32 %v8066_v30, %v4181_v54  ;;  %v5030_v61 = vsel %vm2203_vm4, %v5025_v3, 0 }
 0xb92   : > { %6856 = vpow2.f32 %v4224_v8 }
 0xb93   : > { %v6851_v5 = vpop.eup %6850  ;;  %v4228_v56 = vmul.f32 1.442695, %v4197_v14 }
 0xb94   : > { %v4260_v47 = vsel %vm2005_vm5, %v6851_v5, 0.0  ;;  %v4320_v9 = vpack.c.bf16 %v6851_v5, %v6851_v5  ;;  %v5075_v32 = vpop.permute.xlu0 %5074 }
 0xb95   : > { %6858 = vpow2.f32 %v4228_v56  ;;  %4261 = vadd.xlane.f32.xlu1 %v4260_v47  ;;  %v5080_v10 = vsel %vm2203_vm4, %v5075_v32, 0 }
 0xb96   : > { %6547 = vmatmul.mubr.msk.bf16.vlgmr.msra.gmra.mrb[116].mxu0 %vm2005_vm5, %v4320_v9 }
 0xb97   : > { %v6853_v1 = vpop.eup %6852  ;;  %6557 = vmatpush3.bf16.msra.mxu0 %v4930_v19  ;;  %6558 = vmatprep.mubr.msk.bf16.mxu0 %vm6961_vm2, %v6960_v17 }
 0xb98   : > { %v4266_v52 = vsel %vm2005_vm5, %v6853_v1, 0.0  ;;  %6568 = vmatprep.subr.bf16.mxu0 %v6960_v17  ;;  %v4322_v51 = vpack.c.bf16 %v6853_v1, %v6853_v1 }
 0xb99   : > { %4267 = vadd.xlane.f32.xlu1 %v4266_v52 }
 0xb9b   : > { %v6855_v30 = vpop.eup %6854 }
 0xb9c   : > { %v6857_v48 = vpop.eup %6856  ;;  %v4272_v58 = vsel %vm2005_vm5, %v6855_v30, 0.0  ;;  %v4324_v2 = vpack.c.bf16 %v6855_v30, %v6855_v30 }
 0xb9d   : > { %4273 = vadd.xlane.f32.xlu1 %v4272_v58  ;;  %v4269_v34 = vsel %vm2005_vm5, %v6857_v48, 0.0  ;;  %v4323_v55 = vpack.c.bf16 %v6857_v48, %v6857_v48 }
 0xb9e   : > { %4270 = vadd.xlane.f32.xlu0 %v4269_v34  ;;  %6559 = vmatmul.mubr.msk.bf16.vlgmr.msra.gmra.mrb[120].mxu0 %vm2005_vm5, %v4322_v51 }
 0xb9f   : > { %v6859_v12 = vpop.eup %6858  ;;  %6565 = vmatmul.mubr.msk.bf16.vlgmr.msra.gmra.mrb[136].mxu1 %vm2005_vm5, %v4323_v55  ;;  %6569 = vmatpush3.bf16.msra.mxu0 %v5030_v61 }
 0xba0   : > { %6575 = vmatpush3.bf16.msra.mxu1 %v5080_v10  ;;  %v4275_v6 = vsel %vm2005_vm5, %v6859_v12, 0.0  ;;  %6570 = vmatprep.mubr.msk.bf16.mxu0 %vm6961_vm2, %v6960_v17  ;;  %v4325_v49 = vpack.c.bf16 %v6859_v12, %v6859_v12 }
 0xba1   : > { %4231 = vadd.xlane.f32.xlu1 %v4230_v16  ;;  %6576 = vmatprep.mubr.msk.bf16.mxu1 %vm6961_vm2, %v6960_v17 }
 0xba2   : > { %4276 = vadd.xlane.f32.xlu0 %v4275_v6  ;;  %6580 = vmatprep.subr.bf16.mxu0 %v6960_v17 }
 0xba3   : > { %6588 = vmatprep.subr.bf16.mxu1 %v6960_v17 }
 0xba5   : > { %v8178_v13 = vpop.f32.mrb[96].mxu0 }
 0xba6   : > { %4234 = vadd.xlane.f32.xlu0 %v4233_v7  ;;  %v6488_v18 = vpop.f32.mrb[97].mxu0  ;;  %6571 = vmatmul.mubr.msk.bf16.vlgmr.msra.gmra.mrb[124].mxu0 %vm2005_vm5, %v4324_v2 }
 0xba7   : > { %6577 = vmatmul.mubr.msk.bf16.vlgmr.msra.gmra.mrb[140].mxu1 %vm2005_vm5, %v4325_v49  ;;  %v4371_v46 = vpop.f32.mrb[98].mxu0  ;;  %v8184_v39 = vpop.f32.mrb[112].mxu1  ;;  %6584 = vmatprep.mubr.msk.bf16.mxu0 %vm6961_vm2, %v6960_v17 }
 0xba8   : > { %v6489_v40 = vpop.f32.mrb[99].mxu0  ;;  %v6494_v60 = vpop.f32.mrb[113].mxu1  ;;  %6592 = vmatprep.mubr.msk.bf16.mxu1 %vm6961_vm2, %v6960_v17 }
 0xba9   : > { %v4419_v23 = vpop.f32.mrb[114].mxu1 }
 0xbaa   : > { %v6495_v33 = vpop.f32.mrb[115].mxu1 }
 0xbd1   : > { %v4238_v0 = vpop.xlane.xlu1 %4237 }
 0xbd2   : > { %6860 = vrcp.f32 %v4238_v0 }
 0xbd5   : > { %v4241_v25 = vpop.xlane.xlu0 %4240 }
 0xbd6   : > { %6862 = vrcp.f32 %v4241_v25 }
 0xbd9   : > { %v4244_v37 = vpop.xlane.xlu0 %4243 }
 0xbda   : > { %6864 = vrcp.f32 %v4244_v37 }
 0xbdc   : > { %v6861_v45 = vpop.eup %6860 }
 0xbdd   : > { %v4247_v43 = vpop.xlane.xlu0 %4246 }
 0xbde   : > { %6866 = vrcp.f32 %v4247_v43 }
 0xbe0   : > { %v6863_v28 = vpop.eup %6862 }
 0xbe4   : > { %v6865_v22 = vpop.eup %6864 }
 0xbe5   : > { %v4250_v24 = vpop.xlane.xlu1 %4249 }
 0xbe6   : > { %v4253_v11 = vpop.xlane.xlu0 %4252  ;;  %6868 = vrcp.f32 %v4250_v24 }
 0xbe7   : > { %6870 = vrcp.f32 %v4253_v11 }
 0xbe8   : > { %v6867_v50 = vpop.eup %6866 }
 0xbed   : > { %v4256_v56 = vpop.xlane.xlu1 %4255 }
 0xbee   : > { %v4259_v19 = vpop.xlane.xlu0 %4258  ;;  %6872 = vrcp.f32 %v4256_v56 }
 0xbef   : > { %6874 = vrcp.f32 %v4259_v19 }
 0xbf0   : > { %v6869_v1 = vpop.eup %6868 }
 0xbf1   : > { %v6871_v30 = vpop.eup %6870 }
 0xbf8   : > { %v6873_v16 = vpop.eup %6872 }
 0xbf9   : > { %v6875_v2 = vpop.eup %6874 }
 0xc18   : > { %v4466_v27 = vpop.f32.mrb[100].mxu0 }
 0xc19   : > { %v6500_v15 = vpop.f32.mrb[101].mxu0  ;;  %v5124_v20 = vmul.f32 %v6861_v45, %v4466_v27 }
 0xc1a   : > { %v4469_v29 = vpop.f32.mrb[102].mxu0 }
 0xc1b   : > { %v6501_v31 = vpop.f32.mrb[103].mxu0  ;;  %v4265_v29 = vpop.xlane.xlu0 %4264 }
 0xc1c   : > { %v4516_v35 = vpop.f32.mrb[116].mxu1  ;;  %6876 = vrcp.f32 %v4265_v29 }
 0xc1d   : > { %v5125_v53 = vmul.f32 %v6863_v28, %v4516_v35  ;;  %v6506_v44 = vpop.f32.mrb[117].mxu1 }
 0xc1e   : > { %v4519_v36 = vpop.f32.mrb[118].mxu1 }
 0xc1f   : > { %v6701_v38 = vpack.i.bf16 %v5125_v53, %v5124_v20  ;;  %v6507_v57 = vpop.f32.mrb[119].mxu1 }
 0xc20   : > { %v4566_v41 = vpop.f32.mrb[104].mxu0 }
 0xc21   : > { %v6512_v59 = vpop.f32.mrb[105].mxu0  ;;  %6702 = vrot.lane.b32.xlu1 %v6701_v38, %s6971_s1  ;;  %v5126_v8 = vmul.f32 %v6865_v22, %v4566_v41  ;;  %s8410_s1 = smov 28  }
 0xc22   : > { %v4569_v63 = vpop.f32.mrb[106].mxu0  ;;  %v4262_v45 = vpop.xlane.xlu1 %4261  ;;  %v6744_v59 = vld [vmem:[%s8407_s6] sm:$0xff]  }
 0xc23   : > { %v6513_v21 = vpop.f32.mrb[107].mxu0  ;;  %6878 = vrcp.f32 %v4262_v45  ;;  %6581 = vmatpush3.bf16.msra.mxu0 %v6744_v59 }
 0xc24   : > { %v4616_v4 = vpop.f32.mrb[120].mxu1  ;;  %6582 = vmatprep.subr.bf16.mxu0 %v6960_v17 }
 0xc25   : > { %v5127_v54 = vmul.f32 %v6867_v50, %v4616_v4  ;;  %v6518_v14 = vpop.f32.mrb[121].mxu1 }
 0xc26   : > { %v4619_v5 = vpop.f32.mrb[122].mxu1  ;;  %v4268_v31 = vpop.xlane.xlu1 %4267 }
 0xc27   : > { %v6706_v47 = vpack.i.bf16 %v5127_v54, %v5126_v8  ;;  %v6519_v9 = vpop.f32.mrb[123].mxu1  ;;  %6880 = vrcp.f32 %v4268_v31  ;;  %v6877_v35 = vpop.eup %6876 }
 0xc29   : > { %6707 = vrot.lane.b32.xlu0 %v6706_v47, %s6972_s28  ;;  %v6745_v47 = vld [vmem:[%s8407_s6 + $0x8] sm:$0xff]  }
 0xc2a   : > { %v4274_v57 = vpop.xlane.xlu1 %4273  ;;  %6583 = vmatpush3.bf16.msra.mxu0 %v6745_v47  ;;  %v5971_v47 = vld [vmem:[%s8411_s24] ss:$0 sm:$0xff] }
 0xc2b   : > { %v4271_v28 = vpop.xlane.xlu0 %4270  ;;  %6596 = vmatprep.subr.bf16.mxu0 %v6960_v17 }
 0xc2c   : > { %v4666_v52 = vpop.f32.mrb[108].mxu0  ;;  %6882 = vrcp.f32 %v4271_v28 }
 0xc2d   : > { %v5128_v3 = vmul.f32 %v6869_v1, %v4666_v52  ;;  %v4716_v48 = vpop.f32.mrb[124].mxu1  ;;  %v6524_v32 = vpop.f32.mrb[109].mxu0  ;;  %6884 = vrcp.f32 %v4274_v57 }
 0xc2e   : > { %v5129_v58 = vmul.f32 %v6871_v30, %v4716_v48  ;;  %v6530_v51 = vpop.f32.mrb[125].mxu1  ;;  %v4669_v34 = vpop.f32.mrb[110].mxu0 }
 0xc2f   : > { %v4719_v61 = vpop.f32.mrb[126].mxu1  ;;  %v6525_v12 = vpop.f32.mrb[111].mxu0 }
 0xc30   : > { %v6711_v55 = vpack.i.bf16 %v5129_v58, %v5128_v3  ;;  %v6531_v10 = vpop.f32.mrb[127].mxu1  ;;  %v6879_v20 = vpop.eup %6878 }
 0xc31   : > { %v4277_v63 = vpop.xlane.xlu0 %4276  ;;  %v6881_v22 = vpop.eup %6880 }
 0xc32   : > { %6712 = vrot.lane.b32.xlu1 %v6711_v55, %s6973_s20  ;;  %6886 = vrcp.f32 %v4277_v63 }
 0xc34   : > { %v4766_v6 = vpop.f32.mrb[112].mxu0 }
 0xc35   : > { %v5130_v7 = vmul.f32 %v6873_v16, %v4766_v6  ;;  %v4816_v49 = vpop.f32.mrb[128].mxu1  ;;  %v6536_v18 = vpop.f32.mrb[113].mxu0 }
 0xc36   : > { %v5131_v46 = vmul.f32 %v6875_v2, %v4816_v49  ;;  %v6542_v40 = vpop.f32.mrb[129].mxu1  ;;  %v4769_v60 = vpop.f32.mrb[114].mxu0 }
 0xc37   : > { %v4819_v23 = vpop.f32.mrb[130].mxu1  ;;  %v6537_v33 = vpop.f32.mrb[115].mxu0 }
 0xc38   : > { %v6716_v25 = vpack.i.bf16 %v5131_v46, %v5130_v7  ;;  %v6543_v0 = vpop.f32.mrb[131].mxu1  ;;  %v6883_v50 = vpop.eup %6882 }
 0xc39   : > { %v6885_v30 = vpop.eup %6884  ;;  %v4232_v2 = vpop.xlane.xlu1 %4231 }
 0xc3a   : > { %6717 = vrot.lane.b32.xlu1 %v6716_v25, %s6974_s11  ;;  %v4235_v7 = vpop.xlane.xlu0 %4234  ;;  %6888 = vrcp.f32 %v4232_v2 }
 0xc3b   : > { %6890 = vrcp.f32 %v4235_v7  ;;  %v6746_v7 = vld [vmem:[%s7180_s4] sm:$0xff]  }
 0xc3c   : > { %v6887_v48 = vpop.eup %6886  ;;  %6589 = vmatpush3.bf16.msra.mxu1 %v6746_v7 }
 0xc3d   : > { %v4916_v37 = vpop.f32.mrb[132].mxu1  ;;  %6590 = vmatprep.subr.bf16.mxu1 %v6960_v17 }
 0xc3e   : > { %v6554_v43 = vpop.f32.mrb[133].mxu1  ;;  %v5133_v44 = vmul.f32 %v6877_v35, %v4916_v37 }
 0xc3f   : > { %v4919_v27 = vpop.f32.mrb[134].mxu1 }
 0xc40   : > { %v6555_v15 = vpop.f32.mrb[135].mxu1 }
 0xc44   : > { %v6889_v40 = vpop.eup %6888 }
 0xc45   : > { %v6891_v23 = vpop.eup %6890  ;;  %v5122_v27 = vmul.f32 %v6889_v40, %v8178_v13  ;;  %v6750_v40 = vld [vmem:[%s7194_s13 + $0x10] sm:$0xff]  }
 0xc46   : > { %v5123_v15 = vmul.f32 %v6891_v23, %v8184_v39  ;;  %v6752_v23 = vld [vmem:[%s7194_s13 + $0x20] sm:$0xff]  }
 0xc69   : > { %v4866_v53 = vpop.f32.mrb[116].mxu0 }
 0xc6a   : > { %v5132_v36 = vmul.f32 %v6879_v20, %v4866_v53  ;;  %v6548_v24 = vpop.f32.mrb[117].mxu0 }
 0xc6b   : > { %v4869_v38 = vpop.f32.mrb[118].mxu0 }
 0xc6c   : > { %v6721_v11 = vpack.i.bf16 %v5133_v44, %v5132_v36  ;;  %v6549_v41 = vpop.f32.mrb[119].mxu0 }
 0xc6e   : > { %6722 = vrot.lane.b32.xlu1 %v6721_v11, %s8408_s23 }
 0xc71   : > { %v4966_v21 = vpop.f32.mrb[120].mxu0 }
 0xc72   : > { %v5134_v4 = vmul.f32 %v6881_v22, %v4966_v21  ;;  %v5016_v8 = vpop.f32.mrb[136].mxu1  ;;  %v6560_v54 = vpop.f32.mrb[121].mxu0 }
 0xc73   : > { %v5135_v14 = vmul.f32 %v6883_v50, %v5016_v8  ;;  %v6566_v5 = vpop.f32.mrb[137].mxu1  ;;  %v4969_v56 = vpop.f32.mrb[122].mxu0 }
 0xc74   : > { %v5019_v9 = vpop.f32.mrb[138].mxu1  ;;  %v6561_v19 = vpop.f32.mrb[123].mxu0 }
 0xc75   : > { %v6726_v1 = vpack.i.bf16 %v5135_v14, %v5134_v4  ;;  %v6567_v52 = vpop.f32.mrb[139].mxu1 }
 0xc77   : > { %6727 = vrot.lane.b32.xlu0 %v6726_v1, %s8409_s2 }
 0xc79   : > { %v5066_v3 = vpop.f32.mrb[124].mxu0 }
 0xc7a   : > { %v5136_v32 = vmul.f32 %v6885_v30, %v5066_v3  ;;  %v5116_v58 = vpop.f32.mrb[140].mxu1  ;;  %v6572_v51 = vpop.f32.mrb[125].mxu0 }
 0xc7b   : > { %v5137_v34 = vmul.f32 %v6887_v48, %v5116_v58  ;;  %v6578_v55 = vpop.f32.mrb[141].mxu1  ;;  %v5069_v61 = vpop.f32.mrb[126].mxu0 }
 0xc7c   : > { %v5119_v12 = vpop.f32.mrb[142].mxu1  ;;  %v6573_v10 = vpop.f32.mrb[127].mxu0 }
 0xc7d   : > { %v6731_v16 = vpack.i.bf16 %v5137_v34, %v5136_v32  ;;  %v6579_v6 = vpop.f32.mrb[143].mxu1 }
 0xc7f   : > { %6732 = vrot.lane.b32.xlu1 %v6731_v16, %s8410_s1 }
 0xc93   : > { %v6703_v49 = vpop.permute.xlu1 %6702 }
 0xc94   : > { %v6705_v33 = vunpack.i.h.bf16 %v6703_v49  ;;  %v6704_v25 = vunpack.i.l.bf16 %v6703_v49  ;;  %v6747_v49 = vld [vmem:[%s7180_s4 + $0x8] sm:$0xff]  }
 0xc95   : > { %6591 = vmatpush3.bf16.msra.mxu1 %v6747_v49 }
 0xc96   : > { %v5195_v20 = vsel %vm1194_vm3, %v5123_v15, %v6705_v33  ;;  %v5194_v53 = vsel %vm1194_vm3, %v5122_v27, %v6704_v25  ;;  %v6753_v33 = vld [vmem:[%s7194_s13 + $0x28] sm:$0xff]  }
 0xc9b   : > { %v6708_v60 = vpop.permute.xlu0 %6707 }
 0xc9c   : > { %v6710_v0 = vunpack.i.h.bf16 %v6708_v60  ;;  %v6709_v37 = vunpack.i.l.bf16 %v6708_v60  ;;  %v6751_v60 = vld [vmem:[%s7194_s13 + $0x18] sm:$0xff]  }
 0xc9e   : > { %v5197_v24 = vsel %vm2005_vm5, %v5195_v20, %v6710_v0  ;;  %v5196_v38 = vsel %vm2005_vm5, %v5194_v53, %v6709_v37 }
 0xca4   : > { %v6713_v18 = vpop.permute.xlu1 %6712 }
 0xca5   : > { %v6715_v29 = vunpack.i.h.bf16 %v6713_v18  ;;  %v6714_v45 = vunpack.i.l.bf16 %v6713_v18  ;;  %v6748_v18 = vld [vmem:[%s7194_s13] sm:$0xff]  }
 0xca7   : > { %v5199_v13 = vsel %vm3043_vm6, %v5197_v24, %v6715_v29  ;;  %v5198_v39 = vsel %vm3043_vm6, %v5196_v38, %v6714_v45  ;;  %v5301_v29 = vsub.s32 2, %v7217_v26  ;;  %v6755_v26 = vld [vmem:[%s7194_s13 + $0x38] sm:$0xff]  }
 0xcac   : > { %v6718_v46 = vpop.permute.xlu1 %6717 }
 0xcad   : > { %v6720_v28 = vunpack.i.h.bf16 %v6718_v46  ;;  %v6719_v35 = vunpack.i.l.bf16 %v6718_v46  ;;  %v6749_v46 = vld [vmem:[%s7194_s13 + $0x8] sm:$0xff]  }
 0xcaf   : > { %v5201_v41 = vsel %vm3046_vm7, %v5199_v13, %v6720_v28  ;;  %v5200_v59 = vsel %vm3046_vm7, %v5198_v39, %v6719_v35  ;;  %v6754_v39 = vld [vmem:[%s7194_s13 + $0x30] sm:$0xff]   ;;  %s8414_s13 = scalar_lea.vmem %s8413_s12, %s7118_s0 }
 0xce0   : > { %v6723_v43 = vpop.permute.xlu1 %6722 }
 0xce1   : > { %v6725_v44 = vunpack.i.h.bf16 %v6723_v43  ;;  %v6724_v36 = vunpack.i.l.bf16 %v6723_v43 }
 0xce3   : > { %v5203_v22 = vsel %vm3049_vm8, %v5201_v41, %v6725_v44  ;;  %v5202_v21 = vsel %vm3049_vm8, %v5200_v59, %v6724_v36  ;;  %v6901_v36 = vld [vmem:[%s7130_s30] sm:$0x7] }
 0xce4   : > { %v5308_v24 = vrot.slane %v6901_v36, %v5301_v29  ;;  %v5975_v41 = vld [vmem:[%s8412_s14] ss:$0 sm:$0xff] }
 0xce9   : > { %v6728_v31 = vpop.permute.xlu0 %6727 }
 0xcea   : > { %v6730_v57 = vunpack.i.h.bf16 %v6728_v31  ;;  %v6729_v11 = vunpack.i.l.bf16 %v6728_v31  ;;  %v6900_v31 = vld [vmem:[%s7125_s25] sm:$0x7] }
 0xceb   : > { %v5302_v28 = vrot.slane %v6900_v31, %v5301_v29 }
 0xcec   : > { %v5205_v8 = vsel %vm3052_vm9, %v5203_v22, %v6730_v57  ;;  %v5204_v54 = vsel %vm3052_vm9, %v5202_v21, %v6729_v11 }
 0xcf1   : > { %v6733_v63 = vpop.permute.xlu1 %6732 }
 0xcf2   : > { %v6735_v50 = vunpack.i.h.bf16 %v6733_v63  ;;  %v6734_v4 = vunpack.i.l.bf16 %v6733_v63 }
 0xcf4   : > { %v5207_v14 = vsel %vm3055_vm10, %v5205_v8, %v6735_v50  ;;  %v5206_v5 = vsel %vm3055_vm10, %v5204_v54, %v6734_v4 }
 0xcf5   : > { %v5208_v56 = vpack.c.bf16 %v5207_v14, %v5206_v5 }
 0xcf7   : > { %6585 = vmatmul.mubr.msk.bf16.vlgmr.msra.gmra.mrb[128].mxu0 %vm1045_vm1, %v5208_v56 }
 0xcf8   : > { %6612 = vmatprep.mubr.msk.bf16.mxu0 %vm6961_vm2, %v6960_v17  ;;  %6597 = vmatpush3.bf16.msra.mxu0 %v6748_v18 }
 0xcf9   : > { %6598 = vmatprep.subr.bf16.mxu0 %v6960_v17 }
 0xcfc   : > { %6599 = vmatpush3.bf16.msra.mxu0 %v6749_v46 }
 0xcfd   : > { %6600 = vmatprep.subr.bf16.mxu0 %v6960_v17 }
 0xd00   : > { %6601 = vmatpush3.bf16.msra.mxu0 %v6750_v40 }
 0xd01   : > { %6602 = vmatprep.subr.bf16.mxu0 %v6960_v17 }
 0xd04   : > { %6603 = vmatpush3.bf16.msra.mxu0 %v6751_v60 }
 0xd05   : > { %6604 = vmatprep.subr.bf16.mxu0 %v6960_v17 }
 0xd08   : > { %6605 = vmatpush3.bf16.msra.mxu0 %v6752_v23 }
 0xd09   : > { %6606 = vmatprep.subr.bf16.mxu0 %v6960_v17 }
 0xd0c   : > { %6607 = vmatpush3.bf16.msra.mxu0 %v6753_v33 }
 0xd0d   : > { %6608 = vmatprep.subr.bf16.mxu0 %v6960_v17 }
 0xd10   : > { %6609 = vmatpush3.bf16.msra.mxu0 %v6754_v39 }
 0xd11   : > { %6610 = vmatprep.subr.bf16.mxu0 %v6960_v17  ;;  %v5979_v17 = vld [vmem:[%s8414_s13] ss:$0 sm:$0xff] }
 0xd14   : > { %6611 = vmatpush3.bf16.msra.mxu0 %v6755_v26 }
 0xdca   : > { %v5264_v9 = vpop.f32.mrb[128].mxu0 }
 0xdcb   : > { %v5265_v19 = vadd.f32 %v5971_v47, %v5264_v9  ;;  %v6586_v1 = vpop.f32.mrb[129].mxu0 }
 0xdcc   : > { %v5267_v52 = vpop.f32.mrb[130].mxu0 }
 0xdcd   : > { %v8226_v30 = vadd.f32 %v5265_v19, %v7744_v62  ;;  %v5268_v3 = vadd.f32 %v5971_v47, %v5267_v52  ;;  %v6587_v48 = vpop.f32.mrb[131].mxu0 }
 0xdcf   : > { %v8229_v32 = vadd.f32 %v5268_v3, %v7746_v42  ;;  %v5273_v58 = vsel %vm1045_vm1, %v8226_v30, 0.0 }
 0xdd0   : > { %5274 = vadd.xlane.f32.xlu0 %v5273_v58 }
 0xdd1   : > { %v5276_v51 = vsel %vm1045_vm1, %v8229_v32, 0.0 }
 0xdd2   : > { %5277 = vadd.xlane.f32.xlu1 %v5276_v51 }
 0xe5d   : > { %v5275_v34 = vpop.xlane.xlu0 %5274 }
 0xe5e   : > { %v5279_v55 = vmul.f32 0.03125, %v5275_v34 }
 0xe5f   : > { %v5278_v62 = vpop.xlane.xlu1 %5277 }
 0xe60   : > { %v5281_v61 = vsub.f32 %v8226_v30, %v5279_v55  ;;  %v5280_v12 = vmul.f32 0.03125, %v5278_v62 }
 0xe62   : > { %v5282_v42 = vsub.f32 %v8229_v32, %v5280_v12  ;;  %v5283_v10 = vmul.f32 %v5281_v61, %v5281_v61 }
 0xe64   : > { %v5285_v16 = vsel %vm1045_vm1, %v5283_v10, 0.0  ;;  %v5284_v6 = vmul.f32 %v5282_v42, %v5282_v42 }
 0xe65   : > { %5286 = vadd.xlane.f32.xlu0 %v5285_v16 }
 0xe66   : > { %v5288_v2 = vsel %vm1045_vm1, %v5284_v6, 0.0 }
 0xe69   : > { %5289 = vadd.xlane.f32.xlu0 %v5288_v2 }
 0xef2   : > { %v5287_v25 = vpop.xlane.xlu0 %5286 }
 0xef3   : > { %v5291_v0 = vmul.f32 0.03125, %v5287_v25 }
 0xef5   : > { %v5293_v37 = vadd.f32 1e-06, %v5291_v0 }
 0xef6   : > { %v5290_v43 = vpop.xlane.xlu0 %5289 }
 0xef7   : > { %6892 = vrsqrt.f32 %v5293_v37  ;;  %v5292_v27 = vmul.f32 0.03125, %v5290_v43 }
 0xef9   : > { %v5294_v15 = vadd.f32 1e-06, %v5292_v27 }
 0xefb   : > { %6894 = vrsqrt.f32 %v5294_v15 }
 0xf01   : > { %v6893_v45 = vpop.eup %6892 }
 0xf02   : > { %v5297_v35 = vmul.f32 %v6893_v45, %v5281_v61 }
 0xf04   : > { %v5303_v53 = vmul.f32 %v5302_v28, %v5297_v35 }
 0xf05   : > { %v6895_v20 = vpop.eup %6894 }
 0xf06   : > { %v5298_v44 = vmul.f32 %v6895_v20, %v5282_v42  ;;  %v5309_v57 = vadd.f32 %v5308_v24, %v5303_v53 }
 0xf08   : > { %v5304_v38 = vmul.f32 %v5302_v28, %v5298_v44 }
 0xf0a   : > { %v5310_v11 = vadd.f32 %v5308_v24, %v5304_v38 }
 0xf0c   : > { %v5311_v13 = vpack.c.bf16 %v5310_v11, %v5309_v57 }
 0xf0e   : > { %6593 = vmatmul.mubr.msk.bf16.vlgmr.msra.gmra.mrb[144].mxu1 %vm1045_vm1, %v5311_v13 }
 0xfe1   : > { %v5372_v59 = vpop.f32.mrb[144].mxu1 }
 0xfe2   : > { %v5373_v63 = vadd.f32 %v5975_v41, %v5372_v59  ;;  %v6594_v22 = vpop.f32.mrb[145].mxu1 }
 0xfe3   : > { %v5375_v21 = vpop.f32.mrb[146].mxu1 }
 0xfe4   : > { %v5376_v50 = vadd.f32 %v5975_v41, %v5375_v21  ;;  %v6595_v4 = vpop.f32.mrb[147].mxu1  ;;  %v5379_v8 = vmax.f32 %v5373_v63, 0.0 }
 0xfe6   : > { %v5380_v54 = vmax.f32 %v5376_v50, 0.0 }
 0xfe8   : > { %v5381_v14 = vpack.c.bf16 %v5380_v54, %v5379_v8 }
 0xfea   : > { %6613 = vmatmul.mubr.bf16.vlgmr.msra.gmra.mrb[132].mxu0 %v5381_v14 }
0x10bc   : > { %5499 = sbr.rel (%p5988_p6) target bundleno = 4293 (0x10c5), region = 116 }
0x10bd   : > { %v5487_v5 = vpop.f32.mrb[132].mxu0 }
0x10be   : > { %v5488_v56 = vadd.f32 %v5979_v17, %v5487_v5  ;;  %v6614_v47 = vpop.f32.mrb[133].mxu0 }
0x10bf   : > { %v5490_v9 = vpop.f32.mrb[134].mxu0 }
0x10c0   : > { %v5494_v19 = vadd.f32 %v5488_v56, %v8226_v30  ;;  %v5491_v1 = vadd.f32 %v5979_v17, %v5490_v9  ;;  %v6615_v52 = vpop.f32.mrb[135].mxu0 }
0x10c2   : > { %v5495_v3 = vadd.f32 %v5491_v1, %v8229_v32  ;;  %5500 = vst.msk [vmem:[#allocation2] sm:$0xff] (!%p5988_p6), %vm1045_vm1, %v5494_v19 }
0x10c4   : > { %5501 = vst.msk [vmem:[#allocation2 + $0x8] sm:$0xff] %vm1045_vm1, %v5495_v3 }
0x10c5 PF: > { %s8416_s0 = sld [smem:[#allocation5_spill]] }
0x10cb   : > { %p5989_p7 = scmp.ne.s32.totalorder %s8416_s0, 1 }
0x10cc   : > { %v5508_v48 = vsel (!%p5989_p7), %vm1045_vm1, %v5494_v19, 0.0  ;;  %v5511_v30 = vsel (!%p5989_p7), %vm1045_vm1, %v5495_v3, 0.0  ;;  %s8417_s26 = sld [smem:[#allocation25_spill]] (!%p5989_p7)  ;;  %s8418_s6 = sld [smem:[#allocation26_spill]] (!%p5989_p7) }
0x10cd   : > { %5505 = sbr.rel (%p5989_p7) target bundleno = 4618 (0x120a), region = 120  ;;  %5509 = vadd.xlane.f32.xlu0 (!%p5989_p7), %v5508_v48 }
0x10d1   : > { %5512 = vadd.xlane.f32.xlu0 (!%p5989_p7), %v5511_v30 }
0x10d2   : > { %v5990_v40 = vld [vmem:[%s8417_s26] ss:$0 sm:$0xff] (!%p5989_p7) }
0x10d3   : > { %v5991_v23 = vld [vmem:[%s8418_s6] ss:$0 sm:$0xff] (!%p5989_p7) }
0x115a   : > { %v5510_v58 = vpop.xlane.xlu0 %5509 }
0x115b   : > { %v5514_v51 = vmul.f32 0.03125, %v5510_v58 }
0x115d   : > { %v5516_v32 = vsub.f32 %v5494_v19, %v5514_v51 }
0x115e   : > { %v5513_v34 = vpop.xlane.xlu0 %5512 }
0x115f   : > { %v5515_v55 = vmul.f32 0.03125, %v5513_v34  ;;  %v5518_v62 = vmul.f32 %v5516_v32, %v5516_v32 }
0x1161   : > { %v5517_v61 = vsub.f32 %v5495_v3, %v5515_v55  ;;  %v5520_v12 = vsel %vm1045_vm1, %v5518_v62, 0.0 }
0x1162   : > { %5521 = vadd.xlane.f32.xlu1 %v5520_v12 }
0x1163   : > { %v5519_v42 = vmul.f32 %v5517_v61, %v5517_v61 }
0x1165   : > { %v5523_v10 = vsel %vm1045_vm1, %v5519_v42, 0.0 }
0x1166   : > { %5524 = vadd.xlane.f32.xlu1 %v5523_v10 }
0x11ef   : > { %v5522_v16 = vpop.xlane.xlu1 %5521 }
0x11f0   : > { %v5526_v6 = vmul.f32 0.03125, %v5522_v16 }
0x11f2   : > { %v5528_v2 = vadd.f32 1e-05, %v5526_v6 }
0x11f3   : > { %v5525_v7 = vpop.xlane.xlu1 %5524 }
0x11f4   : > { %6902 = vrsqrt.f32 %v5528_v2  ;;  %v5527_v49 = vmul.f32 0.03125, %v5525_v7 }
0x11f6   : > { %v5529_v18 = vadd.f32 1e-05, %v5527_v49 }
0x11f8   : > { %6904 = vrsqrt.f32 %v5529_v18 }
0x11fe   : > { %v6903_v46 = vpop.eup %6902 }
0x11ff   : > { %v5532_v60 = vmul.f32 %v6903_v46, %v5516_v32 }
0x1201   : > { %v5540_v33 = vmul.f32 %v5990_v40, %v5532_v60 }
0x1202   : > { %v6905_v25 = vpop.eup %6904 }
0x1203   : > { %v5548_v0 = vadd.f32 %v5991_v23, %v5540_v33  ;;  %v5533_v37 = vmul.f32 %v6905_v25, %v5517_v61 }
0x1205   : > { %5550 = vst.msk [vmem:[#allocation2] sm:$0xff] %vm1045_vm1, %v5548_v0  ;;  %v5541_v43 = vmul.f32 %v5990_v40, %v5533_v37 }
0x1207   : > { %v5549_v27 = vadd.f32 %v5991_v23, %v5541_v43 }
0x1209   : > { %5551 = vst.msk [vmem:[#allocation2 + $0x8] sm:$0xff] %vm1045_vm1, %v5549_v27 }
0x120a PF: > { %s8419_s23 = sld [smem:[#allocation7_spill]]  ;;  %s6978_s20 = smov [#allocation2]  }
0x120b   : > { %s5561_s11 = sshll.u32 %s6978_s20, 4  ;;  %s5562_s11 = int_to_ptr.vmem [resolvable:$true] %s5561_s11 }
0x120c   : > { %s6906_s24 = scalar_lea.vmem %s5562_s11, 256  ;;  %p6913_p12 = scmp.lt.s32.totalorder %s5562_s11, %s5562_s11 }
0x120d   : > { %p6907_p9 = scmp.ne.s32.totalorder %s5562_s11, %s6906_s24  ;;  %p6914_p13 = scmp.lt.s32.totalorder %s6906_s24, %s6906_s24 }
0x120f   : > { %p6915_p0 = por %p6914_p13, %p6913_p12 }
0x1210   : > { %s8420_s2 = sadd.s32 4294967295, %s8419_s23  }
0x1211   : > { %p8291_p8 = scmp.eq.s32.totalorder %s8420_s2, 1 }
0x1213   : > { %p6908_p10 = pnand %p6907_p9, %p8291_p8 }
0x1215   : > { %p6909_p11 = pneg %p6908_p10 }
0x1217   : > { %p6916_p1 = pnand %p6915_p0, %p6909_p11 }
0x1219   : > { %6919 = shalt.err (!%p6916_p1)
}
0x121a   : > { %s8422_s14 = sld [smem:[#allocation27_spill]] }
0x1220   : > { %s6920_s30 = scalar_lea.hbm %s8422_s14, 256 }
0x1221   : > { %p6921_p2 = scmp.ne.s32.totalorder %s8422_s14, %s6920_s30  ;;  %p6926_p5 = scmp.lt.u32.totalorder %s6920_s30, %s8422_s14 }
0x1223   : > { %p6922_p3 = pnand %p6921_p2, %p8291_p8 }
0x1225   : > { %p6923_p4 = pneg %p6922_p3 }
0x1227   : > { %p6928_p6 = pnand %p6926_p5, %p6923_p4 }
0x1229   : > { %6931 = shalt.err (!%p6928_p6)
}
0x122a   : > { %s6979_s0 = smov 128  }
0x122b   : > { %6617 = dma.vmem_to_hbm [thread:$0]  (%p8291_p8), %s5562_s11, 256, %s8422_s14, [#allocation3], %s6979_s0, %s6979_s0, %s6972_s28  }
0x122c   : > { %6945 = dma.done.wait (%p8291_p8), [#allocation3], 256  }
0x122d   : > { %6947 = vsyncadd (%p8291_p8), [#allocation3], 4294967040 }
0x122e PF: > { %s8423_s26 = sld [smem:[#allocation7_spill]]  ;;  %s8424_s3 = sld [smem:[#allocation6_spill]] }
0x122f   : > { %s8425_s28 = sld [smem:[#allocation8_spill]] }
0x1234   : > { %s33_s29 = sadd.s32 1, %s8423_s26  }
0x1235   : > { %p30_p7 = scmp.ge.s32.totalorder %s33_s29, 4  }
0x1237   :  { %32 = sbr.rel (!%p30_p7) target bundleno = 21 (0x15), region = 205 }
0x123e   :  { %5577 = vsyncpa [#allocation3], 1 }
0x123f   :  { %5579 = vsyncpa [#allocation3 + $0x1], 1 }

</bundles_post_ra>
